<compile_context>
chip_gen: v7x
topology: tpu7x:2x2x1
jax: 0.10.0
libtpu: 0.0.40
codegen_flags: <defaults>
</compile_context>

<pallas_src>
import jax
import jax.numpy as jnp
from jax.experimental import pallas as pl
from jax.experimental.pallas import tpu as pltpu

# ---- configuration (scaled-down but structurally identical to the module) ----
FEATURE_DIM = 128            # stands in for 2048
MAX_LENGTH  = 16             # stands in for 49 (7x7 spatial) -> here 4x4 patches
TOTAL_LEN   = 2 * MAX_LENGTH # self.total_length
N_HEADS     = 8              # nn.TransformerEncoderLayer(nhead=8)
HEAD_DIM    = FEATURE_DIM // N_HEADS
FFN_DIM     = FEATURE_DIM    # torch default dim_feedforward == 2048 == feature_dim
N_LAYERS    = 2              # self.fusion_layers
NUM_CLASSES = 10             # fc2 out_features
OUT_PAD     = 128            # lane-dense padded classifier width (== FEATURE_DIM)
PATCH       = 4
IN_CH       = 3
KPP         = IN_CH * PATCH * PATCH
LN_EPS      = 1e-5

# packed-vector row indices
#   global slab (8, E):   0 ln_g, 1 ln_b, 2 fc1_b, 3 fc2_b(padded)
#   per-layer slab (NL,10,E): 0 q_b, 1 k_b, 2 v_b, 3 out_b, 4 ln1_g, 5 ln1_b,
#                             6 ffn_b1, 7 ffn_b2, 8 ln2_g, 9 ln2_b


# ------------------------------ fused kernel ----------------------------------

def _layernorm(y, g, b):
    mu = jnp.mean(y, axis=-1, keepdims=True)
    d = y - mu
    var = jnp.mean(d * d, axis=-1, keepdims=True)
    return d * jax.lax.rsqrt(var + LN_EPS) * g + b


def _fused_kernel(p1_ref, p2_ref, c1w_ref, c2w_ref, emb_ref,
                  inw_ref, outw_ref, w1_ref, w2_ref,
                  fc1w_ref, fc2w_ref, vg_ref, vl_ref, o_ref):
    """One batch element per grid step (grid=(B,), 'parallel')."""
    E, S, H, hd = FEATURE_DIM, TOTAL_LEN, N_HEADS, HEAD_DIM

    # ---- backbone stand-in stems: patch-embedding matmuls (see TODO(synk)) ----
    x1 = jnp.dot(p1_ref[0], c1w_ref[...], preferred_element_type=jnp.float32)  # (L,E)
    x2 = jnp.dot(p2_ref[0], c2w_ref[...], preferred_element_type=jnp.float32)  # (L,E)

    # ---- token fusion + (pos + modality [+ folded stem bias]) embedding -------
    x = jnp.concatenate([x1, x2], axis=0) + emb_ref[...]        # (S, E)
    x = _layernorm(x, vg_ref[0:1, :], vg_ref[1:2, :])           # input LayerNorm

    # ---- 2 x nn.TransformerEncoderLayer (post-LN, ReLU FFN, eval dropout=id) --
    for l in range(N_LAYERS):
        vl = vl_ref[l]                                          # (10, E)
        qkv = jnp.dot(x, inw_ref[l], preferred_element_type=jnp.float32)  # (S,3E)
        q = qkv[:, 0:E]       + vl[0:1, :]    # q pre-scaled by 1/sqrt(hd) at init
        k = qkv[:, E:2 * E]   + vl[1:2, :]
        v = qkv[:, 2 * E:3 * E] + vl[2:3, :]

        # per-head attention; contexts gathered along lanes, so the output
        # projection is ONE full-K (S,E)@(E,E) matmul instead of 8 K=16 ones.
        ctx_parts = []
        for h in range(H):                                      # static, H=8
            qh = q[:, h * hd:(h + 1) * hd]
            kh = k[:, h * hd:(h + 1) * hd]
            vh = v[:, h * hd:(h + 1) * hd]
            s = jax.lax.dot_general(qh, kh, (((1,), (1,)), ((), ())),
                                    preferred_element_type=jnp.float32)  # (S,S)
            s = s - jnp.max(s, axis=-1, keepdims=True)
            p = jnp.exp(s)
            p = p / jnp.sum(p, axis=-1, keepdims=True)          # exact softmax
            ctx_parts.append(jnp.dot(p, vh, preferred_element_type=jnp.float32))
        ctx = jnp.concatenate(ctx_parts, axis=-1)               # (S, E)
        attn = jnp.dot(ctx, outw_ref[l],
                       preferred_element_type=jnp.float32) + vl[3:4, :]

        x = _layernorm(x + attn, vl[4:5, :], vl[5:6, :])        # norm1
        h1 = jnp.maximum(
            jnp.dot(x, w1_ref[l], preferred_element_type=jnp.float32) + vl[6:7, :],
            0.0)
        h2 = jnp.dot(h1, w2_ref[l], preferred_element_type=jnp.float32) + vl[7:8, :]
        x = _layernorm(x + h2, vl[8:9, :], vl[9:10, :])         # norm2

    # ---- tail: relu(mean_{tokens 1:}(fc1(x))) @ fc2  --------------------------
    # fc1 commuted with the (linear) token mean; mean over tokens[1:] computed
    # as (sum over all S - token0)/(S-1).  Matching the reference, token 0 is
    # excluded even though no CLS token is prepended in forward().
    tot = jnp.sum(x, axis=0, keepdims=True)                     # (1, E)
    pooled = (tot - x[0:1, :]) * (1.0 / (S - 1))                # (1, E)
    y = jnp.maximum(
        jnp.dot(pooled, fc1w_ref[...], preferred_element_type=jnp.float32)
        + vg_ref[2:3, :], 0.0)
    logits = (jnp.dot(y, fc2w_ref[...], preferred_element_type=jnp.float32)
              + vg_ref[3:4, :])                                 # (1, OUT_PAD)
    o_ref[0] = logits


# ------------------------------ glue / params ---------------------------------

def _patchify(img, patch):
    """NCHW image -> (B, L, C*p*p) non-overlapping patches, row-major order."""
    B, C, Hh, Ww = img.shape
    hp, wp = Hh // patch, Ww // patch
    x = img.reshape(B, C, hp, patch, wp, patch)
    x = x.transpose(0, 2, 4, 1, 3, 5)            # (B, hp, wp, C, p, p)
    return x.reshape(B, hp * wp, C * patch * patch)


def init_params(key):
    keys = iter(jax.random.split(key, 32))

    def nrm(shape, scale):
        return (scale * jax.random.normal(next(keys), shape)).astype(jnp.float32)

    E, F, NL, S, L = FEATURE_DIM, FFN_DIM, N_LAYERS, TOTAL_LEN, MAX_LENGTH

    # backbone stand-in patch-embed stems (see TODO(synk) at top)
    conv1_w = nrm((KPP, E), (2.0 / KPP) ** 0.5)
    conv2_w = nrm((KPP, E), (2.0 / KPP) ** 0.5)
    conv1_b = nrm((E,), 0.02)
    conv2_b = nrm((E,), 0.02)

    # position / modality embedding tables (nn.Embedding default N(0,1)),
    # pre-combined row-wise; stem biases folded in (exact, zero runtime cost).
    pos_emb = nrm((S, E), 1.0)
    mod_emb = nrm((2, E), 1.0)
    mod_ids = jnp.concatenate(
        [jnp.zeros((L,), jnp.int32), jnp.ones((L,), jnp.int32)])
    emb = pos_emb + mod_emb[mod_ids]
    emb = emb.at[:L, :].add(conv1_b).at[L:, :].add(conv2_b)

    # packed qkv projection with the 1/sqrt(head_dim) score scale folded into
    # the q columns (zero runtime cost).
    scale = 1.0 / (HEAD_DIM ** 0.5)
    in_w = nrm((NL, E, 3 * E), (1.0 / E) ** 0.5)
    in_w = in_w.at[:, :, :E].multiply(scale)
    in_b = nrm((NL, 3 * E), 0.02)
    in_b = in_b.at[:, :E].multiply(scale)

    out_w = nrm((NL, E, E), (1.0 / E) ** 0.5)
    out_b = nrm((NL, E), 0.02)
    ffn_w1 = nrm((NL, E, F), (1.0 / E) ** 0.5)
    ffn_b1 = nrm((NL, F), 0.02)
    ffn_w2 = nrm((NL, F, E), (1.0 / F) ** 0.5)
    ffn_b2 = nrm((NL, E), 0.02)

    fc1_w = nrm((E, E), (2.0 / E) ** 0.5)        # kaiming_normal_(fan_in)
    fc1_b = nrm((E,), 0.02)
    fc2_w = nrm((E, NUM_CLASSES), (1.0 / E) ** 0.5)
    fc2_b = nrm((NUM_CLASSES,), 0.02)
    # pad classifier to a lane-dense 128-wide output (sliced back in wrapper)
    fc2_w_pad = jnp.zeros((E, OUT_PAD), jnp.float32).at[:, :NUM_CLASSES].set(fc2_w)
    fc2_b_pad = jnp.zeros((OUT_PAD,), jnp.float32).at[:NUM_CLASSES].set(fc2_b)

    # packed global small vectors (8, E): rows [ln_g, ln_b, fc1_b, fc2_b_pad, 0..]
    zeros_e = jnp.zeros((E,), jnp.float32)
    vecs_g = jnp.stack([jnp.ones((E,), jnp.float32), zeros_e, fc1_b, fc2_b_pad,
                        zeros_e, zeros_e, zeros_e, zeros_e], axis=0)

    # packed per-layer small vectors (NL, 10, E)
    vecs_l = jnp.stack([
        in_b[:, 0:E], in_b[:, E:2 * E], in_b[:, 2 * E:3 * E], out_b,
        jnp.ones((NL, E), jnp.float32), jnp.zeros((NL, E), jnp.float32),
        ffn_b1, ffn_b2,
        jnp.ones((NL, E), jnp.float32), jnp.zeros((NL, E), jnp.float32),
    ], axis=1).astype(jnp.float32)

    return {
        "conv1_w": conv1_w, "conv2_w": conv2_w, "emb": emb.astype(jnp.float32),
        "in_w": in_w, "out_w": out_w,
        "ffn_w1": ffn_w1, "ffn_w2": ffn_w2,
        "fc1_w": fc1_w, "fc2_w": fc2_w_pad,
        "vecs_g": vecs_g, "vecs_l": vecs_l,
    }


# --------------------------------- forward ------------------------------------

def forward(params, image1, image2):
    B = image1.shape[0]
    E, F, NL, S, L = FEATURE_DIM, FFN_DIM, N_LAYERS, TOTAL_LEN, MAX_LENGTH
    p1 = _patchify(image1, PATCH)                 # (B, L, KPP)
    p2 = _patchify(image2, PATCH)

    rep2 = lambda b: (0, 0)
    rep3 = lambda b: (0, 0, 0)
    in_specs = [
        pl.BlockSpec((1, L, KPP), lambda b: (b, 0, 0)),   # p1
        pl.BlockSpec((1, L, KPP), lambda b: (b, 0, 0)),   # p2
        pl.BlockSpec((KPP, E), rep2),                     # conv1_w
        pl.BlockSpec((KPP, E), rep2),                     # conv2_w
        pl.BlockSpec((S, E), rep2),                       # emb (pos+mod+stem bias)
        pl.BlockSpec((NL, E, 3 * E), rep3),               # in_w
        pl.BlockSpec((NL, E, E), rep3),                   # out_w
        pl.BlockSpec((NL, E, F), rep3),                   # ffn_w1
        pl.BlockSpec((NL, F, E), rep3),                   # ffn_w2
        pl.BlockSpec((E, E), rep2),                       # fc1_w
        pl.BlockSpec((E, OUT_PAD), rep2),                 # fc2_w (padded)
        pl.BlockSpec((8, E), rep2),                       # packed global vectors
        pl.BlockSpec((NL, 10, E), rep3),                  # packed per-layer vectors
    ]

    out = pl.pallas_call(
        _fused_kernel,
        grid=(B,),
        out_shape=jax.ShapeDtypeStruct((B, 1, OUT_PAD), jnp.float32),
        in_specs=in_specs,
        out_specs=pl.BlockSpec((1, 1, OUT_PAD), lambda b: (b, 0, 0)),
        compiler_params=pltpu.CompilerParams(
            dimension_semantics=("parallel",),
            vmem_limit_bytes=32 * 1024 * 1024),
    )(p1, p2,
      params["conv1_w"], params["conv2_w"], params["emb"],
      params["in_w"], params["out_w"], params["ffn_w1"], params["ffn_w2"],
      params["fc1_w"], params["fc2_w"], params["vecs_g"], params["vecs_l"])

    return out[:, 0, :NUM_CLASSES]                # slice padded logits to 10


# ----------------------------------- main --------------------------------------

if __name__ == "__main__":
    key = jax.random.PRNGKey(0)
    kp, k1, k2 = jax.random.split(key, 3)
    params = init_params(kp)
    image1 = jax.random.normal(k1, (2, IN_CH, 16, 16), jnp.float32)
    image2 = jax.random.normal(k2, (2, IN_CH, 16, 16), jnp.float32)

    out = jax.jit(forward)(params, image1, image2)
    jax.block_until_ready(out)
    assert out.shape == (2, NUM_CLASSES) and out.dtype == jnp.float32
    assert bool(jnp.all(jnp.isfinite(out)))
    print("KERNEL_OK")
</pallas_src>

<mosaic_0001>
module attributes {stable_mosaic.version = 11 : i64} {
  func.func @_fused_kernel(%arg0: i32, %arg1: memref<1x16x48xf32, #tpu.memory_space<vmem>>, %arg2: memref<1x16x48xf32, #tpu.memory_space<vmem>>, %arg3: memref<48x128xf32, #tpu.memory_space<vmem>>, %arg4: memref<48x128xf32, #tpu.memory_space<vmem>>, %arg5: memref<32x128xf32, #tpu.memory_space<vmem>>, %arg6: memref<2x128x384xf32, #tpu.memory_space<vmem>>, %arg7: memref<2x128x128xf32, #tpu.memory_space<vmem>>, %arg8: memref<2x128x128xf32, #tpu.memory_space<vmem>>, %arg9: memref<2x128x128xf32, #tpu.memory_space<vmem>>, %arg10: memref<128x128xf32, #tpu.memory_space<vmem>>, %arg11: memref<128x128xf32, #tpu.memory_space<vmem>>, %arg12: memref<8x128xf32, #tpu.memory_space<vmem>>, %arg13: memref<2x10x128xf32, #tpu.memory_space<vmem>>, %arg14: memref<1x1x128xf32, #tpu.memory_space<vmem>>) attributes {dimension_semantics = [#tpu.dimension_semantics<parallel>], iteration_bounds = array<i64: 2>, scalar_prefetch = 0 : i64, scratch_operands = 0 : i64, tpu.core_type = #tpu.core_type<tc>, window_params = [{transform_indices = @transform_0, window_bounds = array<i64: 1, 16, 48>}, {transform_indices = @transform_1, window_bounds = array<i64: 1, 16, 48>}, {pipeline_mode = #tpu.pipeline_mode<synchronous>, transform_indices = @transform_2, window_bounds = array<i64: 48, 128>}, {pipeline_mode = #tpu.pipeline_mode<synchronous>, transform_indices = @transform_3, window_bounds = array<i64: 48, 128>}, {pipeline_mode = #tpu.pipeline_mode<synchronous>, transform_indices = @transform_4, window_bounds = array<i64: 32, 128>}, {pipeline_mode = #tpu.pipeline_mode<synchronous>, transform_indices = @transform_5, window_bounds = array<i64: 2, 128, 384>}, {pipeline_mode = #tpu.pipeline_mode<synchronous>, transform_indices = @transform_6, window_bounds = array<i64: 2, 128, 128>}, {pipeline_mode = #tpu.pipeline_mode<synchronous>, transform_indices = @transform_7, window_bounds = array<i64: 2, 128, 128>}, {pipeline_mode = #tpu.pipeline_mode<synchronous>, transform_indices = @transform_8, window_bounds = array<i64: 2, 128, 128>}, {pipeline_mode = #tpu.pipeline_mode<synchronous>, transform_indices = @transform_9, window_bounds = array<i64: 128, 128>}, {pipeline_mode = #tpu.pipeline_mode<synchronous>, transform_indices = @transform_10, window_bounds = array<i64: 128, 128>}, {pipeline_mode = #tpu.pipeline_mode<synchronous>, transform_indices = @transform_11, window_bounds = array<i64: 8, 128>}, {pipeline_mode = #tpu.pipeline_mode<synchronous>, transform_indices = @transform_12, window_bounds = array<i64: 2, 10, 128>}, {transform_indices = @transform_13, window_bounds = array<i64: 1, 1, 128>}]} {
    %c0 = arith.constant 0 : index
    %c0_0 = arith.constant 0 : index
    %c0_1 = arith.constant 0 : index
    %0 = vector.load %arg1[%c0, %c0_0, %c0_1] : memref<1x16x48xf32, #tpu.memory_space<vmem>>, vector<1x16x48xf32>
    %1 = vector.shape_cast %0 : vector<1x16x48xf32> to vector<16x48xf32>
    %c0_2 = arith.constant 0 : index
    %c0_3 = arith.constant 0 : index
    %2 = vector.load %arg3[%c0_2, %c0_3] : memref<48x128xf32, #tpu.memory_space<vmem>>, vector<48x128xf32>
    %cst = arith.constant dense<0.000000e+00> : vector<16x128xf32>
    %3 = tpu.matmul %1, %2, %cst {dimension_numbers = #tpu.dot_dimension_numbers<[1], [0], [0], [1], [0, 0, 1, 1], [], []>} : vector<16x48xf32>, vector<48x128xf32>, vector<16x128xf32> -> vector<16x128xf32>
    %c0_4 = arith.constant 0 : index
    %c0_5 = arith.constant 0 : index
    %c0_6 = arith.constant 0 : index
    %4 = vector.load %arg2[%c0_4, %c0_5, %c0_6] : memref<1x16x48xf32, #tpu.memory_space<vmem>>, vector<1x16x48xf32>
    %5 = vector.shape_cast %4 : vector<1x16x48xf32> to vector<16x48xf32>
    %c0_7 = arith.constant 0 : index
    %c0_8 = arith.constant 0 : index
    %6 = vector.load %arg4[%c0_7, %c0_8] : memref<48x128xf32, #tpu.memory_space<vmem>>, vector<48x128xf32>
    %cst_9 = arith.constant dense<0.000000e+00> : vector<16x128xf32>
    %7 = tpu.matmul %5, %6, %cst_9 {dimension_numbers = #tpu.dot_dimension_numbers<[1], [0], [0], [1], [0, 0, 1, 1], [], []>} : vector<16x48xf32>, vector<48x128xf32>, vector<16x128xf32> -> vector<16x128xf32>
    %8 = tpu.concatenate %3, %7 in 0 : vector<16x128xf32>, vector<16x128xf32> -> vector<32x128xf32>
    %c0_10 = arith.constant 0 : index
    %c0_11 = arith.constant 0 : index
    %9 = vector.load %arg5[%c0_10, %c0_11] : memref<32x128xf32, #tpu.memory_space<vmem>>, vector<32x128xf32>
    %10 = arith.addf %8, %9 : vector<32x128xf32>
    %c0_12 = arith.constant 0 : index
    %c0_13 = arith.constant 0 : index
    %11 = vector.load %arg12[%c0_12, %c0_13] : memref<8x128xf32, #tpu.memory_space<vmem>>, vector<1x128xf32>
    %c1 = arith.constant 1 : index
    %c0_14 = arith.constant 0 : index
    %12 = vector.load %arg12[%c1, %c0_14] : memref<8x128xf32, #tpu.memory_space<vmem>>, vector<1x128xf32>
    %cst_15 = arith.constant dense<0.000000e+00> : vector<32xf32>
    %13 = vector.multi_reduction <add>, %10, %cst_15 [1] : vector<32x128xf32> to vector<32xf32>
    %14 = vector.shape_cast %13 : vector<32xf32> to vector<32x1xf32>
    %cst_16 = arith.constant 1.280000e+02 : f32
    %15 = vector.broadcast %cst_16 : f32 to vector<32x1xf32>
    %16 = arith.divf %14, %15 : vector<32x1xf32>
    %17 = vector.broadcast %16 : vector<32x1xf32> to vector<32x128xf32>
    %18 = arith.subf %10, %17 : vector<32x128xf32>
    %19 = arith.mulf %18, %18 : vector<32x128xf32>
    %cst_17 = arith.constant dense<0.000000e+00> : vector<32xf32>
    %20 = vector.multi_reduction <add>, %19, %cst_17 [1] : vector<32x128xf32> to vector<32xf32>
    %21 = vector.shape_cast %20 : vector<32xf32> to vector<32x1xf32>
    %cst_18 = arith.constant 1.280000e+02 : f32
    %22 = vector.broadcast %cst_18 : f32 to vector<32x1xf32>
    %23 = arith.divf %21, %22 : vector<32x1xf32>
    %cst_19 = arith.constant 9.99999974E-6 : f32
    %24 = vector.broadcast %cst_19 : f32 to vector<32x1xf32>
    %25 = arith.addf %23, %24 : vector<32x1xf32>
    %26 = math.rsqrt %25 : vector<32x1xf32>
    %27 = vector.broadcast %26 : vector<32x1xf32> to vector<32x128xf32>
    %28 = arith.mulf %18, %27 : vector<32x128xf32>
    %29 = vector.broadcast %11 : vector<1x128xf32> to vector<32x128xf32>
    %30 = arith.mulf %28, %29 : vector<32x128xf32>
    %31 = vector.broadcast %12 : vector<1x128xf32> to vector<32x128xf32>
    %32 = arith.addf %30, %31 : vector<32x128xf32>
    %c0_20 = arith.constant 0 : index
    %c0_21 = arith.constant 0 : index
    %c0_22 = arith.constant 0 : index
    %33 = vector.load %arg13[%c0_20, %c0_21, %c0_22] : memref<2x10x128xf32, #tpu.memory_space<vmem>>, vector<1x10x128xf32>
    %34 = vector.shape_cast %33 : vector<1x10x128xf32> to vector<10x128xf32>
    %c0_23 = arith.constant 0 : index
    %c0_24 = arith.constant 0 : index
    %c0_25 = arith.constant 0 : index
    %35 = vector.load %arg6[%c0_23, %c0_24, %c0_25] : memref<2x128x384xf32, #tpu.memory_space<vmem>>, vector<1x128x384xf32>
    %36 = vector.shape_cast %35 : vector<1x128x384xf32> to vector<128x384xf32>
    %cst_26 = arith.constant dense<0.000000e+00> : vector<32x384xf32>
    %37 = tpu.matmul %32, %36, %cst_26 {dimension_numbers = #tpu.dot_dimension_numbers<[1], [0], [0], [1], [0, 0, 1, 1], [], []>} : vector<32x128xf32>, vector<128x384xf32>, vector<32x384xf32> -> vector<32x384xf32>
    %38 = vector.extract_strided_slice %37 {offsets = [0, 0], sizes = [32, 128], strides = [1, 1]} : vector<32x384xf32> to vector<32x128xf32>
    %39 = vector.extract_strided_slice %34 {offsets = [0, 0], sizes = [1, 128], strides = [1, 1]} : vector<10x128xf32> to vector<1x128xf32>
    %40 = vector.broadcast %39 : vector<1x128xf32> to vector<32x128xf32>
    %41 = arith.addf %38, %40 : vector<32x128xf32>
    %42 = vector.extract_strided_slice %37 {offsets = [0, 128], sizes = [32, 128], strides = [1, 1]} : vector<32x384xf32> to vector<32x128xf32>
    %43 = vector.extract_strided_slice %34 {offsets = [1, 0], sizes = [1, 128], strides = [1, 1]} : vector<10x128xf32> to vector<1x128xf32>
    %44 = vector.broadcast %43 : vector<1x128xf32> to vector<32x128xf32>
    %45 = arith.addf %42, %44 : vector<32x128xf32>
    %46 = vector.extract_strided_slice %37 {offsets = [0, 256], sizes = [32, 128], strides = [1, 1]} : vector<32x384xf32> to vector<32x128xf32>
    %47 = vector.extract_strided_slice %34 {offsets = [2, 0], sizes = [1, 128], strides = [1, 1]} : vector<10x128xf32> to vector<1x128xf32>
    %48 = vector.broadcast %47 : vector<1x128xf32> to vector<32x128xf32>
    %49 = arith.addf %46, %48 : vector<32x128xf32>
    %50 = vector.extract_strided_slice %41 {offsets = [0, 0], sizes = [32, 16], strides = [1, 1]} : vector<32x128xf32> to vector<32x16xf32>
    %51 = vector.extract_strided_slice %45 {offsets = [0, 0], sizes = [32, 16], strides = [1, 1]} : vector<32x128xf32> to vector<32x16xf32>
    %52 = vector.extract_strided_slice %49 {offsets = [0, 0], sizes = [32, 16], strides = [1, 1]} : vector<32x128xf32> to vector<32x16xf32>
    %cst_27 = arith.constant dense<0.000000e+00> : vector<32x32xf32>
    %53 = tpu.matmul %50, %51, %cst_27 {dimension_numbers = #tpu.dot_dimension_numbers<[1], [1], [0], [0], [0, 0, 1, 0], [], []>} : vector<32x16xf32>, vector<32x16xf32>, vector<32x32xf32> -> vector<32x32xf32>
    %cst_28 = arith.constant dense<0xFF800000> : vector<32xf32>
    %54 = vector.multi_reduction <maximumf>, %53, %cst_28 [1] : vector<32x32xf32> to vector<32xf32>
    %55 = vector.shape_cast %54 : vector<32xf32> to vector<32x1xf32>
    %56 = vector.broadcast %55 : vector<32x1xf32> to vector<32x32xf32>
    %57 = arith.subf %53, %56 : vector<32x32xf32>
    %58 = math.exp %57 : vector<32x32xf32>
    %cst_29 = arith.constant dense<0.000000e+00> : vector<32xf32>
    %59 = vector.multi_reduction <add>, %58, %cst_29 [1] : vector<32x32xf32> to vector<32xf32>
    %60 = vector.shape_cast %59 : vector<32xf32> to vector<32x1xf32>
    %61 = vector.broadcast %60 : vector<32x1xf32> to vector<32x32xf32>
    %62 = arith.divf %58, %61 : vector<32x32xf32>
    %cst_30 = arith.constant dense<0.000000e+00> : vector<32x16xf32>
    %63 = tpu.matmul %62, %52, %cst_30 {dimension_numbers = #tpu.dot_dimension_numbers<[1], [0], [0], [1], [0, 0, 1, 1], [], []>} : vector<32x32xf32>, vector<32x16xf32>, vector<32x16xf32> -> vector<32x16xf32>
    %64 = vector.extract_strided_slice %41 {offsets = [0, 16], sizes = [32, 16], strides = [1, 1]} : vector<32x128xf32> to vector<32x16xf32>
    %65 = vector.extract_strided_slice %45 {offsets = [0, 16], sizes = [32, 16], strides = [1, 1]} : vector<32x128xf32> to vector<32x16xf32>
    %66 = vector.extract_strided_slice %49 {offsets = [0, 16], sizes = [32, 16], strides = [1, 1]} : vector<32x128xf32> to vector<32x16xf32>
    %cst_31 = arith.constant dense<0.000000e+00> : vector<32x32xf32>
    %67 = tpu.matmul %64, %65, %cst_31 {dimension_numbers = #tpu.dot_dimension_numbers<[1], [1], [0], [0], [0, 0, 1, 0], [], []>} : vector<32x16xf32>, vector<32x16xf32>, vector<32x32xf32> -> vector<32x32xf32>
    %cst_32 = arith.constant dense<0xFF800000> : vector<32xf32>
    %68 = vector.multi_reduction <maximumf>, %67, %cst_32 [1] : vector<32x32xf32> to vector<32xf32>
    %69 = vector.shape_cast %68 : vector<32xf32> to vector<32x1xf32>
    %70 = vector.broadcast %69 : vector<32x1xf32> to vector<32x32xf32>
    %71 = arith.subf %67, %70 : vector<32x32xf32>
    %72 = math.exp %71 : vector<32x32xf32>
    %cst_33 = arith.constant dense<0.000000e+00> : vector<32xf32>
    %73 = vector.multi_reduction <add>, %72, %cst_33 [1] : vector<32x32xf32> to vector<32xf32>
    %74 = vector.shape_cast %73 : vector<32xf32> to vector<32x1xf32>
    %75 = vector.broadcast %74 : vector<32x1xf32> to vector<32x32xf32>
    %76 = arith.divf %72, %75 : vector<32x32xf32>
    %cst_34 = arith.constant dense<0.000000e+00> : vector<32x16xf32>
    %77 = tpu.matmul %76, %66, %cst_34 {dimension_numbers = #tpu.dot_dimension_numbers<[1], [0], [0], [1], [0, 0, 1, 1], [], []>} : vector<32x32xf32>, vector<32x16xf32>, vector<32x16xf32> -> vector<32x16xf32>
    %78 = vector.extract_strided_slice %41 {offsets = [0, 32], sizes = [32, 16], strides = [1, 1]} : vector<32x128xf32> to vector<32x16xf32>
    %79 = vector.extract_strided_slice %45 {offsets = [0, 32], sizes = [32, 16], strides = [1, 1]} : vector<32x128xf32> to vector<32x16xf32>
    %80 = vector.extract_strided_slice %49 {offsets = [0, 32], sizes = [32, 16], strides = [1, 1]} : vector<32x128xf32> to vector<32x16xf32>
    %cst_35 = arith.constant dense<0.000000e+00> : vector<32x32xf32>
    %81 = tpu.matmul %78, %79, %cst_35 {dimension_numbers = #tpu.dot_dimension_numbers<[1], [1], [0], [0], [0, 0, 1, 0], [], []>} : vector<32x16xf32>, vector<32x16xf32>, vector<32x32xf32> -> vector<32x32xf32>
    %cst_36 = arith.constant dense<0xFF800000> : vector<32xf32>
    %82 = vector.multi_reduction <maximumf>, %81, %cst_36 [1] : vector<32x32xf32> to vector<32xf32>
    %83 = vector.shape_cast %82 : vector<32xf32> to vector<32x1xf32>
    %84 = vector.broadcast %83 : vector<32x1xf32> to vector<32x32xf32>
    %85 = arith.subf %81, %84 : vector<32x32xf32>
    %86 = math.exp %85 : vector<32x32xf32>
    %cst_37 = arith.constant dense<0.000000e+00> : vector<32xf32>
    %87 = vector.multi_reduction <add>, %86, %cst_37 [1] : vector<32x32xf32> to vector<32xf32>
    %88 = vector.shape_cast %87 : vector<32xf32> to vector<32x1xf32>
    %89 = vector.broadcast %88 : vector<32x1xf32> to vector<32x32xf32>
    %90 = arith.divf %86, %89 : vector<32x32xf32>
    %cst_38 = arith.constant dense<0.000000e+00> : vector<32x16xf32>
    %91 = tpu.matmul %90, %80, %cst_38 {dimension_numbers = #tpu.dot_dimension_numbers<[1], [0], [0], [1], [0, 0, 1, 1], [], []>} : vector<32x32xf32>, vector<32x16xf32>, vector<32x16xf32> -> vector<32x16xf32>
    %92 = vector.extract_strided_slice %41 {offsets = [0, 48], sizes = [32, 16], strides = [1, 1]} : vector<32x128xf32> to vector<32x16xf32>
    %93 = vector.extract_strided_slice %45 {offsets = [0, 48], sizes = [32, 16], strides = [1, 1]} : vector<32x128xf32> to vector<32x16xf32>
    %94 = vector.extract_strided_slice %49 {offsets = [0, 48], sizes = [32, 16], strides = [1, 1]} : vector<32x128xf32> to vector<32x16xf32>
    %cst_39 = arith.constant dense<0.000000e+00> : vector<32x32xf32>
    %95 = tpu.matmul %92, %93, %cst_39 {dimension_numbers = #tpu.dot_dimension_numbers<[1], [1], [0], [0], [0, 0, 1, 0], [], []>} : vector<32x16xf32>, vector<32x16xf32>, vector<32x32xf32> -> vector<32x32xf32>
    %cst_40 = arith.constant dense<0xFF800000> : vector<32xf32>
    %96 = vector.multi_reduction <maximumf>, %95, %cst_40 [1] : vector<32x32xf32> to vector<32xf32>
    %97 = vector.shape_cast %96 : vector<32xf32> to vector<32x1xf32>
    %98 = vector.broadcast %97 : vector<32x1xf32> to vector<32x32xf32>
    %99 = arith.subf %95, %98 : vector<32x32xf32>
    %100 = math.exp %99 : vector<32x32xf32>
    %cst_41 = arith.constant dense<0.000000e+00> : vector<32xf32>
    %101 = vector.multi_reduction <add>, %100, %cst_41 [1] : vector<32x32xf32> to vector<32xf32>
    %102 = vector.shape_cast %101 : vector<32xf32> to vector<32x1xf32>
    %103 = vector.broadcast %102 : vector<32x1xf32> to vector<32x32xf32>
    %104 = arith.divf %100, %103 : vector<32x32xf32>
    %cst_42 = arith.constant dense<0.000000e+00> : vector<32x16xf32>
    %105 = tpu.matmul %104, %94, %cst_42 {dimension_numbers = #tpu.dot_dimension_numbers<[1], [0], [0], [1], [0, 0, 1, 1], [], []>} : vector<32x32xf32>, vector<32x16xf32>, vector<32x16xf32> -> vector<32x16xf32>
    %106 = vector.extract_strided_slice %41 {offsets = [0, 64], sizes = [32, 16], strides = [1, 1]} : vector<32x128xf32> to vector<32x16xf32>
    %107 = vector.extract_strided_slice %45 {offsets = [0, 64], sizes = [32, 16], strides = [1, 1]} : vector<32x128xf32> to vector<32x16xf32>
    %108 = vector.extract_strided_slice %49 {offsets = [0, 64], sizes = [32, 16], strides = [1, 1]} : vector<32x128xf32> to vector<32x16xf32>
    %cst_43 = arith.constant dense<0.000000e+00> : vector<32x32xf32>
    %109 = tpu.matmul %106, %107, %cst_43 {dimension_numbers = #tpu.dot_dimension_numbers<[1], [1], [0], [0], [0, 0, 1, 0], [], []>} : vector<32x16xf32>, vector<32x16xf32>, vector<32x32xf32> -> vector<32x32xf32>
    %cst_44 = arith.constant dense<0xFF800000> : vector<32xf32>
    %110 = vector.multi_reduction <maximumf>, %109, %cst_44 [1] : vector<32x32xf32> to vector<32xf32>
    %111 = vector.shape_cast %110 : vector<32xf32> to vector<32x1xf32>
    %112 = vector.broadcast %111 : vector<32x1xf32> to vector<32x32xf32>
    %113 = arith.subf %109, %112 : vector<32x32xf32>
    %114 = math.exp %113 : vector<32x32xf32>
    %cst_45 = arith.constant dense<0.000000e+00> : vector<32xf32>
    %115 = vector.multi_reduction <add>, %114, %cst_45 [1] : vector<32x32xf32> to vector<32xf32>
    %116 = vector.shape_cast %115 : vector<32xf32> to vector<32x1xf32>
    %117 = vector.broadcast %116 : vector<32x1xf32> to vector<32x32xf32>
    %118 = arith.divf %114, %117 : vector<32x32xf32>
    %cst_46 = arith.constant dense<0.000000e+00> : vector<32x16xf32>
    %119 = tpu.matmul %118, %108, %cst_46 {dimension_numbers = #tpu.dot_dimension_numbers<[1], [0], [0], [1], [0, 0, 1, 1], [], []>} : vector<32x32xf32>, vector<32x16xf32>, vector<32x16xf32> -> vector<32x16xf32>
    %120 = vector.extract_strided_slice %41 {offsets = [0, 80], sizes = [32, 16], strides = [1, 1]} : vector<32x128xf32> to vector<32x16xf32>
    %121 = vector.extract_strided_slice %45 {offsets = [0, 80], sizes = [32, 16], strides = [1, 1]} : vector<32x128xf32> to vector<32x16xf32>
    %122 = vector.extract_strided_slice %49 {offsets = [0, 80], sizes = [32, 16], strides = [1, 1]} : vector<32x128xf32> to vector<32x16xf32>
    %cst_47 = arith.constant dense<0.000000e+00> : vector<32x32xf32>
    %123 = tpu.matmul %120, %121, %cst_47 {dimension_numbers = #tpu.dot_dimension_numbers<[1], [1], [0], [0], [0, 0, 1, 0], [], []>} : vector<32x16xf32>, vector<32x16xf32>, vector<32x32xf32> -> vector<32x32xf32>
    %cst_48 = arith.constant dense<0xFF800000> : vector<32xf32>
    %124 = vector.multi_reduction <maximumf>, %123, %cst_48 [1] : vector<32x32xf32> to vector<32xf32>
    %125 = vector.shape_cast %124 : vector<32xf32> to vector<32x1xf32>
    %126 = vector.broadcast %125 : vector<32x1xf32> to vector<32x32xf32>
    %127 = arith.subf %123, %126 : vector<32x32xf32>
    %128 = math.exp %127 : vector<32x32xf32>
    %cst_49 = arith.constant dense<0.000000e+00> : vector<32xf32>
    %129 = vector.multi_reduction <add>, %128, %cst_49 [1] : vector<32x32xf32> to vector<32xf32>
    %130 = vector.shape_cast %129 : vector<32xf32> to vector<32x1xf32>
    %131 = vector.broadcast %130 : vector<32x1xf32> to vector<32x32xf32>
    %132 = arith.divf %128, %131 : vector<32x32xf32>
    %cst_50 = arith.constant dense<0.000000e+00> : vector<32x16xf32>
    %133 = tpu.matmul %132, %122, %cst_50 {dimension_numbers = #tpu.dot_dimension_numbers<[1], [0], [0], [1], [0, 0, 1, 1], [], []>} : vector<32x32xf32>, vector<32x16xf32>, vector<32x16xf32> -> vector<32x16xf32>
    %134 = vector.extract_strided_slice %41 {offsets = [0, 96], sizes = [32, 16], strides = [1, 1]} : vector<32x128xf32> to vector<32x16xf32>
    %135 = vector.extract_strided_slice %45 {offsets = [0, 96], sizes = [32, 16], strides = [1, 1]} : vector<32x128xf32> to vector<32x16xf32>
    %136 = vector.extract_strided_slice %49 {offsets = [0, 96], sizes = [32, 16], strides = [1, 1]} : vector<32x128xf32> to vector<32x16xf32>
    %cst_51 = arith.constant dense<0.000000e+00> : vector<32x32xf32>
    %137 = tpu.matmul %134, %135, %cst_51 {dimension_numbers = #tpu.dot_dimension_numbers<[1], [1], [0], [0], [0, 0, 1, 0], [], []>} : vector<32x16xf32>, vector<32x16xf32>, vector<32x32xf32> -> vector<32x32xf32>
    %cst_52 = arith.constant dense<0xFF800000> : vector<32xf32>
    %138 = vector.multi_reduction <maximumf>, %137, %cst_52 [1] : vector<32x32xf32> to vector<32xf32>
    %139 = vector.shape_cast %138 : vector<32xf32> to vector<32x1xf32>
    %140 = vector.broadcast %139 : vector<32x1xf32> to vector<32x32xf32>
    %141 = arith.subf %137, %140 : vector<32x32xf32>
    %142 = math.exp %141 : vector<32x32xf32>
    %cst_53 = arith.constant dense<0.000000e+00> : vector<32xf32>
    %143 = vector.multi_reduction <add>, %142, %cst_53 [1] : vector<32x32xf32> to vector<32xf32>
    %144 = vector.shape_cast %143 : vector<32xf32> to vector<32x1xf32>
    %145 = vector.broadcast %144 : vector<32x1xf32> to vector<32x32xf32>
    %146 = arith.divf %142, %145 : vector<32x32xf32>
    %cst_54 = arith.constant dense<0.000000e+00> : vector<32x16xf32>
    %147 = tpu.matmul %146, %136, %cst_54 {dimension_numbers = #tpu.dot_dimension_numbers<[1], [0], [0], [1], [0, 0, 1, 1], [], []>} : vector<32x32xf32>, vector<32x16xf32>, vector<32x16xf32> -> vector<32x16xf32>
    %148 = vector.extract_strided_slice %41 {offsets = [0, 112], sizes = [32, 16], strides = [1, 1]} : vector<32x128xf32> to vector<32x16xf32>
    %149 = vector.extract_strided_slice %45 {offsets = [0, 112], sizes = [32, 16], strides = [1, 1]} : vector<32x128xf32> to vector<32x16xf32>
    %150 = vector.extract_strided_slice %49 {offsets = [0, 112], sizes = [32, 16], strides = [1, 1]} : vector<32x128xf32> to vector<32x16xf32>
    %cst_55 = arith.constant dense<0.000000e+00> : vector<32x32xf32>
    %151 = tpu.matmul %148, %149, %cst_55 {dimension_numbers = #tpu.dot_dimension_numbers<[1], [1], [0], [0], [0, 0, 1, 0], [], []>} : vector<32x16xf32>, vector<32x16xf32>, vector<32x32xf32> -> vector<32x32xf32>
    %cst_56 = arith.constant dense<0xFF800000> : vector<32xf32>
    %152 = vector.multi_reduction <maximumf>, %151, %cst_56 [1] : vector<32x32xf32> to vector<32xf32>
    %153 = vector.shape_cast %152 : vector<32xf32> to vector<32x1xf32>
    %154 = vector.broadcast %153 : vector<32x1xf32> to vector<32x32xf32>
    %155 = arith.subf %151, %154 : vector<32x32xf32>
    %156 = math.exp %155 : vector<32x32xf32>
    %cst_57 = arith.constant dense<0.000000e+00> : vector<32xf32>
    %157 = vector.multi_reduction <add>, %156, %cst_57 [1] : vector<32x32xf32> to vector<32xf32>
    %158 = vector.shape_cast %157 : vector<32xf32> to vector<32x1xf32>
    %159 = vector.broadcast %158 : vector<32x1xf32> to vector<32x32xf32>
    %160 = arith.divf %156, %159 : vector<32x32xf32>
    %cst_58 = arith.constant dense<0.000000e+00> : vector<32x16xf32>
    %161 = tpu.matmul %160, %150, %cst_58 {dimension_numbers = #tpu.dot_dimension_numbers<[1], [0], [0], [1], [0, 0, 1, 1], [], []>} : vector<32x32xf32>, vector<32x16xf32>, vector<32x16xf32> -> vector<32x16xf32>
    %162 = tpu.concatenate %63, %77, %91, %105, %119, %133, %147, %161 in 1 : vector<32x16xf32>, vector<32x16xf32>, vector<32x16xf32>, vector<32x16xf32>, vector<32x16xf32>, vector<32x16xf32>, vector<32x16xf32>, vector<32x16xf32> -> vector<32x128xf32>
    %c0_59 = arith.constant 0 : index
    %c0_60 = arith.constant 0 : index
    %c0_61 = arith.constant 0 : index
    %163 = vector.load %arg7[%c0_59, %c0_60, %c0_61] : memref<2x128x128xf32, #tpu.memory_space<vmem>>, vector<1x128x128xf32>
    %164 = vector.shape_cast %163 : vector<1x128x128xf32> to vector<128x128xf32>
    %cst_62 = arith.constant dense<0.000000e+00> : vector<32x128xf32>
    %165 = tpu.matmul %162, %164, %cst_62 {dimension_numbers = #tpu.dot_dimension_numbers<[1], [0], [0], [1], [0, 0, 1, 1], [], []>} : vector<32x128xf32>, vector<128x128xf32>, vector<32x128xf32> -> vector<32x128xf32>
    %166 = vector.extract_strided_slice %34 {offsets = [3, 0], sizes = [1, 128], strides = [1, 1]} : vector<10x128xf32> to vector<1x128xf32>
    %167 = vector.broadcast %166 : vector<1x128xf32> to vector<32x128xf32>
    %168 = arith.addf %165, %167 : vector<32x128xf32>
    %169 = arith.addf %32, %168 : vector<32x128xf32>
    %170 = vector.extract_strided_slice %34 {offsets = [4, 0], sizes = [1, 128], strides = [1, 1]} : vector<10x128xf32> to vector<1x128xf32>
    %171 = vector.extract_strided_slice %34 {offsets = [5, 0], sizes = [1, 128], strides = [1, 1]} : vector<10x128xf32> to vector<1x128xf32>
    %cst_63 = arith.constant dense<0.000000e+00> : vector<32xf32>
    %172 = vector.multi_reduction <add>, %169, %cst_63 [1] : vector<32x128xf32> to vector<32xf32>
    %173 = vector.shape_cast %172 : vector<32xf32> to vector<32x1xf32>
    %cst_64 = arith.constant 1.280000e+02 : f32
    %174 = vector.broadcast %cst_64 : f32 to vector<32x1xf32>
    %175 = arith.divf %173, %174 : vector<32x1xf32>
    %176 = vector.broadcast %175 : vector<32x1xf32> to vector<32x128xf32>
    %177 = arith.subf %169, %176 : vector<32x128xf32>
    %178 = arith.mulf %177, %177 : vector<32x128xf32>
    %cst_65 = arith.constant dense<0.000000e+00> : vector<32xf32>
    %179 = vector.multi_reduction <add>, %178, %cst_65 [1] : vector<32x128xf32> to vector<32xf32>
    %180 = vector.shape_cast %179 : vector<32xf32> to vector<32x1xf32>
    %cst_66 = arith.constant 1.280000e+02 : f32
    %181 = vector.broadcast %cst_66 : f32 to vector<32x1xf32>
    %182 = arith.divf %180, %181 : vector<32x1xf32>
    %cst_67 = arith.constant 9.99999974E-6 : f32
    %183 = vector.broadcast %cst_67 : f32 to vector<32x1xf32>
    %184 = arith.addf %182, %183 : vector<32x1xf32>
    %185 = math.rsqrt %184 : vector<32x1xf32>
    %186 = vector.broadcast %185 : vector<32x1xf32> to vector<32x128xf32>
    %187 = arith.mulf %177, %186 : vector<32x128xf32>
    %188 = vector.broadcast %170 : vector<1x128xf32> to vector<32x128xf32>
    %189 = arith.mulf %187, %188 : vector<32x128xf32>
    %190 = vector.broadcast %171 : vector<1x128xf32> to vector<32x128xf32>
    %191 = arith.addf %189, %190 : vector<32x128xf32>
    %c0_68 = arith.constant 0 : index
    %c0_69 = arith.constant 0 : index
    %c0_70 = arith.constant 0 : index
    %192 = vector.load %arg8[%c0_68, %c0_69, %c0_70] : memref<2x128x128xf32, #tpu.memory_space<vmem>>, vector<1x128x128xf32>
    %193 = vector.shape_cast %192 : vector<1x128x128xf32> to vector<128x128xf32>
    %cst_71 = arith.constant dense<0.000000e+00> : vector<32x128xf32>
    %194 = tpu.matmul %191, %193, %cst_71 {dimension_numbers = #tpu.dot_dimension_numbers<[1], [0], [0], [1], [0, 0, 1, 1], [], []>} : vector<32x128xf32>, vector<128x128xf32>, vector<32x128xf32> -> vector<32x128xf32>
    %195 = vector.extract_strided_slice %34 {offsets = [6, 0], sizes = [1, 128], strides = [1, 1]} : vector<10x128xf32> to vector<1x128xf32>
    %196 = vector.broadcast %195 : vector<1x128xf32> to vector<32x128xf32>
    %197 = arith.addf %194, %196 : vector<32x128xf32>
    %cst_72 = arith.constant 0.000000e+00 : f32
    %198 = vector.broadcast %cst_72 : f32 to vector<32x128xf32>
    %199 = arith.maximumf %197, %198 : vector<32x128xf32>
    %c0_73 = arith.constant 0 : index
    %c0_74 = arith.constant 0 : index
    %c0_75 = arith.constant 0 : index
    %200 = vector.load %arg9[%c0_73, %c0_74, %c0_75] : memref<2x128x128xf32, #tpu.memory_space<vmem>>, vector<1x128x128xf32>
    %201 = vector.shape_cast %200 : vector<1x128x128xf32> to vector<128x128xf32>
    %cst_76 = arith.constant dense<0.000000e+00> : vector<32x128xf32>
    %202 = tpu.matmul %199, %201, %cst_76 {dimension_numbers = #tpu.dot_dimension_numbers<[1], [0], [0], [1], [0, 0, 1, 1], [], []>} : vector<32x128xf32>, vector<128x128xf32>, vector<32x128xf32> -> vector<32x128xf32>
    %203 = vector.extract_strided_slice %34 {offsets = [7, 0], sizes = [1, 128], strides = [1, 1]} : vector<10x128xf32> to vector<1x128xf32>
    %204 = vector.broadcast %203 : vector<1x128xf32> to vector<32x128xf32>
    %205 = arith.addf %202, %204 : vector<32x128xf32>
    %206 = arith.addf %191, %205 : vector<32x128xf32>
    %207 = vector.extract_strided_slice %34 {offsets = [8, 0], sizes = [1, 128], strides = [1, 1]} : vector<10x128xf32> to vector<1x128xf32>
    %208 = vector.extract_strided_slice %34 {offsets = [9, 0], sizes = [1, 128], strides = [1, 1]} : vector<10x128xf32> to vector<1x128xf32>
    %cst_77 = arith.constant dense<0.000000e+00> : vector<32xf32>
    %209 = vector.multi_reduction <add>, %206, %cst_77 [1] : vector<32x128xf32> to vector<32xf32>
    %210 = vector.shape_cast %209 : vector<32xf32> to vector<32x1xf32>
    %cst_78 = arith.constant 1.280000e+02 : f32
    %211 = vector.broadcast %cst_78 : f32 to vector<32x1xf32>
    %212 = arith.divf %210, %211 : vector<32x1xf32>
    %213 = vector.broadcast %212 : vector<32x1xf32> to vector<32x128xf32>
    %214 = arith.subf %206, %213 : vector<32x128xf32>
    %215 = arith.mulf %214, %214 : vector<32x128xf32>
    %cst_79 = arith.constant dense<0.000000e+00> : vector<32xf32>
    %216 = vector.multi_reduction <add>, %215, %cst_79 [1] : vector<32x128xf32> to vector<32xf32>
    %217 = vector.shape_cast %216 : vector<32xf32> to vector<32x1xf32>
    %cst_80 = arith.constant 1.280000e+02 : f32
    %218 = vector.broadcast %cst_80 : f32 to vector<32x1xf32>
    %219 = arith.divf %217, %218 : vector<32x1xf32>
    %cst_81 = arith.constant 9.99999974E-6 : f32
    %220 = vector.broadcast %cst_81 : f32 to vector<32x1xf32>
    %221 = arith.addf %219, %220 : vector<32x1xf32>
    %222 = math.rsqrt %221 : vector<32x1xf32>
    %223 = vector.broadcast %222 : vector<32x1xf32> to vector<32x128xf32>
    %224 = arith.mulf %214, %223 : vector<32x128xf32>
    %225 = vector.broadcast %207 : vector<1x128xf32> to vector<32x128xf32>
    %226 = arith.mulf %224, %225 : vector<32x128xf32>
    %227 = vector.broadcast %208 : vector<1x128xf32> to vector<32x128xf32>
    %228 = arith.addf %226, %227 : vector<32x128xf32>
    %c1_82 = arith.constant 1 : index
    %c0_83 = arith.constant 0 : index
    %c0_84 = arith.constant 0 : index
    %229 = vector.load %arg13[%c1_82, %c0_83, %c0_84] : memref<2x10x128xf32, #tpu.memory_space<vmem>>, vector<1x10x128xf32>
    %230 = vector.shape_cast %229 : vector<1x10x128xf32> to vector<10x128xf32>
    %c1_85 = arith.constant 1 : index
    %c0_86 = arith.constant 0 : index
    %c0_87 = arith.constant 0 : index
    %231 = vector.load %arg6[%c1_85, %c0_86, %c0_87] : memref<2x128x384xf32, #tpu.memory_space<vmem>>, vector<1x128x384xf32>
    %232 = vector.shape_cast %231 : vector<1x128x384xf32> to vector<128x384xf32>
    %cst_88 = arith.constant dense<0.000000e+00> : vector<32x384xf32>
    %233 = tpu.matmul %228, %232, %cst_88 {dimension_numbers = #tpu.dot_dimension_numbers<[1], [0], [0], [1], [0, 0, 1, 1], [], []>} : vector<32x128xf32>, vector<128x384xf32>, vector<32x384xf32> -> vector<32x384xf32>
    %234 = vector.extract_strided_slice %233 {offsets = [0, 0], sizes = [32, 128], strides = [1, 1]} : vector<32x384xf32> to vector<32x128xf32>
    %235 = vector.extract_strided_slice %230 {offsets = [0, 0], sizes = [1, 128], strides = [1, 1]} : vector<10x128xf32> to vector<1x128xf32>
    %236 = vector.broadcast %235 : vector<1x128xf32> to vector<32x128xf32>
    %237 = arith.addf %234, %236 : vector<32x128xf32>
    %238 = vector.extract_strided_slice %233 {offsets = [0, 128], sizes = [32, 128], strides = [1, 1]} : vector<32x384xf32> to vector<32x128xf32>
    %239 = vector.extract_strided_slice %230 {offsets = [1, 0], sizes = [1, 128], strides = [1, 1]} : vector<10x128xf32> to vector<1x128xf32>
    %240 = vector.broadcast %239 : vector<1x128xf32> to vector<32x128xf32>
    %241 = arith.addf %238, %240 : vector<32x128xf32>
    %242 = vector.extract_strided_slice %233 {offsets = [0, 256], sizes = [32, 128], strides = [1, 1]} : vector<32x384xf32> to vector<32x128xf32>
    %243 = vector.extract_strided_slice %230 {offsets = [2, 0], sizes = [1, 128], strides = [1, 1]} : vector<10x128xf32> to vector<1x128xf32>
    %244 = vector.broadcast %243 : vector<1x128xf32> to vector<32x128xf32>
    %245 = arith.addf %242, %244 : vector<32x128xf32>
    %246 = vector.extract_strided_slice %237 {offsets = [0, 0], sizes = [32, 16], strides = [1, 1]} : vector<32x128xf32> to vector<32x16xf32>
    %247 = vector.extract_strided_slice %241 {offsets = [0, 0], sizes = [32, 16], strides = [1, 1]} : vector<32x128xf32> to vector<32x16xf32>
    %248 = vector.extract_strided_slice %245 {offsets = [0, 0], sizes = [32, 16], strides = [1, 1]} : vector<32x128xf32> to vector<32x16xf32>
    %cst_89 = arith.constant dense<0.000000e+00> : vector<32x32xf32>
    %249 = tpu.matmul %246, %247, %cst_89 {dimension_numbers = #tpu.dot_dimension_numbers<[1], [1], [0], [0], [0, 0, 1, 0], [], []>} : vector<32x16xf32>, vector<32x16xf32>, vector<32x32xf32> -> vector<32x32xf32>
    %cst_90 = arith.constant dense<0xFF800000> : vector<32xf32>
    %250 = vector.multi_reduction <maximumf>, %249, %cst_90 [1] : vector<32x32xf32> to vector<32xf32>
    %251 = vector.shape_cast %250 : vector<32xf32> to vector<32x1xf32>
    %252 = vector.broadcast %251 : vector<32x1xf32> to vector<32x32xf32>
    %253 = arith.subf %249, %252 : vector<32x32xf32>
    %254 = math.exp %253 : vector<32x32xf32>
    %cst_91 = arith.constant dense<0.000000e+00> : vector<32xf32>
    %255 = vector.multi_reduction <add>, %254, %cst_91 [1] : vector<32x32xf32> to vector<32xf32>
    %256 = vector.shape_cast %255 : vector<32xf32> to vector<32x1xf32>
    %257 = vector.broadcast %256 : vector<32x1xf32> to vector<32x32xf32>
    %258 = arith.divf %254, %257 : vector<32x32xf32>
    %cst_92 = arith.constant dense<0.000000e+00> : vector<32x16xf32>
    %259 = tpu.matmul %258, %248, %cst_92 {dimension_numbers = #tpu.dot_dimension_numbers<[1], [0], [0], [1], [0, 0, 1, 1], [], []>} : vector<32x32xf32>, vector<32x16xf32>, vector<32x16xf32> -> vector<32x16xf32>
    %260 = vector.extract_strided_slice %237 {offsets = [0, 16], sizes = [32, 16], strides = [1, 1]} : vector<32x128xf32> to vector<32x16xf32>
    %261 = vector.extract_strided_slice %241 {offsets = [0, 16], sizes = [32, 16], strides = [1, 1]} : vector<32x128xf32> to vector<32x16xf32>
    %262 = vector.extract_strided_slice %245 {offsets = [0, 16], sizes = [32, 16], strides = [1, 1]} : vector<32x128xf32> to vector<32x16xf32>
    %cst_93 = arith.constant dense<0.000000e+00> : vector<32x32xf32>
    %263 = tpu.matmul %260, %261, %cst_93 {dimension_numbers = #tpu.dot_dimension_numbers<[1], [1], [0], [0], [0, 0, 1, 0], [], []>} : vector<32x16xf32>, vector<32x16xf32>, vector<32x32xf32> -> vector<32x32xf32>
    %cst_94 = arith.constant dense<0xFF800000> : vector<32xf32>
    %264 = vector.multi_reduction <maximumf>, %263, %cst_94 [1] : vector<32x32xf32> to vector<32xf32>
    %265 = vector.shape_cast %264 : vector<32xf32> to vector<32x1xf32>
    %266 = vector.broadcast %265 : vector<32x1xf32> to vector<32x32xf32>
    %267 = arith.subf %263, %266 : vector<32x32xf32>
    %268 = math.exp %267 : vector<32x32xf32>
    %cst_95 = arith.constant dense<0.000000e+00> : vector<32xf32>
    %269 = vector.multi_reduction <add>, %268, %cst_95 [1] : vector<32x32xf32> to vector<32xf32>
    %270 = vector.shape_cast %269 : vector<32xf32> to vector<32x1xf32>
    %271 = vector.broadcast %270 : vector<32x1xf32> to vector<32x32xf32>
    %272 = arith.divf %268, %271 : vector<32x32xf32>
    %cst_96 = arith.constant dense<0.000000e+00> : vector<32x16xf32>
    %273 = tpu.matmul %272, %262, %cst_96 {dimension_numbers = #tpu.dot_dimension_numbers<[1], [0], [0], [1], [0, 0, 1, 1], [], []>} : vector<32x32xf32>, vector<32x16xf32>, vector<32x16xf32> -> vector<32x16xf32>
    %274 = vector.extract_strided_slice %237 {offsets = [0, 32], sizes = [32, 16], strides = [1, 1]} : vector<32x128xf32> to vector<32x16xf32>
    %275 = vector.extract_strided_slice %241 {offsets = [0, 32], sizes = [32, 16], strides = [1, 1]} : vector<32x128xf32> to vector<32x16xf32>
    %276 = vector.extract_strided_slice %245 {offsets = [0, 32], sizes = [32, 16], strides = [1, 1]} : vector<32x128xf32> to vector<32x16xf32>
    %cst_97 = arith.constant dense<0.000000e+00> : vector<32x32xf32>
    %277 = tpu.matmul %274, %275, %cst_97 {dimension_numbers = #tpu.dot_dimension_numbers<[1], [1], [0], [0], [0, 0, 1, 0], [], []>} : vector<32x16xf32>, vector<32x16xf32>, vector<32x32xf32> -> vector<32x32xf32>
    %cst_98 = arith.constant dense<0xFF800000> : vector<32xf32>
    %278 = vector.multi_reduction <maximumf>, %277, %cst_98 [1] : vector<32x32xf32> to vector<32xf32>
    %279 = vector.shape_cast %278 : vector<32xf32> to vector<32x1xf32>
    %280 = vector.broadcast %279 : vector<32x1xf32> to vector<32x32xf32>
    %281 = arith.subf %277, %280 : vector<32x32xf32>
    %282 = math.exp %281 : vector<32x32xf32>
    %cst_99 = arith.constant dense<0.000000e+00> : vector<32xf32>
    %283 = vector.multi_reduction <add>, %282, %cst_99 [1] : vector<32x32xf32> to vector<32xf32>
    %284 = vector.shape_cast %283 : vector<32xf32> to vector<32x1xf32>
    %285 = vector.broadcast %284 : vector<32x1xf32> to vector<32x32xf32>
    %286 = arith.divf %282, %285 : vector<32x32xf32>
    %cst_100 = arith.constant dense<0.000000e+00> : vector<32x16xf32>
    %287 = tpu.matmul %286, %276, %cst_100 {dimension_numbers = #tpu.dot_dimension_numbers<[1], [0], [0], [1], [0, 0, 1, 1], [], []>} : vector<32x32xf32>, vector<32x16xf32>, vector<32x16xf32> -> vector<32x16xf32>
    %288 = vector.extract_strided_slice %237 {offsets = [0, 48], sizes = [32, 16], strides = [1, 1]} : vector<32x128xf32> to vector<32x16xf32>
    %289 = vector.extract_strided_slice %241 {offsets = [0, 48], sizes = [32, 16], strides = [1, 1]} : vector<32x128xf32> to vector<32x16xf32>
    %290 = vector.extract_strided_slice %245 {offsets = [0, 48], sizes = [32, 16], strides = [1, 1]} : vector<32x128xf32> to vector<32x16xf32>
    %cst_101 = arith.constant dense<0.000000e+00> : vector<32x32xf32>
    %291 = tpu.matmul %288, %289, %cst_101 {dimension_numbers = #tpu.dot_dimension_numbers<[1], [1], [0], [0], [0, 0, 1, 0], [], []>} : vector<32x16xf32>, vector<32x16xf32>, vector<32x32xf32> -> vector<32x32xf32>
    %cst_102 = arith.constant dense<0xFF800000> : vector<32xf32>
    %292 = vector.multi_reduction <maximumf>, %291, %cst_102 [1] : vector<32x32xf32> to vector<32xf32>
    %293 = vector.shape_cast %292 : vector<32xf32> to vector<32x1xf32>
    %294 = vector.broadcast %293 : vector<32x1xf32> to vector<32x32xf32>
    %295 = arith.subf %291, %294 : vector<32x32xf32>
    %296 = math.exp %295 : vector<32x32xf32>
    %cst_103 = arith.constant dense<0.000000e+00> : vector<32xf32>
    %297 = vector.multi_reduction <add>, %296, %cst_103 [1] : vector<32x32xf32> to vector<32xf32>
    %298 = vector.shape_cast %297 : vector<32xf32> to vector<32x1xf32>
    %299 = vector.broadcast %298 : vector<32x1xf32> to vector<32x32xf32>
    %300 = arith.divf %296, %299 : vector<32x32xf32>
    %cst_104 = arith.constant dense<0.000000e+00> : vector<32x16xf32>
    %301 = tpu.matmul %300, %290, %cst_104 {dimension_numbers = #tpu.dot_dimension_numbers<[1], [0], [0], [1], [0, 0, 1, 1], [], []>} : vector<32x32xf32>, vector<32x16xf32>, vector<32x16xf32> -> vector<32x16xf32>
    %302 = vector.extract_strided_slice %237 {offsets = [0, 64], sizes = [32, 16], strides = [1, 1]} : vector<32x128xf32> to vector<32x16xf32>
    %303 = vector.extract_strided_slice %241 {offsets = [0, 64], sizes = [32, 16], strides = [1, 1]} : vector<32x128xf32> to vector<32x16xf32>
    %304 = vector.extract_strided_slice %245 {offsets = [0, 64], sizes = [32, 16], strides = [1, 1]} : vector<32x128xf32> to vector<32x16xf32>
    %cst_105 = arith.constant dense<0.000000e+00> : vector<32x32xf32>
    %305 = tpu.matmul %302, %303, %cst_105 {dimension_numbers = #tpu.dot_dimension_numbers<[1], [1], [0], [0], [0, 0, 1, 0], [], []>} : vector<32x16xf32>, vector<32x16xf32>, vector<32x32xf32> -> vector<32x32xf32>
    %cst_106 = arith.constant dense<0xFF800000> : vector<32xf32>
    %306 = vector.multi_reduction <maximumf>, %305, %cst_106 [1] : vector<32x32xf32> to vector<32xf32>
    %307 = vector.shape_cast %306 : vector<32xf32> to vector<32x1xf32>
    %308 = vector.broadcast %307 : vector<32x1xf32> to vector<32x32xf32>
    %309 = arith.subf %305, %308 : vector<32x32xf32>
    %310 = math.exp %309 : vector<32x32xf32>
    %cst_107 = arith.constant dense<0.000000e+00> : vector<32xf32>
    %311 = vector.multi_reduction <add>, %310, %cst_107 [1] : vector<32x32xf32> to vector<32xf32>
    %312 = vector.shape_cast %311 : vector<32xf32> to vector<32x1xf32>
    %313 = vector.broadcast %312 : vector<32x1xf32> to vector<32x32xf32>
    %314 = arith.divf %310, %313 : vector<32x32xf32>
    %cst_108 = arith.constant dense<0.000000e+00> : vector<32x16xf32>
    %315 = tpu.matmul %314, %304, %cst_108 {dimension_numbers = #tpu.dot_dimension_numbers<[1], [0], [0], [1], [0, 0, 1, 1], [], []>} : vector<32x32xf32>, vector<32x16xf32>, vector<32x16xf32> -> vector<32x16xf32>
    %316 = vector.extract_strided_slice %237 {offsets = [0, 80], sizes = [32, 16], strides = [1, 1]} : vector<32x128xf32> to vector<32x16xf32>
    %317 = vector.extract_strided_slice %241 {offsets = [0, 80], sizes = [32, 16], strides = [1, 1]} : vector<32x128xf32> to vector<32x16xf32>
    %318 = vector.extract_strided_slice %245 {offsets = [0, 80], sizes = [32, 16], strides = [1, 1]} : vector<32x128xf32> to vector<32x16xf32>
    %cst_109 = arith.constant dense<0.000000e+00> : vector<32x32xf32>
    %319 = tpu.matmul %316, %317, %cst_109 {dimension_numbers = #tpu.dot_dimension_numbers<[1], [1], [0], [0], [0, 0, 1, 0], [], []>} : vector<32x16xf32>, vector<32x16xf32>, vector<32x32xf32> -> vector<32x32xf32>
    %cst_110 = arith.constant dense<0xFF800000> : vector<32xf32>
    %320 = vector.multi_reduction <maximumf>, %319, %cst_110 [1] : vector<32x32xf32> to vector<32xf32>
    %321 = vector.shape_cast %320 : vector<32xf32> to vector<32x1xf32>
    %322 = vector.broadcast %321 : vector<32x1xf32> to vector<32x32xf32>
    %323 = arith.subf %319, %322 : vector<32x32xf32>
    %324 = math.exp %323 : vector<32x32xf32>
    %cst_111 = arith.constant dense<0.000000e+00> : vector<32xf32>
    %325 = vector.multi_reduction <add>, %324, %cst_111 [1] : vector<32x32xf32> to vector<32xf32>
    %326 = vector.shape_cast %325 : vector<32xf32> to vector<32x1xf32>
    %327 = vector.broadcast %326 : vector<32x1xf32> to vector<32x32xf32>
    %328 = arith.divf %324, %327 : vector<32x32xf32>
    %cst_112 = arith.constant dense<0.000000e+00> : vector<32x16xf32>
    %329 = tpu.matmul %328, %318, %cst_112 {dimension_numbers = #tpu.dot_dimension_numbers<[1], [0], [0], [1], [0, 0, 1, 1], [], []>} : vector<32x32xf32>, vector<32x16xf32>, vector<32x16xf32> -> vector<32x16xf32>
    %330 = vector.extract_strided_slice %237 {offsets = [0, 96], sizes = [32, 16], strides = [1, 1]} : vector<32x128xf32> to vector<32x16xf32>
    %331 = vector.extract_strided_slice %241 {offsets = [0, 96], sizes = [32, 16], strides = [1, 1]} : vector<32x128xf32> to vector<32x16xf32>
    %332 = vector.extract_strided_slice %245 {offsets = [0, 96], sizes = [32, 16], strides = [1, 1]} : vector<32x128xf32> to vector<32x16xf32>
    %cst_113 = arith.constant dense<0.000000e+00> : vector<32x32xf32>
    %333 = tpu.matmul %330, %331, %cst_113 {dimension_numbers = #tpu.dot_dimension_numbers<[1], [1], [0], [0], [0, 0, 1, 0], [], []>} : vector<32x16xf32>, vector<32x16xf32>, vector<32x32xf32> -> vector<32x32xf32>
    %cst_114 = arith.constant dense<0xFF800000> : vector<32xf32>
    %334 = vector.multi_reduction <maximumf>, %333, %cst_114 [1] : vector<32x32xf32> to vector<32xf32>
    %335 = vector.shape_cast %334 : vector<32xf32> to vector<32x1xf32>
    %336 = vector.broadcast %335 : vector<32x1xf32> to vector<32x32xf32>
    %337 = arith.subf %333, %336 : vector<32x32xf32>
    %338 = math.exp %337 : vector<32x32xf32>
    %cst_115 = arith.constant dense<0.000000e+00> : vector<32xf32>
    %339 = vector.multi_reduction <add>, %338, %cst_115 [1] : vector<32x32xf32> to vector<32xf32>
    %340 = vector.shape_cast %339 : vector<32xf32> to vector<32x1xf32>
    %341 = vector.broadcast %340 : vector<32x1xf32> to vector<32x32xf32>
    %342 = arith.divf %338, %341 : vector<32x32xf32>
    %cst_116 = arith.constant dense<0.000000e+00> : vector<32x16xf32>
    %343 = tpu.matmul %342, %332, %cst_116 {dimension_numbers = #tpu.dot_dimension_numbers<[1], [0], [0], [1], [0, 0, 1, 1], [], []>} : vector<32x32xf32>, vector<32x16xf32>, vector<32x16xf32> -> vector<32x16xf32>
    %344 = vector.extract_strided_slice %237 {offsets = [0, 112], sizes = [32, 16], strides = [1, 1]} : vector<32x128xf32> to vector<32x16xf32>
    %345 = vector.extract_strided_slice %241 {offsets = [0, 112], sizes = [32, 16], strides = [1, 1]} : vector<32x128xf32> to vector<32x16xf32>
    %346 = vector.extract_strided_slice %245 {offsets = [0, 112], sizes = [32, 16], strides = [1, 1]} : vector<32x128xf32> to vector<32x16xf32>
    %cst_117 = arith.constant dense<0.000000e+00> : vector<32x32xf32>
    %347 = tpu.matmul %344, %345, %cst_117 {dimension_numbers = #tpu.dot_dimension_numbers<[1], [1], [0], [0], [0, 0, 1, 0], [], []>} : vector<32x16xf32>, vector<32x16xf32>, vector<32x32xf32> -> vector<32x32xf32>
    %cst_118 = arith.constant dense<0xFF800000> : vector<32xf32>
    %348 = vector.multi_reduction <maximumf>, %347, %cst_118 [1] : vector<32x32xf32> to vector<32xf32>
    %349 = vector.shape_cast %348 : vector<32xf32> to vector<32x1xf32>
    %350 = vector.broadcast %349 : vector<32x1xf32> to vector<32x32xf32>
    %351 = arith.subf %347, %350 : vector<32x32xf32>
    %352 = math.exp %351 : vector<32x32xf32>
    %cst_119 = arith.constant dense<0.000000e+00> : vector<32xf32>
    %353 = vector.multi_reduction <add>, %352, %cst_119 [1] : vector<32x32xf32> to vector<32xf32>
    %354 = vector.shape_cast %353 : vector<32xf32> to vector<32x1xf32>
    %355 = vector.broadcast %354 : vector<32x1xf32> to vector<32x32xf32>
    %356 = arith.divf %352, %355 : vector<32x32xf32>
    %cst_120 = arith.constant dense<0.000000e+00> : vector<32x16xf32>
    %357 = tpu.matmul %356, %346, %cst_120 {dimension_numbers = #tpu.dot_dimension_numbers<[1], [0], [0], [1], [0, 0, 1, 1], [], []>} : vector<32x32xf32>, vector<32x16xf32>, vector<32x16xf32> -> vector<32x16xf32>
    %358 = tpu.concatenate %259, %273, %287, %301, %315, %329, %343, %357 in 1 : vector<32x16xf32>, vector<32x16xf32>, vector<32x16xf32>, vector<32x16xf32>, vector<32x16xf32>, vector<32x16xf32>, vector<32x16xf32>, vector<32x16xf32> -> vector<32x128xf32>
    %c1_121 = arith.constant 1 : index
    %c0_122 = arith.constant 0 : index
    %c0_123 = arith.constant 0 : index
    %359 = vector.load %arg7[%c1_121, %c0_122, %c0_123] : memref<2x128x128xf32, #tpu.memory_space<vmem>>, vector<1x128x128xf32>
    %360 = vector.shape_cast %359 : vector<1x128x128xf32> to vector<128x128xf32>
    %cst_124 = arith.constant dense<0.000000e+00> : vector<32x128xf32>
    %361 = tpu.matmul %358, %360, %cst_124 {dimension_numbers = #tpu.dot_dimension_numbers<[1], [0], [0], [1], [0, 0, 1, 1], [], []>} : vector<32x128xf32>, vector<128x128xf32>, vector<32x128xf32> -> vector<32x128xf32>
    %362 = vector.extract_strided_slice %230 {offsets = [3, 0], sizes = [1, 128], strides = [1, 1]} : vector<10x128xf32> to vector<1x128xf32>
    %363 = vector.broadcast %362 : vector<1x128xf32> to vector<32x128xf32>
    %364 = arith.addf %361, %363 : vector<32x128xf32>
    %365 = arith.addf %228, %364 : vector<32x128xf32>
    %366 = vector.extract_strided_slice %230 {offsets = [4, 0], sizes = [1, 128], strides = [1, 1]} : vector<10x128xf32> to vector<1x128xf32>
    %367 = vector.extract_strided_slice %230 {offsets = [5, 0], sizes = [1, 128], strides = [1, 1]} : vector<10x128xf32> to vector<1x128xf32>
    %cst_125 = arith.constant dense<0.000000e+00> : vector<32xf32>
    %368 = vector.multi_reduction <add>, %365, %cst_125 [1] : vector<32x128xf32> to vector<32xf32>
    %369 = vector.shape_cast %368 : vector<32xf32> to vector<32x1xf32>
    %cst_126 = arith.constant 1.280000e+02 : f32
    %370 = vector.broadcast %cst_126 : f32 to vector<32x1xf32>
    %371 = arith.divf %369, %370 : vector<32x1xf32>
    %372 = vector.broadcast %371 : vector<32x1xf32> to vector<32x128xf32>
    %373 = arith.subf %365, %372 : vector<32x128xf32>
    %374 = arith.mulf %373, %373 : vector<32x128xf32>
    %cst_127 = arith.constant dense<0.000000e+00> : vector<32xf32>
    %375 = vector.multi_reduction <add>, %374, %cst_127 [1] : vector<32x128xf32> to vector<32xf32>
    %376 = vector.shape_cast %375 : vector<32xf32> to vector<32x1xf32>
    %cst_128 = arith.constant 1.280000e+02 : f32
    %377 = vector.broadcast %cst_128 : f32 to vector<32x1xf32>
    %378 = arith.divf %376, %377 : vector<32x1xf32>
    %cst_129 = arith.constant 9.99999974E-6 : f32
    %379 = vector.broadcast %cst_129 : f32 to vector<32x1xf32>
    %380 = arith.addf %378, %379 : vector<32x1xf32>
    %381 = math.rsqrt %380 : vector<32x1xf32>
    %382 = vector.broadcast %381 : vector<32x1xf32> to vector<32x128xf32>
    %383 = arith.mulf %373, %382 : vector<32x128xf32>
    %384 = vector.broadcast %366 : vector<1x128xf32> to vector<32x128xf32>
    %385 = arith.mulf %383, %384 : vector<32x128xf32>
    %386 = vector.broadcast %367 : vector<1x128xf32> to vector<32x128xf32>
    %387 = arith.addf %385, %386 : vector<32x128xf32>
    %c1_130 = arith.constant 1 : index
    %c0_131 = arith.constant 0 : index
    %c0_132 = arith.constant 0 : index
    %388 = vector.load %arg8[%c1_130, %c0_131, %c0_132] : memref<2x128x128xf32, #tpu.memory_space<vmem>>, vector<1x128x128xf32>
    %389 = vector.shape_cast %388 : vector<1x128x128xf32> to vector<128x128xf32>
    %cst_133 = arith.constant dense<0.000000e+00> : vector<32x128xf32>
    %390 = tpu.matmul %387, %389, %cst_133 {dimension_numbers = #tpu.dot_dimension_numbers<[1], [0], [0], [1], [0, 0, 1, 1], [], []>} : vector<32x128xf32>, vector<128x128xf32>, vector<32x128xf32> -> vector<32x128xf32>
    %391 = vector.extract_strided_slice %230 {offsets = [6, 0], sizes = [1, 128], strides = [1, 1]} : vector<10x128xf32> to vector<1x128xf32>
    %392 = vector.broadcast %391 : vector<1x128xf32> to vector<32x128xf32>
    %393 = arith.addf %390, %392 : vector<32x128xf32>
    %cst_134 = arith.constant 0.000000e+00 : f32
    %394 = vector.broadcast %cst_134 : f32 to vector<32x128xf32>
    %395 = arith.maximumf %393, %394 : vector<32x128xf32>
    %c1_135 = arith.constant 1 : index
    %c0_136 = arith.constant 0 : index
    %c0_137 = arith.constant 0 : index
    %396 = vector.load %arg9[%c1_135, %c0_136, %c0_137] : memref<2x128x128xf32, #tpu.memory_space<vmem>>, vector<1x128x128xf32>
    %397 = vector.shape_cast %396 : vector<1x128x128xf32> to vector<128x128xf32>
    %cst_138 = arith.constant dense<0.000000e+00> : vector<32x128xf32>
    %398 = tpu.matmul %395, %397, %cst_138 {dimension_numbers = #tpu.dot_dimension_numbers<[1], [0], [0], [1], [0, 0, 1, 1], [], []>} : vector<32x128xf32>, vector<128x128xf32>, vector<32x128xf32> -> vector<32x128xf32>
    %399 = vector.extract_strided_slice %230 {offsets = [7, 0], sizes = [1, 128], strides = [1, 1]} : vector<10x128xf32> to vector<1x128xf32>
    %400 = vector.broadcast %399 : vector<1x128xf32> to vector<32x128xf32>
    %401 = arith.addf %398, %400 : vector<32x128xf32>
    %402 = arith.addf %387, %401 : vector<32x128xf32>
    %403 = vector.extract_strided_slice %230 {offsets = [8, 0], sizes = [1, 128], strides = [1, 1]} : vector<10x128xf32> to vector<1x128xf32>
    %404 = vector.extract_strided_slice %230 {offsets = [9, 0], sizes = [1, 128], strides = [1, 1]} : vector<10x128xf32> to vector<1x128xf32>
    %cst_139 = arith.constant dense<0.000000e+00> : vector<32xf32>
    %405 = vector.multi_reduction <add>, %402, %cst_139 [1] : vector<32x128xf32> to vector<32xf32>
    %406 = vector.shape_cast %405 : vector<32xf32> to vector<32x1xf32>
    %cst_140 = arith.constant 1.280000e+02 : f32
    %407 = vector.broadcast %cst_140 : f32 to vector<32x1xf32>
    %408 = arith.divf %406, %407 : vector<32x1xf32>
    %409 = vector.broadcast %408 : vector<32x1xf32> to vector<32x128xf32>
    %410 = arith.subf %402, %409 : vector<32x128xf32>
    %411 = arith.mulf %410, %410 : vector<32x128xf32>
    %cst_141 = arith.constant dense<0.000000e+00> : vector<32xf32>
    %412 = vector.multi_reduction <add>, %411, %cst_141 [1] : vector<32x128xf32> to vector<32xf32>
    %413 = vector.shape_cast %412 : vector<32xf32> to vector<32x1xf32>
    %cst_142 = arith.constant 1.280000e+02 : f32
    %414 = vector.broadcast %cst_142 : f32 to vector<32x1xf32>
    %415 = arith.divf %413, %414 : vector<32x1xf32>
    %cst_143 = arith.constant 9.99999974E-6 : f32
    %416 = vector.broadcast %cst_143 : f32 to vector<32x1xf32>
    %417 = arith.addf %415, %416 : vector<32x1xf32>
    %418 = math.rsqrt %417 : vector<32x1xf32>
    %419 = vector.broadcast %418 : vector<32x1xf32> to vector<32x128xf32>
    %420 = arith.mulf %410, %419 : vector<32x128xf32>
    %421 = vector.broadcast %403 : vector<1x128xf32> to vector<32x128xf32>
    %422 = arith.mulf %420, %421 : vector<32x128xf32>
    %423 = vector.broadcast %404 : vector<1x128xf32> to vector<32x128xf32>
    %424 = arith.addf %422, %423 : vector<32x128xf32>
    %cst_144 = arith.constant dense<0.000000e+00> : vector<128xf32>
    %425 = vector.multi_reduction <add>, %424, %cst_144 [0] : vector<32x128xf32> to vector<128xf32>
    %426 = vector.shape_cast %425 : vector<128xf32> to vector<1x128xf32>
    %427 = vector.extract_strided_slice %424 {offsets = [0, 0], sizes = [1, 128], strides = [1, 1]} : vector<32x128xf32> to vector<1x128xf32>
    %428 = arith.subf %426, %427 : vector<1x128xf32>
    %cst_145 = arith.constant 0.0322580636 : f32
    %429 = vector.broadcast %cst_145 : f32 to vector<1x128xf32>
    %430 = arith.mulf %428, %429 : vector<1x128xf32>
    %c0_146 = arith.constant 0 : index
    %c0_147 = arith.constant 0 : index
    %431 = vector.load %arg10[%c0_146, %c0_147] : memref<128x128xf32, #tpu.memory_space<vmem>>, vector<128x128xf32>
    %cst_148 = arith.constant dense<0.000000e+00> : vector<1x128xf32>
    %432 = tpu.matmul %430, %431, %cst_148 {dimension_numbers = #tpu.dot_dimension_numbers<[1], [0], [0], [1], [0, 0, 1, 1], [], []>} : vector<1x128xf32>, vector<128x128xf32>, vector<1x128xf32> -> vector<1x128xf32>
    %c2 = arith.constant 2 : index
    %c0_149 = arith.constant 0 : index
    %433 = vector.load %arg12[%c2, %c0_149] : memref<8x128xf32, #tpu.memory_space<vmem>>, vector<1x128xf32>
    %434 = arith.addf %432, %433 : vector<1x128xf32>
    %cst_150 = arith.constant 0.000000e+00 : f32
    %435 = vector.broadcast %cst_150 : f32 to vector<1x128xf32>
    %436 = arith.maximumf %434, %435 : vector<1x128xf32>
    %c0_151 = arith.constant 0 : index
    %c0_152 = arith.constant 0 : index
    %437 = vector.load %arg11[%c0_151, %c0_152] : memref<128x128xf32, #tpu.memory_space<vmem>>, vector<128x128xf32>
    %cst_153 = arith.constant dense<0.000000e+00> : vector<1x128xf32>
    %438 = tpu.matmul %436, %437, %cst_153 {dimension_numbers = #tpu.dot_dimension_numbers<[1], [0], [0], [1], [0, 0, 1, 1], [], []>} : vector<1x128xf32>, vector<128x128xf32>, vector<1x128xf32> -> vector<1x128xf32>
    %c3 = arith.constant 3 : index
    %c0_154 = arith.constant 0 : index
    %439 = vector.load %arg12[%c3, %c0_154] : memref<8x128xf32, #tpu.memory_space<vmem>>, vector<1x128xf32>
    %440 = arith.addf %438, %439 : vector<1x128xf32>
    %c0_155 = arith.constant 0 : index
    %c0_156 = arith.constant 0 : index
    %c0_157 = arith.constant 0 : index
    %441 = vector.load %arg14[%c0_155, %c0_156, %c0_157] : memref<1x1x128xf32, #tpu.memory_space<vmem>>, vector<1x1x128xf32>
    %442 = vector.shape_cast %441 : vector<1x1x128xf32> to vector<1x128xf32>
    %443 = vector.shape_cast %440 : vector<1x128xf32> to vector<1x1x128xf32>
    tpu.vector_store %arg14[%c0_155, %c0_156, %c0_157], %443 {strides = array<i32>} : memref<1x1x128xf32, #tpu.memory_space<vmem>>, vector<1x1x128xf32>,
    return
  }
  func.func @transform_0(%arg0: i32) -> (i32, i32, i32) {
    %c0_i32 = arith.constant 0 : i32
    %c0_i32_0 = arith.constant 0 : i32
    %c0_i32_1 = arith.constant 0 : i32
    return %arg0, %c0_i32, %c0_i32_0 : i32, i32, i32
  }
  func.func @transform_1(%arg0: i32) -> (i32, i32, i32) {
    %c0_i32 = arith.constant 0 : i32
    %c0_i32_0 = arith.constant 0 : i32
    %c0_i32_1 = arith.constant 0 : i32
    return %arg0, %c0_i32, %c0_i32_0 : i32, i32, i32
  }
  func.func @transform_2(%arg0: i32) -> (i32, i32) {
    %c0_i32 = arith.constant 0 : i32
    %c0_i32_0 = arith.constant 0 : i32
    %c0_i32_1 = arith.constant 0 : i32
    return %c0_i32, %c0_i32_0 : i32, i32
  }
  func.func @transform_3(%arg0: i32) -> (i32, i32) {
    %c0_i32 = arith.constant 0 : i32
    %c0_i32_0 = arith.constant 0 : i32
    %c0_i32_1 = arith.constant 0 : i32
    return %c0_i32, %c0_i32_0 : i32, i32
  }
  func.func @transform_4(%arg0: i32) -> (i32, i32) {
    %c0_i32 = arith.constant 0 : i32
    %c0_i32_0 = arith.constant 0 : i32
    %c0_i32_1 = arith.constant 0 : i32
    return %c0_i32, %c0_i32_0 : i32, i32
  }
  func.func @transform_5(%arg0: i32) -> (i32, i32, i32) {
    %c0_i32 = arith.constant 0 : i32
    %c0_i32_0 = arith.constant 0 : i32
    %c0_i32_1 = arith.constant 0 : i32
    %c0_i32_2 = arith.constant 0 : i32
    return %c0_i32, %c0_i32_0, %c0_i32_1 : i32, i32, i32
  }
  func.func @transform_6(%arg0: i32) -> (i32, i32, i32) {
    %c0_i32 = arith.constant 0 : i32
    %c0_i32_0 = arith.constant 0 : i32
    %c0_i32_1 = arith.constant 0 : i32
    %c0_i32_2 = arith.constant 0 : i32
    return %c0_i32, %c0_i32_0, %c0_i32_1 : i32, i32, i32
  }
  func.func @transform_7(%arg0: i32) -> (i32, i32, i32) {
    %c0_i32 = arith.constant 0 : i32
    %c0_i32_0 = arith.constant 0 : i32
    %c0_i32_1 = arith.constant 0 : i32
    %c0_i32_2 = arith.constant 0 : i32
    return %c0_i32, %c0_i32_0, %c0_i32_1 : i32, i32, i32
  }
  func.func @transform_8(%arg0: i32) -> (i32, i32, i32) {
    %c0_i32 = arith.constant 0 : i32
    %c0_i32_0 = arith.constant 0 : i32
    %c0_i32_1 = arith.constant 0 : i32
    %c0_i32_2 = arith.constant 0 : i32
    return %c0_i32, %c0_i32_0, %c0_i32_1 : i32, i32, i32
  }
  func.func @transform_9(%arg0: i32) -> (i32, i32) {
    %c0_i32 = arith.constant 0 : i32
    %c0_i32_0 = arith.constant 0 : i32
    %c0_i32_1 = arith.constant 0 : i32
    return %c0_i32, %c0_i32_0 : i32, i32
  }
  func.func @transform_10(%arg0: i32) -> (i32, i32) {
    %c0_i32 = arith.constant 0 : i32
    %c0_i32_0 = arith.constant 0 : i32
    %c0_i32_1 = arith.constant 0 : i32
    return %c0_i32, %c0_i32_0 : i32, i32
  }
  func.func @transform_11(%arg0: i32) -> (i32, i32) {
    %c0_i32 = arith.constant 0 : i32
    %c0_i32_0 = arith.constant 0 : i32
    %c0_i32_1 = arith.constant 0 : i32
    return %c0_i32, %c0_i32_0 : i32, i32
  }
  func.func @transform_12(%arg0: i32) -> (i32, i32, i32) {
    %c0_i32 = arith.constant 0 : i32
    %c0_i32_0 = arith.constant 0 : i32
    %c0_i32_1 = arith.constant 0 : i32
    %c0_i32_2 = arith.constant 0 : i32
    return %c0_i32, %c0_i32_0, %c0_i32_1 : i32, i32, i32
  }
  func.func @transform_13(%arg0: i32) -> (i32, i32, i32) {
    %c0_i32 = arith.constant 0 : i32
    %c0_i32_0 = arith.constant 0 : i32
    %c0_i32_1 = arith.constant 0 : i32
    return %arg0, %c0_i32, %c0_i32_0 : i32, i32, i32
  }
}

</mosaic_0001>

<bundles_post_ra>
// kernel: forward.1
= control target key start
LH: loop header
LB: loop body
LE: loop exit
PB: predicated region body
PF: predicated region fallthrough
CT: control target
= control target key end

     0   :  { %s12261_s0 = inlined_call_operand.vmem [shape: f32[2,16,48], index: 0, kind: input, shape index: {}]   ;;  %s12262_s1 = inlined_call_operand.vmem [shape: f32[2,16,48], index: 1, kind: input, shape index: {}]   ;;  %s12263_s2 = inlined_call_operand.vmem [shape: f32[48,128], index: 2, kind: input, shape index: {}]   ;;  %s12264_s3 = inlined_call_operand.vmem [shape: f32[48,128], index: 3, kind: input, shape index: {}]   ;;  %s12265_s4 = inlined_call_operand.vmem [shape: f32[32,128], index: 4, kind: input, shape index: {}]   ;;  %s12266_s5 = inlined_call_operand.vmem [shape: f32[2,128,384], index: 5, kind: input, shape index: {}]   ;;  %s12267_s6 = inlined_call_operand.vmem [shape: f32[2,128,128], index: 6, kind: input, shape index: {}]   ;;  %s12268_s7 = inlined_call_operand.vmem [shape: f32[2,128,128], index: 7, kind: input, shape index: {}]   ;;  %s12269_s8 = inlined_call_operand.vmem [shape: f32[2,128,128], index: 8, kind: input, shape index: {}]   ;;  %s12270_s9 = inlined_call_operand.vmem [shape: f32[128,128], index: 9, kind: input, shape index: {}]   ;;  %s12271_s10 = inlined_call_operand.vmem [shape: f32[128,128], index: 10, kind: input, shape index: {}]   ;;  %s12272_s11 = inlined_call_operand.vmem [shape: f32[8,128], index: 11, kind: input, shape index: {}]   ;;  %s12273_s12 = inlined_call_operand.vmem [shape: f32[2,10,128], index: 12, kind: input, shape index: {}]   ;;  %s12274_s13 = inlined_call_operand.hbm [shape: f32[2,1,128], index: 13, kind: output, shape index: {}]  }
   0x1   :  { %12300 = sst [smem:[#allocation8_spill]] %s12261_s0 }
   0x2   :  { %12301 = sst [smem:[#allocation9_spill]] %s12262_s1 }
   0x3   :  { %18 = vsyncpa [#allocation3], 0 }
   0x4   :  { %20 = vsyncpa [#allocation3 + $0x1], 0  ;;  %s10195_s25 = smov 0   ;;  %s10197_s26 = smov 0  }
   0x5   :  { %s10199_s27 = smov 0   ;;  %s10201_s28 = smov 0  }
   0x6 LB: > { %12302 = sst [smem:[#allocation5_spill]] %s10108_s27  ;;  %s10216_s29 = sadd.s32 4294967295, %s10112_s28   ;;  %s10112_s28 = sphi %s10201_s28, %s12331_s28   ;;  %s10108_s27 = sphi %s10199_s27, %s12333_s27   ;;  %s10104_s26 = sphi %s10197_s26, %s12335_s26   ;;  %s10100_s25 = sphi %s10195_s25, %s12334_s25  }
   0x7   : > { %s6944_s30 = sadd.s32 4294967294, %s10112_s28   ;;  %s10220_s14 = sadd.s32 1, %s10112_s28  }
   0x8   : > { %12303 = sst [smem:[#allocation6_spill]] %s10220_s14  ;;  %s316_s15 = sadd.s32 1, %s10108_s27 }
   0x9   : > { %s313_s16 = ssub.s32 %s10112_s28, %s10220_s14  ;;  %p326_p0 = scmp.ne.s32.totalorder %s10108_s27, %s10104_s26 }
   0xa   : > { %p314_p1 = scmp.eq.s32.totalorder %s313_s16, 0  ;;  %p327_p2 = scmp.eq.s32.totalorder %s10216_s29, 1 }
   0xb   : > { %p332_p3 = scmp.ne.s32.totalorder %s10104_s26, %s10100_s25  ;;  %p333_p4 = scmp.eq.s32.totalorder %s6944_s30, 1 }
   0xc   : > { %s10231_s17 = scalar_select %p314_p1, %s10108_s27, %s316_s15  }
   0xd   : > { %p10233_p5 = por %p327_p2, %p326_p0  ;;  %p10237_p6 = por %p333_p4, %p332_p3 }
   0xe   : > { %12304 = sst [smem:[#allocation7_spill]] %s10231_s17  ;;  %p6947_p7 = scmp.ge.s32.totalorder %s10112_s28, 1 }
   0xf   : > { %p400_p8 = scmp.lt.s32.totalorder %s10112_s28, 3 }
  0x11   : > { %p401_p9 = pnand %p6947_p7, %p400_p8 }
  0x12   : > { %v460_v0 = vld [vmem:[%s12263_s2] sm:$0xff] (!%p401_p9)  ;;  %v461_v1 = vld [vmem:[%s12263_s2 + $0x8] sm:$0xff] (!%p401_p9)  ;;  %p448_p10 = scmp.lt.s32.totalorder (!%p401_p9), %s10216_s29, 1  ;;  %v462_v5 = vld [vmem:[%s12263_s2 + $0x10] sm:$0xff] (!%p401_p9)  ;;  %vm466_vm0 = vcmask (!%p401_p9), 392192   ;;  %s12307_s0 = sld [smem:[#allocation8_spill]] (!%p401_p9) }
  0x13   : > { %404 = sbr.rel (%p401_p9) target bundleno = 13400 (0x3458), region = 72  ;;  %v550_v2 = vld [vmem:[%s12264_s3] sm:$0xff] (!%p401_p9)  ;;  %v8571_v3 = vpack.c.bf16 (!%p401_p9), %v461_v1, %v460_v0  ;;  %v551_v4 = vld [vmem:[%s12264_s3 + $0x8] sm:$0xff] (!%p401_p9)  ;;  %v463_v6 = vld [vmem:[%s12263_s2 + $0x18] sm:$0xff] (!%p401_p9)  ;;  %s12308_s1 = sld [smem:[#allocation9_spill]] (!%p401_p9)  ;;  %vm956_vm1 = vcmask (!%p401_p9), 130048  }
  0x14   : > { %v8583_v7 = vpack.c.bf16 (!%p401_p9), %v551_v4, %v550_v2  ;;  %v8575_v8 = vpack.c.bf16 (!%p401_p9), %v463_v6, %v462_v5  ;;  %v552_v9 = vld [vmem:[%s12264_s3 + $0x10] sm:$0xff] (!%p401_p9)  ;;  %v553_v10 = vld [vmem:[%s12264_s3 + $0x18] sm:$0xff] (!%p401_p9)  ;;  %v464_v11 = vld [vmem:[%s12263_s2 + $0x20] sm:$0xff] (!%p401_p9)  ;;  %vm1066_vm3 = vcmask (!%p401_p9), 261120   ;;  %s12289_s21 = smov (!%p401_p9), 96   ;;  %s12287_s22 = smov (!%p401_p9), 80  }
  0x15   : > { %8572 = vmatprep.subr.bf16.mxu0 (!%p401_p9), %v8571_v3  ;;  %v8587_v12 = vpack.c.bf16 (!%p401_p9), %v553_v10, %v552_v9  ;;  %v465_v13 = vld [vmem:[%s12263_s2 + $0x28] sm:$0xff] (!%p401_p9)  ;;  %v554_v14 = vld [vmem:[%s12264_s3 + $0x20] sm:$0xff] (!%p401_p9)  ;;  %v639_v24 = vld [vmem:[%s12265_s4 + $0x10] sm:$0xff] (!%p401_p9)  ;;  %s12291_s23 = smov (!%p401_p9), 64   ;;  %s12283_s30 = smov (!%p401_p9), 32   ;;  %vm3226_vm4 = vcmask (!%p401_p9), 523264  }
  0x16   : > { %v555_v15 = vld [vmem:[%s12264_s3 + $0x28] sm:$0xff] (!%p401_p9)  ;;  %8584 = vmatprep.subr.bf16.mxu1 (!%p401_p9), %v8583_v7  ;;  %8574 = vmatpush3.bf16.msra.mxu0 (!%p401_p9), %v8571_v3  ;;  %v8579_v16 = vpack.c.bf16 (!%p401_p9), %v465_v13, %v464_v11  ;;  %v637_v22 = vld [vmem:[%s12265_s4] sm:$0xff] (!%p401_p9)  ;;  %v640_v27 = vld [vmem:[%s12265_s4 + $0x18] sm:$0xff] (!%p401_p9)  ;;  %s12281_s15 = smov (!%p401_p9), 16   ;;  %vm3231_vm5 = vcmask (!%p401_p9), 654336   ;;  %vm3236_vm6 = vcmask (!%p401_p9), 785408  }
  0x17   : > { %8586 = vmatpush3.bf16.msra.mxu1 (!%p401_p9), %v8583_v7  ;;  %8576 = vmatprep.subr.bf16.mxu0 (!%p401_p9), %v8575_v8  ;;  %v8591_v17 = vpack.c.bf16 (!%p401_p9), %v555_v15, %v554_v14  ;;  %v638_v30 = vld [vmem:[%s12265_s4 + $0x8] sm:$0xff] (!%p401_p9)  ;;  %v714_v35 = vld [vmem:[%s12266_s5 + $0x20] sm:$0xff] (!%p401_p9)  ;;  %v713_v38 = vld [vmem:[%s12266_s5 + $0x18] sm:$0xff] (!%p401_p9)  ;;  %vm3241_vm7 = vcmask (!%p401_p9), 916480   ;;  %s12320_s17 = smov (!%p401_p9), 48   ;;  %s12321_s20 = smov (!%p401_p9), 32  }
  0x18   : > { %8588 = vmatprep.subr.bf16.mxu1 (!%p401_p9), %v8587_v12  ;;  %v711_v34 = vld [vmem:[%s12266_s5 + $0x8] sm:$0xff] (!%p401_p9)  ;;  %v710_v36 = vld [vmem:[%s12266_s5] sm:$0xff] (!%p401_p9)  ;;  %v717_v39 = vld [vmem:[%s12266_s5 + $0x38] sm:$0xff] (!%p401_p9)  ;;  %vm10123_vm8 = vmmov (!%p401_p9), 0  }
  0x19   : > { %v8595_v37 = vpack.c.bf16 (!%p401_p9), %v714_v35, %v711_v34  ;;  %v720_v40 = vld [vmem:[%s12266_s5 + $0x50] sm:$0xff] (!%p401_p9)  ;;  %v8597_v41 = vpack.c.bf16 (!%p401_p9), %v713_v38, %v710_v36  ;;  %v715_v44 = vld [vmem:[%s12266_s5 + $0x28] sm:$0xff] (!%p401_p9)  ;;  %v726_v49 = vld [vmem:[%s12266_s5 + $0x80] sm:$0xff] (!%p401_p9) }
  0x1a   : > { %s449_s27 = scalar_select %p448_p10, %s10216_s29, 1  ;;  %8578 = vmatpush3.bf16.msra.mxu0 %v8575_v8  ;;  %v8599_v42 = vpack.c.bf16 %v720_v40, %v717_v39  ;;  %v712_v43 = vld [vmem:[%s12266_s5 + $0x10] sm:$0xff]  ;;  %v719_v47 = vld [vmem:[%s12266_s5 + $0x48] sm:$0xff]  ;;  %v718_v51 = vld [vmem:[%s12266_s5 + $0x40] sm:$0xff] }
  0x1b   : > { %8590 = vmatpush3.bf16.msra.mxu1 %v8587_v12  ;;  %8580 = vmatprep.subr.bf16.mxu0 %v8579_v16  ;;  %v716_v45 = vld [vmem:[%s12266_s5 + $0x30] sm:$0xff]  ;;  %v8627_v46 = vpack.c.bf16 %v715_v44, %v712_v43  ;;  %v723_v48 = vld [vmem:[%s12266_s5 + $0x68] sm:$0xff]  ;;  %v721_v52 = vld [vmem:[%s12266_s5 + $0x58] sm:$0xff] }
  0x1c   : > { %s7251_s24 = sshll.u32 %s449_s27, 4  ;;  %8592 = vmatprep.subr.bf16.mxu1 %v8591_v17  ;;  %v8601_v50 = vpack.c.bf16 %v719_v47, %v716_v45  ;;  %v8603_v53 = vpack.c.bf16 %v726_v49, %v723_v48  ;;  %v8631_v54 = vpack.c.bf16 %v721_v52, %v718_v51  ;;  %v722_v55 = vld [vmem:[%s12266_s5 + $0x60] sm:$0xff]  ;;  %v725_v56 = vld [vmem:[%s12266_s5 + $0x78] sm:$0xff]  ;;  %v732_v11 = vld [vmem:[%s12266_s5 + $0xb0] sm:$0xff]  ;;  %v12279_v49 = vmov 0.0   ;;  %s12293_s27 = smov 112  }
  0x1d   : > { %s452_s16 = scalar_lea.vmem %s12307_s0, %s7251_s24  ;;  %s457_s14 = scalar_lea.vmem %s12308_s1, %s7251_s24  ;;  %v8605_v57 = vpack.c.bf16 %v725_v56, %v722_v55  ;;  %v729_v10 = vld [vmem:[%s12266_s5 + $0x98] sm:$0xff]  ;;  %v724_v12 = vld [vmem:[%s12266_s5 + $0x70] sm:$0xff]  ;;  %v727_v14 = vld [vmem:[%s12266_s5 + $0x88] sm:$0xff] }
  0x1e   : > { %v458_v18 = vld [vmem:[%s452_s16] sm:$0xff]  ;;  %8582 = vmatpush3.bf16.msra.mxu0 %v8579_v16  ;;  %v459_v20 = vld [vmem:[%s452_s16 + $0x8] sm:$0xff]  ;;  %v8607_v13 = vpack.c.bf16 %v732_v11, %v729_v10  ;;  %v728_v15 = vld [vmem:[%s12266_s5 + $0x90] sm:$0xff]  ;;  %s12285_s24 = smov 48   ;;  %s12319_s16 = smov 80  }
  0x1f   : > { %v548_v19 = vld [vmem:[%s457_s14] sm:$0xff]  ;;  %7731 = vmatprep.mubr.msk.f32.mxu0 %vm466_vm0, %v458_v18  ;;  %8594 = vmatpush3.bf16.msra.mxu1 %v8591_v17  ;;  %v549_v21 = vld [vmem:[%s457_s14 + $0x8] sm:$0xff]  ;;  %v8635_v17 = vpack.c.bf16 %v727_v14, %v724_v12  ;;  %v749_v43 = vld [vmem:[%s12266_s5 + $0x138] sm:$0xff]  ;;  %s12318_s14 = smov 112  }
  0x20   : > { %7746 = vmatprep.mubr.msk.f32.mxu1 %vm466_vm0, %v548_v19  ;;  %8596 = vmatprep.subr.bf16.mxu0 %v8595_v37  ;;  %v731_v16 = vld [vmem:[%s12266_s5 + $0xa8] sm:$0xff]  ;;  %v750_v38 = vld [vmem:[%s12266_s5 + $0x140] sm:$0xff]  ;;  %v756_v47 = vld [vmem:[%s12266_s5 + $0x170] sm:$0xff] }
  0x21   : > { %7732 = vmatmul.mubr.msk.f32.vlgmr.msra.gmra.mrb[0].mxu0 %vm466_vm0, %v459_v20  ;;  %8628 = vmatprep.subr.bf16.mxu1 %v8627_v46  ;;  %v8609_v18 = vpack.c.bf16 %v731_v16, %v728_v15  ;;  %v735_v19 = vld [vmem:[%s12266_s5 + $0xc8] sm:$0xff]  ;;  %v738_v20 = vld [vmem:[%s12266_s5 + $0xe0] sm:$0xff]  ;;  %v748_v48 = vld [vmem:[%s12266_s5 + $0x130] sm:$0xff] }
  0x22   : > { %7747 = vmatmul.mubr.msk.f32.vlgmr.msra.gmra.mrb[0].mxu1 %vm466_vm0, %v549_v21  ;;  %8598 = vmatpush1.bf16.msra.mxu0 %v8597_v41  ;;  %v730_v21 = vld [vmem:[%s12266_s5 + $0xa0] sm:$0xff]  ;;  %v743_v34 = vld [vmem:[%s12266_s5 + $0x108] sm:$0xff]  ;;  %v745_v41 = vld [vmem:[%s12266_s5 + $0x118] sm:$0xff] }
  0x23   : > { %8600 = vmatprep.subr.bf16.mxu0 %v8599_v42  ;;  %8630 = vmatpush3.bf16.msra.mxu1 %v8627_v46  ;;  %v747_v37 = vld [vmem:[%s12266_s5 + $0x128] sm:$0xff]  ;;  %v742_v39 = vld [vmem:[%s12266_s5 + $0x100] sm:$0xff]  ;;  %v753_v46 = vld [vmem:[%s12266_s5 + $0x158] sm:$0xff] }
  0x24   : > { %8632 = vmatprep.subr.bf16.mxu1 %v8631_v54  ;;  %v8619_v40 = vpack.c.bf16 %v750_v38, %v747_v37  ;;  %v746_v42 = vld [vmem:[%s12266_s5 + $0x120] sm:$0xff]  ;;  %v8647_v44 = vpack.c.bf16 %v745_v41, %v742_v39  ;;  %822 = vmatprep.mubr.f32.mxu0 %v12279_v49  ;;  %v751_v51 = vld [vmem:[%s12266_s5 + $0x148] sm:$0xff]  ;;  %v752_v52 = vld [vmem:[%s12266_s5 + $0x150] sm:$0xff] }
  0x25   : > { %v8621_v45 = vpack.c.bf16 %v749_v43, %v746_v42  ;;  %v754_v56 = vld [vmem:[%s12266_s5 + $0x160] sm:$0xff]  ;;  %vm10515_vm2 = vmpackc.low %vm956_vm1, %vm956_vm1 }
  0x26   : > { %8602 = vmatpush1.bf16.msra.mxu0 %v8601_v50  ;;  %v8623_v50 = vpack.c.bf16 %v756_v47, %v753_v46  ;;  %v6956_v12 = vld [vmem:[%s12272_s11] ss:$0 sm:$0xff]  ;;  %v6957_v14 = vld [vmem:[%s12272_s11 + $0x1] ss:$0 sm:$0xff] }
  0x27   : > { %8604 = vmatprep.subr.bf16.mxu0 %v8603_v53  ;;  %8634 = vmatpush3.bf16.msra.mxu1 %v8631_v54  ;;  %v755_v53 = vld [vmem:[%s12266_s5 + $0x168] sm:$0xff]  ;;  %v8651_v54 = vpack.c.bf16 %v751_v51, %v748_v48 }
  0x28   : > { %8636 = vmatprep.subr.bf16.mxu1 %v8635_v17  ;;  %v8625_v55 = vpack.c.bf16 %v755_v53, %v752_v52 }
  0x2a   : > { %8606 = vmatpush1.bf16.msra.mxu0 %v8605_v57  ;;  %v757_v57 = vld [vmem:[%s12266_s5 + $0x178] sm:$0xff] }
  0x2b   : > { %8608 = vmatprep.subr.bf16.mxu0 %v8607_v13  ;;  %8638 = vmatpush3.bf16.msra.mxu1 %v8635_v17 }
  0x2e   : > { %8610 = vmatpush1.bf16.msra.mxu0 %v8609_v18 }
  0xf4   : > { %v7733_v23 = vpop.f32.mrb[0].mxu0 }
  0xf5   : > { %v7748_v25 = vpop.f32.mrb[0].mxu1  ;;  %v539_v26 = vpop.f32.mrb[1].mxu0  ;;  %v642_v33 = vadd.f32 %v7733_v23, %v638_v30  ;;  %v733_v23 = vld [vmem:[%s12266_s5 + $0xb8] sm:$0xff]  ;;  %v736_v30 = vld [vmem:[%s12266_s5 + $0xd0] sm:$0xff] }
  0xf6   : > { %v641_v28 = vadd.f32 %v637_v22, %v539_v26  ;;  %v628_v29 = vpop.f32.mrb[1].mxu1  ;;  %v644_v32 = vadd.f32 %v7748_v25, %v640_v27  ;;  %v8611_v22 = vpack.c.bf16 %v738_v20, %v735_v19  ;;  %v737_v25 = vld [vmem:[%s12266_s5 + $0xd8] sm:$0xff]  ;;  %v8639_v26 = vpack.c.bf16 %v733_v23, %v730_v21 }
  0xf7   : > { %v643_v31 = vadd.f32 %v639_v24, %v628_v29  ;;  %v734_v24 = vld [vmem:[%s12266_s5 + $0xc0] sm:$0xff]  ;;  %v744_v29 = vld [vmem:[%s12266_s5 + $0x110] sm:$0xff] }
  0xf8   : > { %647 = vadd.xlane.f32.xlu0 %v641_v28  ;;  %v8613_v27 = vpack.c.bf16 %v737_v25, %v734_v24  ;;  %8612 = vmatprep.subr.bf16.mxu0 %v8611_v22 }
  0xf9   : > { %651 = vadd.xlane.f32.xlu1 %v643_v31  ;;  %8640 = vmatprep.subr.bf16.mxu1 %v8639_v26 }
  0xfa   : > { %8614 = vmatpush1.bf16.msra.mxu0 %v8613_v27  ;;  %8642 = vmatpush3.bf16.msra.mxu1 %v8639_v26 }
  0xfc   : > { %649 = vadd.xlane.f32.xlu0 %v642_v33 }
  0xfd   : > { %653 = vadd.xlane.f32.xlu1 %v644_v32 }
 0x185   : > { %v648_v58 = vpop.xlane.xlu0 %647 }
 0x186   : > { %v652_v59 = vpop.xlane.xlu1 %651  ;;  %v656_v60 = vmul.f32 0.0078125, %v648_v58  ;;  %v8655_v58 = vpack.c.bf16 %v757_v57, %v754_v56 }
 0x187   : > { %v658_v61 = vmul.f32 0.0078125, %v652_v59 }
 0x188   : > { %v10351_v62 = vsub.f32 %v641_v28, %v656_v60  ;;  %v741_v28 = vld [vmem:[%s12266_s5 + $0xf8] sm:$0xff] }
 0x189   : > { %v650_v63 = vpop.xlane.xlu0 %649  ;;  %v10355_v3 = vsub.f32 %v643_v31, %v658_v61  ;;  %v8615_v31 = vpack.c.bf16 %v744_v29, %v741_v28  ;;  %v708_v28 = vld [vmem:[%s12273_s12] sm:$0xff] }
 0x18a   : > { %v654_v0 = vpop.xlane.xlu1 %653  ;;  %v657_v1 = vmul.f32 0.0078125, %v650_v63  ;;  %v664_v2 = vmul.f32 %v10351_v62, %v10351_v62 }
 0x18b   : > { %v659_v4 = vmul.f32 0.0078125, %v654_v0  ;;  %v666_v6 = vmul.f32 %v10355_v3, %v10355_v3  ;;  %8616 = vmatprep.subr.bf16.mxu0 %v8615_v31 }
 0x18c   : > { %668 = vadd.xlane.f32.xlu0 %v664_v2  ;;  %v10357_v5 = vsub.f32 %v642_v33, %v657_v1  ;;  %v740_v33 = vld [vmem:[%s12266_s5 + $0xf0] sm:$0xff] }
 0x18d   : > { %v10363_v8 = vsub.f32 %v644_v32, %v659_v4  ;;  %v739_v32 = vld [vmem:[%s12266_s5 + $0xe8] sm:$0xff]  ;;  %v8617_v36 = vpack.c.bf16 %v743_v34, %v740_v33 }
 0x18e   : > { %v665_v7 = vmul.f32 %v10357_v5, %v10357_v5  ;;  %v8643_v35 = vpack.c.bf16 %v739_v32, %v736_v30 }
 0x18f   : > { %v667_v9 = vmul.f32 %v10363_v8, %v10363_v8  ;;  %8618 = vmatpush1.bf16.msra.mxu0 %v8617_v36 }
 0x190   : > { %672 = vadd.xlane.f32.xlu0 %v666_v6  ;;  %670 = vadd.xlane.f32.xlu1 %v665_v7 }
 0x191   : > { %8644 = vmatprep.subr.bf16.mxu1 %v8643_v35  ;;  %8620 = vmatprep.subr.bf16.mxu0 %v8619_v40 }
 0x192   : > { %8646 = vmatpush3.bf16.msra.mxu1 %v8643_v35 }
 0x193   : > { %8648 = vmatprep.subr.bf16.mxu1 %v8647_v44  ;;  %8622 = vmatpush1.bf16.msra.mxu0 %v8621_v45 }
 0x194   : > { %674 = vadd.xlane.f32.xlu1 %v667_v9  ;;  %8624 = vmatprep.subr.bf16.mxu0 %v8623_v50 }
 0x196   : > { %8650 = vmatpush3.bf16.msra.mxu1 %v8647_v44 }
 0x197   : > { %8652 = vmatprep.subr.bf16.mxu1 %v8651_v54  ;;  %8626 = vmatpush1.bf16.msra.mxu0 %v8625_v55 }
 0x19a   : > { %8654 = vmatpush3.bf16.msra.mxu1 %v8651_v54 }
 0x19b   : > { %8656 = vmatprep.subr.bf16.mxu1 %v8655_v58 }
 0x19e   : > { %8658 = vmatpush3.bf16.msra.mxu1 %v8655_v58 }
 0x219   : > { %v669_v59 = vpop.xlane.xlu0 %668 }
 0x21a   : > { %v676_v60 = vmul.f32 0.0078125, %v669_v59 }
 0x21c   : > { %v680_v61 = vadd.f32 1e-05, %v676_v60 }
 0x21d   : > { %v671_v63 = vpop.xlane.xlu1 %670  ;;  %v673_v0 = vpop.xlane.xlu0 %672 }
 0x21e   : > { %9752 = vrsqrt.f32 %v680_v61  ;;  %v677_v1 = vmul.f32 0.0078125, %v671_v63  ;;  %v678_v2 = vmul.f32 0.0078125, %v673_v0 }
 0x220   : > { %v681_v4 = vadd.f32 1e-05, %v677_v1  ;;  %v682_v6 = vadd.f32 1e-05, %v678_v2 }
 0x221   : > { %v675_v7 = vpop.xlane.xlu1 %674 }
 0x222   : > { %9754 = vrsqrt.f32 %v681_v4  ;;  %v679_v9 = vmul.f32 0.0078125, %v675_v7 }
 0x223   : > { %9756 = vrsqrt.f32 %v682_v6 }
 0x224   : > { %v683_v10 = vadd.f32 1e-05, %v679_v9 }
 0x226   : > { %9758 = vrsqrt.f32 %v683_v10 }
 0x228   : > { %v9753_v11 = vpop.eup %9752 }
 0x229   : > { %v688_v13 = vmul.f32 %v9753_v11, %v10351_v62 }
 0x22b   : > { %v696_v15 = vmul.f32 %v6956_v12, %v688_v13 }
 0x22c   : > { %v9755_v16 = vpop.eup %9754 }
 0x22d   : > { %v9757_v17 = vpop.eup %9756  ;;  %v10471_v18 = vadd.f32 %v6957_v14, %v696_v15  ;;  %v689_v19 = vmul.f32 %v9755_v16, %v10357_v5 }
 0x22e   : > { %v690_v20 = vmul.f32 %v9757_v17, %v10355_v3 }
 0x22f   : > { %823 = vmatmul.mubr.f32.vlgmr.msra.gmra.mrb[2].mxu0 %v10471_v18  ;;  %7781 = vmatprep.mubr.f32.mxu1 %v10471_v18  ;;  %v697_v21 = vmul.f32 %v6956_v12, %v689_v19 }
 0x230   : > { %v9759_v22 = vpop.eup %9758  ;;  %828 = vmatprep.mubr.f32.mxu0 %v12279_v49  ;;  %v698_v62 = vmul.f32 %v6956_v12, %v690_v20 }
 0x231   : > { %v10478_v23 = vadd.f32 %v6957_v14, %v697_v21  ;;  %v691_v24 = vmul.f32 %v9759_v22, %v10363_v8  ;;  %v932_v8 = vlaneseq }
 0x232   : > { %v10481_v25 = vadd.f32 %v6957_v14, %v698_v62 }
 0x233   : > { %829 = vmatmul.mubr.f32.gmra.mrb[4].mxu0 %v10478_v23  ;;  %7782 = vmatmul.mubr.f32.vlgmr.msra.gmra.mrb[2].mxu1 %v10478_v23  ;;  %v699_v3 = vmul.f32 %v6956_v12, %v691_v24  ;;  %v10493_v26 = vshrl.u32 %v932_v8, 7 }
 0x234   : > { %7784 = vmatprep.mubr.f32.mxu1 %v10481_v25  ;;  %834 = vmatprep.mubr.f32.mxu0 %v12279_v49 }
 0x235   : > { %v10487_v5 = vadd.f32 %v6957_v14, %v699_v3  ;;  %v10496_v27 = vsub.s32 0, %v10493_v26  ;;  %v12278_v30 = vsub.s32 2, %v10493_v26  ;;  %v10504_v31 = vsub.s32 1, %v10493_v26 }
 0x237   : > { %835 = vmatmul.mubr.f32.gmra.mrb[6].mxu0 %v10481_v25  ;;  %7785 = vmatmul.mubr.f32.gmra.mrb[4].mxu1 %v10487_v5  ;;  %v935_v29 = vrot.slane %v708_v28, %v10496_v27  ;;  %v951_v35 = vrot.slane %v708_v28, %v12278_v30  ;;  %v943_v36 = vrot.slane %v708_v28, %v10504_v31 }
 0x238   : > { %840 = vmatprep.mubr.f32.mxu0 %v12279_v49 }
 0x23b   : > { %841 = vmatmul.mubr.f32.gmra.mrb[8].mxu0 %v10487_v5 }
 0x302   : > { %v824_v32 = vpop.f32.mrb[2].mxu0 }
 0x303   : > { %v10506_v33 = vadd.f32 %v935_v29, %v824_v32  ;;  %v826_v34 = vpop.f32.mrb[3].mxu0 }
 0x304   : > { %v944_v42 = vadd.f32 %v943_v36, %v826_v34 }
 0x305   : > { %7795 = vmatprep.mubr.msk.f32.mxu0 %vm956_vm1, %v10506_v33 }
 0x306   : > { %v830_v37 = vpop.f32.mrb[4].mxu0  ;;  %v7783_v38 = vpop.f32.mrb[2].mxu1 }
 0x307   : > { %v953_v39 = vadd.f32 %v7783_v38, %v951_v35  ;;  %v832_v40 = vpop.f32.mrb[5].mxu0  ;;  %v913_v41 = vpop.f32.mrb[3].mxu1  ;;  %v10535_v2 = vadd.f32 %v935_v29, %v830_v37 }
 0x308   : > { %v945_v43 = vadd.f32 %v943_v36, %v832_v40  ;;  %v952_v44 = vadd.f32 %v951_v35, %v913_v41 }
 0x30a   : > { %v836_v46 = vpop.f32.mrb[6].mxu0  ;;  %v7786_v47 = vpop.f32.mrb[4].mxu1  ;;  %v8659_v48 = vpack.c.bf16 %v945_v43, %v944_v42  ;;  %v8671_v50 = vpack.c.bf16 %v953_v39, %v952_v44  ;;  %v10519_v51 = vpack.i.bf16 %v945_v43, %v944_v42  ;;  %v10521_v55 = vpack.i.bf16 %v953_v39, %v952_v44 }
 0x30b   : > { %v955_v52 = vadd.f32 %v7786_v47, %v951_v35  ;;  %v838_v53 = vpop.f32.mrb[7].mxu0  ;;  %v923_v54 = vpop.f32.mrb[5].mxu1  ;;  %v10537_v4 = vadd.f32 %v935_v29, %v836_v46 }
 0x30c   : > { %v954_v56 = vadd.f32 %v951_v35, %v923_v54  ;;  %8661 = vmatprep.subr.msk.bf16.mxu0 %vm10515_vm2, %v8659_v48  ;;  %8672 = vmatprep.subr.bf16.mxu1 %v8671_v50  ;;  %v946_v60 = vadd.f32 %v943_v36, %v838_v53 }
 0x30d   : > { %8664 = vmatpush3.bf16.xpose.msk.msra.mxu0 %vm10515_vm2, %v8659_v48  ;;  %8674 = vmatpush3.bf16.msra.mxu1 %v8671_v50 }
 0x30e   : > { %v842_v57 = vpop.f32.mrb[8].mxu0  ;;  %v8675_v58 = vpack.c.bf16 %v955_v52, %v954_v56  ;;  %v10527_v59 = vpack.i.bf16 %v955_v52, %v954_v56 }
 0x30f   : > { %v844_v61 = vpop.f32.mrb[9].mxu0  ;;  %v10543_v6 = vadd.f32 %v935_v29, %v842_v57 }
 0x310   : > { %v947_v63 = vadd.f32 %v943_v36, %v844_v61  ;;  %8676 = vmatprep.subr.bf16.mxu1 %v8675_v58 }
 0x311   : > { %8678 = vmatpush3.bf16.msra.mxu1 %v8675_v58 }
 0x312   : > { %v8665_v0 = vpack.c.bf16 %v947_v63, %v946_v60  ;;  %v10529_v1 = vpack.i.bf16 %v947_v63, %v946_v60 }
 0x314   : > { %8667 = vmatprep.subr.msk.bf16.mxu0 %vm10515_vm2, %v8665_v0 }
 0x315   : > { %8670 = vmatpush3.bf16.xpose.msk.msra.mxu0 %vm10515_vm2, %v8665_v0 }
 0x31c   : > { %7796 = vmatmul.mubr.msk.f32.vlgmr.msra.gmra.mrb[10].mxu0 %vm956_vm1, %v10535_v2 }
 0x31d   : > { %7798 = vmatprep.mubr.msk.f32.mxu0 %vm956_vm1, %v10537_v4 }
 0x320   : > { %7799 = vmatmul.mubr.msk.f32.gmra.mrb[12].mxu0 %vm956_vm1, %v10543_v6 }
 0x3ef   : > { %v7797_v7 = vpop.f32.mrb[10].mxu0 }
 0x3f0   : > { %v1047_v9 = vpop.f32.mrb[11].mxu0  ;;  %v1070_v10 = vsel %vm1066_vm3, %v7797_v7, -inf }
 0x3f1   : > { %1071 = vmax.xlane.f32.xlu1 %v1070_v10  ;;  %v1067_v11 = vsel %vm1066_vm3, %v1047_v9, -inf }
 0x3f2   : > { %1068 = vmax.xlane.f32.xlu0 %v1067_v11 }
 0x3f3   : > { %v7800_v12 = vpop.f32.mrb[12].mxu0 }
 0x3f4   : > { %v1057_v13 = vpop.f32.mrb[13].mxu0  ;;  %v1076_v14 = vsel %vm1066_vm3, %v7800_v12, -inf }
 0x3f5   : > { %1077 = vmax.xlane.f32.xlu1 %v1076_v14  ;;  %v1073_v15 = vsel %vm1066_vm3, %v1057_v13, -inf }
 0x3f6   : > { %1074 = vmax.xlane.f32.xlu0 %v1073_v15 }
 0x47e   : > { %v1072_v16 = vpop.xlane.xlu1 %1071 }
 0x47f   : > { %v1080_v17 = vsub.f32 %v7797_v7, %v1072_v16  ;;  %v1069_v19 = vpop.xlane.xlu0 %1068 }
 0x480   : > { %v1079_v20 = vsub.f32 %v1047_v9, %v1069_v19 }
 0x481   : > { %v1085_v21 = vmul.f32 1.442695, %v1080_v17 }
 0x482   : > { %v1083_v22 = vmul.f32 1.442695, %v1079_v20  ;;  %v1078_v62 = vpop.xlane.xlu1 %1077 }
 0x483   : > { %9760 = vpow2.f32 %v1085_v21  ;;  %v1082_v24 = vsub.f32 %v7800_v12, %v1078_v62  ;;  %v1075_v3 = vpop.xlane.xlu0 %1074 }
 0x484   : > { %9762 = vpow2.f32 %v1083_v22  ;;  %v1081_v8 = vsub.f32 %v1057_v13, %v1075_v3 }
 0x485   : > { %v1089_v28 = vmul.f32 1.442695, %v1082_v24 }
 0x486   : > { %v1087_v29 = vmul.f32 1.442695, %v1081_v8 }
 0x487   : > { %9764 = vpow2.f32 %v1089_v28 }
 0x488   : > { %9766 = vpow2.f32 %v1087_v29 }
 0x48d   : > { %v9761_v32 = vpop.eup %9760 }
 0x48e   : > { %v9763_v34 = vpop.eup %9762  ;;  %v1094_v35 = vsel %vm1066_vm3, %v9761_v32, 0.0 }
 0x48f   : > { %1095 = vadd.xlane.f32.xlu1 %v1094_v35  ;;  %v1091_v36 = vsel %vm1066_vm3, %v9763_v34, 0.0 }
 0x490   : > { %1092 = vadd.xlane.f32.xlu0 %v1091_v36 }
 0x491   : > { %v9765_v37 = vpop.eup %9764 }
 0x492   : > { %v9767_v38 = vpop.eup %9766  ;;  %v1100_v39 = vsel %vm1066_vm3, %v9765_v37, 0.0 }
 0x493   : > { %1101 = vadd.xlane.f32.xlu1 %v1100_v39  ;;  %v1097_v40 = vsel %vm1066_vm3, %v9767_v38, 0.0 }
 0x494   : > { %1098 = vadd.xlane.f32.xlu0 %v1097_v40 }
 0x4a4   : > { %9338 = vrot.lane.b32.xlu1 %v10529_v1, %s12293_s27 }
 0x4a8   : > { %9343 = vrot.lane.b32.xlu1 %v10519_v51, %s12289_s21 }
 0x4aa   : > { %9333 = vrot.lane.b32.xlu0 %v10519_v51, %s12293_s27 }
 0x4ac   : > { %1208 = vrot.lane.b32.xlu1 %v10506_v33, %s12293_s27 }
 0x4ae   : > { %1210 = vrot.lane.b32.xlu0 %v10535_v2, %s12293_s27 }
 0x4b0   : > { %9348 = vrot.lane.b32.xlu1 %v10529_v1, %s12289_s21 }
 0x4b2   : > { %1212 = vrot.lane.b32.xlu0 %v10537_v4, %s12293_s27 }
 0x4b4   : > { %1214 = vrot.lane.b32.xlu1 %v10543_v6, %s12293_s27 }
 0x4b6   : > { %1482 = vrot.lane.b32.xlu0 %v10506_v33, %s12289_s21 }
 0x4b8   : > { %1484 = vrot.lane.b32.xlu1 %v10535_v2, %s12289_s21 }
 0x4ba   : > { %1486 = vrot.lane.b32.xlu0 %v10537_v4, %s12289_s21 }
 0x4bc   : > { %1488 = vrot.lane.b32.xlu1 %v10543_v6, %s12289_s21 }
 0x51c   : > { %v1096_v41 = vpop.xlane.xlu1 %1095 }
 0x51d   : > { %9768 = vrcp.f32 %v1096_v41  ;;  %v1093_v42 = vpop.xlane.xlu0 %1092 }
 0x51e   : > { %9770 = vrcp.f32 %v1093_v42 }
 0x520   : > { %v1102_v43 = vpop.xlane.xlu1 %1101 }
 0x521   : > { %9772 = vrcp.f32 %v1102_v43  ;;  %v1099_v44 = vpop.xlane.xlu0 %1098 }
 0x522   : > { %9774 = vrcp.f32 %v1099_v44 }
 0x524   : > { %v9339_v46 = vpop.permute.xlu1 %9338 }
 0x525   : > { %v9334_v47 = vpop.permute.xlu0 %9333  ;;  %v9341_v54 = vunpack.i.h.bf16 %v9339_v46  ;;  %v9340_v56 = vunpack.i.l.bf16 %v9339_v46 }
 0x526   : > { %v9336_v48 = vunpack.i.h.bf16 %v9334_v47  ;;  %v9335_v50 = vunpack.i.l.bf16 %v9334_v47 }
 0x527   : > { %v9769_v52 = vpop.eup %9768  ;;  %v8685_v7 = vpack.c.bf16 %v9341_v54, %v9340_v56 }
 0x528   : > { %v9771_v53 = vpop.eup %9770  ;;  %v8679_v57 = vpack.c.bf16 %v9336_v48, %v9335_v50  ;;  %v9344_v58 = vpop.permute.xlu1 %9343  ;;  %v1106_v61 = vmul.f32 %v9769_v52, %v9761_v32 }
 0x529   : > { %v1104_v60 = vmul.f32 %v9771_v53, %v9763_v34  ;;  %v9346_v12 = vunpack.i.h.bf16 %v9344_v58  ;;  %v9345_v13 = vunpack.i.l.bf16 %v9344_v58  ;;  %v1211_v15 = vpop.permute.xlu0 %1210 }
 0x52a   : > { %8681 = vmatprep.subr.msk.bf16.mxu1 %vm10515_vm2, %v8679_v57 }
 0x52b   : > { %v9773_v63 = vpop.eup %9772  ;;  %7809 = vmatprep.mubr.msk.f32.mxu1 %vm1066_vm3, %v1104_v60  ;;  %v8699_v14 = vpack.c.bf16 %v9346_v12, %v9345_v13 }
 0x52c   : > { %v9775_v0 = vpop.eup %9774  ;;  %7810 = vmatmul.mubr.msk.f32.vlgmr.msra.gmra.mrb[6].mxu1 %vm1066_vm3, %v1106_v61  ;;  %v1110_v10 = vmul.f32 %v9773_v63, %v9765_v37  ;;  %v1209_v11 = vpop.permute.xlu1 %1208 }
 0x52d   : > { %8684 = vmatpush3.bf16.xpose.msk.msra.mxu1 %vm10515_vm2, %v8679_v57  ;;  %v1108_v9 = vmul.f32 %v9775_v0, %v9767_v38  ;;  %v1213_v20 = vpop.permute.xlu0 %1212 }
 0x52e   : > { %8687 = vmatprep.subr.msk.bf16.mxu1 %vm10515_vm2, %v8685_v7 }
 0x52f   : > { %7812 = vmatprep.mubr.msk.f32.mxu1 %vm1066_vm3, %v1108_v9 }
 0x530   : > { %7813 = vmatmul.mubr.msk.f32.gmra.mrb[8].mxu1 %vm1066_vm3, %v1110_v10  ;;  %v9349_v16 = vpop.permute.xlu1 %9348 }
 0x531   : > { %7823 = vmatprep.mubr.msk.f32.mxu1 %vm956_vm1, %v1209_v11  ;;  %v9351_v17 = vunpack.i.h.bf16 %v9349_v16  ;;  %v9350_v19 = vunpack.i.l.bf16 %v9349_v16  ;;  %v1483_v62 = vpop.permute.xlu0 %1482 }
 0x533   : > { %v8705_v21 = vpack.c.bf16 %v9351_v17, %v9350_v19 }
 0x534   : > { %v1215_v22 = vpop.permute.xlu1 %1214 }
 0x535   : > { %8690 = vmatpush3.bf16.xpose.msk.msra.mxu1 %vm10515_vm2, %v8685_v7  ;;  %v1487_v3 = vpop.permute.xlu0 %1486 }
 0x536   : > { %8701 = vmatprep.subr.msk.bf16.mxu1 %vm10515_vm2, %v8699_v14 }
 0x538   : > { %v1485_v24 = vpop.permute.xlu1 %1484 }
 0x53c   : > { %7824 = vmatmul.mubr.msk.f32.vlgmr.msra.gmra.mrb[10].mxu1 %vm956_vm1, %v1211_v15  ;;  %v1489_v8 = vpop.permute.xlu1 %1488 }
 0x53d   : > { %7826 = vmatprep.mubr.msk.f32.mxu1 %vm956_vm1, %v1213_v20  ;;  %8704 = vmatpush3.bf16.xpose.msk.msra.mxu1 %vm10515_vm2, %v8699_v14 }
 0x53e   : > { %8707 = vmatprep.subr.msk.bf16.mxu1 %vm10515_vm2, %v8705_v21 }
 0x540   : > { %7827 = vmatmul.mubr.msk.f32.gmra.mrb[12].mxu1 %vm956_vm1, %v1215_v22 }
 0x541   : > { %7851 = vmatprep.mubr.msk.f32.mxu1 %vm956_vm1, %v1483_v62 }
 0x545   : > { %8710 = vmatpush3.bf16.xpose.msk.msra.mxu1 %vm10515_vm2, %v8705_v21 }
 0x54c   : > { %7852 = vmatmul.mubr.msk.f32.vlgmr.msra.gmra.mrb[14].mxu1 %vm956_vm1, %v1485_v24 }
 0x54d   : > { %7854 = vmatprep.mubr.msk.f32.mxu1 %vm956_vm1, %v1487_v3 }
 0x550   : > { %7855 = vmatmul.mubr.msk.f32.gmra.mrb[16].mxu1 %vm956_vm1, %v1489_v8 }
 0x5ff   : > { %v10607_v28 = vpop.f32.mrb[6].mxu1 }
 0x600   : > { %v10609_v29 = vpop.f32.mrb[7].mxu1 }
 0x603   : > { %v10611_v32 = vpop.f32.mrb[8].mxu1 }
 0x604   : > { %v10613_v34 = vpop.f32.mrb[9].mxu1 }
 0x60f   : > { %v10615_v35 = vpop.f32.mrb[10].mxu1 }
 0x610   : > { %v10617_v36 = vpop.f32.mrb[11].mxu1  ;;  %v1328_v19 = vsel %vm1066_vm3, %v10615_v35, -inf }
 0x611   : > { %v1325_v16 = vsel %vm1066_vm3, %v10617_v36, -inf }
 0x613   : > { %v10619_v37 = vpop.f32.mrb[12].mxu1 }
 0x614   : > { %v10621_v38 = vpop.f32.mrb[13].mxu1  ;;  %v1334_v20 = vsel %vm1066_vm3, %v10619_v37, -inf }
 0x615   : > { %v1331_v17 = vsel %vm1066_vm3, %v10621_v38, -inf }
 0x61f   : > { %v7853_v39 = vpop.f32.mrb[14].mxu1 }
 0x620   : > { %v1580_v40 = vpop.f32.mrb[15].mxu1  ;;  %v1602_v41 = vsel %vm1066_vm3, %v7853_v39, -inf }
 0x621   : > { %1603 = vmax.xlane.f32.xlu1 %v1602_v41  ;;  %v1599_v42 = vsel %vm1066_vm3, %v1580_v40, -inf }
 0x622   : > { %1600 = vmax.xlane.f32.xlu0 %v1599_v42 }
 0x623   : > { %v7856_v43 = vpop.f32.mrb[16].mxu1 }
 0x624   : > { %v1590_v44 = vpop.f32.mrb[17].mxu1  ;;  %v1608_v47 = vsel %vm1066_vm3, %v7856_v43, -inf }
 0x625   : > { %v1605_v46 = vsel %vm1066_vm3, %v1590_v44, -inf }
 0x626   : > { %1606 = vmax.xlane.f32.xlu0 %v1605_v46 }
 0x62a   : > { %1609 = vmax.xlane.f32.xlu0 %v1608_v47 }
 0x6ae   : > { %v1604_v48 = vpop.xlane.xlu1 %1603 }
 0x6af   : > { %v1612_v50 = vsub.f32 %v7853_v39, %v1604_v48  ;;  %v1601_v52 = vpop.xlane.xlu0 %1600 }
 0x6b0   : > { %v1611_v53 = vsub.f32 %v1580_v40, %v1601_v52 }
 0x6b1   : > { %v1617_v54 = vmul.f32 1.442695, %v1612_v50 }
 0x6b2   : > { %v1615_v56 = vmul.f32 1.442695, %v1611_v53 }
 0x6b3   : > { %9776 = vpow2.f32 %v1617_v54  ;;  %v1607_v63 = vpop.xlane.xlu0 %1606 }
 0x6b4   : > { %9778 = vpow2.f32 %v1615_v56  ;;  %v1613_v0 = vsub.f32 %v1590_v44, %v1607_v63 }
 0x6b6   : > { %v1619_v7 = vmul.f32 1.442695, %v1613_v0 }
 0x6b7   : > { %v1610_v9 = vpop.xlane.xlu0 %1609 }
 0x6b8   : > { %v1614_v10 = vsub.f32 %v7856_v43, %v1610_v9  ;;  %9780 = vpow2.f32 %v1619_v7 }
 0x6ba   : > { %v1621_v11 = vmul.f32 1.442695, %v1614_v10 }
 0x6bc   : > { %9782 = vpow2.f32 %v1621_v11 }
 0x6bd   : > { %v9777_v57 = vpop.eup %9776 }
 0x6be   : > { %v9779_v58 = vpop.eup %9778  ;;  %v1626_v60 = vsel %vm1066_vm3, %v9777_v57, 0.0 }
 0x6bf   : > { %1627 = vadd.xlane.f32.xlu1 %v1626_v60  ;;  %v1623_v61 = vsel %vm1066_vm3, %v9779_v58, 0.0 }
 0x6c0   : > { %1624 = vadd.xlane.f32.xlu0 %v1623_v61 }
 0x6c2   : > { %v9781_v12 = vpop.eup %9780 }
 0x6c3   : > { %v1629_v13 = vsel %vm1066_vm3, %v9781_v12, 0.0 }
 0x6c6   : > { %v9783_v14 = vpop.eup %9782 }
 0x6c7   : > { %v1632_v15 = vsel %vm1066_vm3, %v9783_v14, 0.0 }
 0x6d0   : > { %9358 = vrot.lane.b32.xlu1 %v10527_v59, %s12289_s21 }
 0x6d4   : > { %9363 = vrot.lane.b32.xlu1 %v10519_v51, %s12287_s22 }
 0x6d6   : > { %9353 = vrot.lane.b32.xlu0 %v10521_v55, %s12289_s21 }
 0x6d8   : > { %9368 = vrot.lane.b32.xlu1 %v10529_v1, %s12287_s22 }
 0x6f5   : > { %1630 = vadd.xlane.f32.xlu0 %v1629_v13 }
 0x6fc   : > { %1633 = vadd.xlane.f32.xlu1 %v1632_v15 }
 0x70b   : > { %1752 = vrot.lane.b32.xlu0 %v10506_v33, %s12287_s22 }
 0x70d   : > { %1754 = vrot.lane.b32.xlu1 %v10535_v2, %s12287_s22 }
 0x70f   : > { %1756 = vrot.lane.b32.xlu0 %v10537_v4, %s12287_s22 }
 0x711   : > { %1758 = vrot.lane.b32.xlu1 %v10543_v6, %s12287_s22 }
 0x72e   : > { %1326 = vmax.xlane.f32.xlu0 %v1325_v16 }
 0x732   : > { %1332 = vmax.xlane.f32.xlu0 %v1331_v17 }
 0x735   : > { %1329 = vmax.xlane.f32.xlu1 %v1328_v19 }
 0x736   : > { %1335 = vmax.xlane.f32.xlu0 %v1334_v20 }
 0x74c   : > { %v1628_v21 = vpop.xlane.xlu1 %1627 }
 0x74d   : > { %v1625_v22 = vpop.xlane.xlu0 %1624 }
 0x74e   : > { %9784 = vrcp.f32 %v1625_v22 }
 0x74f   : > { %9786 = vrcp.f32 %v1628_v21 }
 0x750   : > { %v9359_v62 = vpop.permute.xlu1 %9358 }
 0x751   : > { %v9354_v24 = vpop.permute.xlu0 %9353  ;;  %v9361_v3 = vunpack.i.h.bf16 %v9359_v62  ;;  %v9360_v8 = vunpack.i.l.bf16 %v9359_v62 }
 0x752   : > { %v9356_v39 = vunpack.i.h.bf16 %v9354_v24  ;;  %v9355_v40 = vunpack.i.l.bf16 %v9354_v24 }
 0x753   : > { %v8715_v46 = vpack.c.bf16 %v9361_v3, %v9360_v8 }
 0x754   : > { %v9364_v41 = vpop.permute.xlu1 %9363  ;;  %v8711_v42 = vpack.c.bf16 %v9356_v39, %v9355_v40 }
 0x755   : > { %v9366_v43 = vunpack.i.h.bf16 %v9364_v41  ;;  %v9365_v44 = vunpack.i.l.bf16 %v9364_v41 }
 0x756   : > { %8712 = vmatprep.subr.bf16.mxu1 %v8711_v42 }
 0x757   : > { %8714 = vmatpush3.bf16.msra.mxu1 %v8711_v42  ;;  %v8719_v52 = vpack.c.bf16 %v9366_v43, %v9365_v44 }
 0x758   : > { %v9785_v47 = vpop.eup %9784  ;;  %8716 = vmatprep.subr.bf16.mxu1 %v8715_v46  ;;  %v9369_v54 = vpop.permute.xlu1 %9368 }
 0x759   : > { %v9787_v48 = vpop.eup %9786  ;;  %v1636_v50 = vmul.f32 %v9785_v47, %v9779_v58  ;;  %v9371_v56 = vunpack.i.h.bf16 %v9369_v54  ;;  %v9370_v60 = vunpack.i.l.bf16 %v9369_v54 }
 0x75a   : > { %v1638_v53 = vmul.f32 %v9787_v48, %v9777_v57 }
 0x75b   : > { %8718 = vmatpush3.bf16.msra.mxu1 %v8715_v46  ;;  %7865 = vmatprep.mubr.msk.f32.mxu1 %vm1066_vm3, %v1636_v50  ;;  %v8725_v61 = vpack.c.bf16 %v9371_v56, %v9370_v60 }
 0x75c   : > { %8721 = vmatprep.subr.msk.bf16.mxu1 %vm10515_vm2, %v8719_v52 }
 0x75e   : > { %7866 = vmatmul.mubr.msk.f32.vlgmr.msra.gmra.mrb[18].mxu1 %vm1066_vm3, %v1638_v53 }
 0x764   : > { %8724 = vmatpush3.bf16.xpose.msk.msra.mxu1 %vm10515_vm2, %v8719_v52 }
 0x765   : > { %8727 = vmatprep.subr.msk.bf16.mxu1 %vm10515_vm2, %v8725_v61 }
 0x76c   : > { %8730 = vmatpush3.bf16.xpose.msk.msra.mxu1 %vm10515_vm2, %v8725_v61 }
 0x782   : > { %v1631_v58 = vpop.xlane.xlu0 %1630 }
 0x783   : > { %9788 = vrcp.f32 %v1631_v58 }
 0x786   : > { %v1753_v9 = vpop.permute.xlu0 %1752 }
 0x789   : > { %v1634_v57 = vpop.xlane.xlu1 %1633 }
 0x78a   : > { %9790 = vrcp.f32 %v1634_v57  ;;  %v1757_v13 = vpop.permute.xlu0 %1756 }
 0x78d   : > { %v9789_v63 = vpop.eup %9788  ;;  %v1755_v11 = vpop.permute.xlu1 %1754 }
 0x78e   : > { %v1640_v0 = vmul.f32 %v9789_v63, %v9781_v12 }
 0x790   : > { %7868 = vmatprep.mubr.msk.f32.mxu1 %vm1066_vm3, %v1640_v0 }
 0x791   : > { %v1759_v15 = vpop.permute.xlu1 %1758 }
 0x794   : > { %v9791_v7 = vpop.eup %9790 }
 0x795   : > { %v1642_v10 = vmul.f32 %v9791_v7, %v9783_v14 }
 0x797   : > { %7869 = vmatmul.mubr.msk.f32.gmra.mrb[20].mxu1 %vm1066_vm3, %v1642_v10 }
 0x798   : > { %7879 = vmatprep.mubr.msk.f32.mxu1 %vm956_vm1, %v1753_v9 }
 0x79b   : > { %7880 = vmatmul.mubr.msk.f32.vlgmr.msra.gmra.mrb[22].mxu1 %vm956_vm1, %v1755_v11 }
 0x79c   : > { %7882 = vmatprep.mubr.msk.f32.mxu1 %vm956_vm1, %v1757_v13 }
 0x79f   : > { %7883 = vmatmul.mubr.msk.f32.gmra.mrb[24].mxu1 %vm956_vm1, %v1759_v15 }
 0x7bb   : > { %v1327_v16 = vpop.xlane.xlu0 %1326 }
 0x7bc   : > { %v1337_v12 = vsub.f32 %v10617_v36, %v1327_v16 }
 0x7be   : > { %v1341_v17 = vmul.f32 1.442695, %v1337_v12 }
 0x7bf   : > { %v1333_v19 = vpop.xlane.xlu0 %1332 }
 0x7c0   : > { %9792 = vpow2.f32 %v1341_v17  ;;  %v1339_v14 = vsub.f32 %v10621_v38, %v1333_v19 }
 0x7c2   : > { %v1345_v20 = vmul.f32 1.442695, %v1339_v14  ;;  %v1330_v21 = vpop.xlane.xlu1 %1329 }
 0x7c3   : > { %v1338_v22 = vsub.f32 %v10615_v35, %v1330_v21  ;;  %v1336_v62 = vpop.xlane.xlu0 %1335 }
 0x7c4   : > { %9794 = vpow2.f32 %v1345_v20  ;;  %v1340_v24 = vsub.f32 %v10619_v37, %v1336_v62 }
 0x7c5   : > { %v1343_v3 = vmul.f32 1.442695, %v1338_v22 }
 0x7c6   : > { %v1347_v8 = vmul.f32 1.442695, %v1340_v24 }
 0x7c7   : > { %9796 = vpow2.f32 %v1343_v3 }
 0x7c8   : > { %9798 = vpow2.f32 %v1347_v8 }
 0x7ca   : > { %v9793_v39 = vpop.eup %9792 }
 0x7cb   : > { %v1349_v36 = vsel %vm1066_vm3, %v9793_v39, 0.0 }
 0x7cc   : > { %1350 = vadd.xlane.f32.xlu0 %v1349_v36 }
 0x7ce   : > { %v10676_v40 = vpop.eup %9794 }
 0x7cf   : > { %v1355_v38 = vsel %vm1066_vm3, %v10676_v40, 0.0 }
 0x7d0   : > { %1356 = vadd.xlane.f32.xlu0 %v1355_v38 }
 0x7d1   : > { %v10680_v41 = vpop.eup %9796 }
 0x7d2   : > { %v1352_v35 = vsel %vm1066_vm3, %v10680_v41, 0.0  ;;  %v10684_v37 = vpop.eup %9798 }
 0x7d3   : > { %1353 = vadd.xlane.f32.xlu1 %v1352_v35  ;;  %v1358_v42 = vsel %vm1066_vm3, %v10684_v37, 0.0 }
 0x7d7   : > { %1359 = vadd.xlane.f32.xlu1 %v1358_v42 }
 0x831   : > { %v10688_v43 = vpop.f32.mrb[18].mxu1 }
 0x832   : > { %v10690_v44 = vpop.f32.mrb[19].mxu1 }
 0x833   : > { %v9477_v46 = vpack.i.bf16 %v10688_v43, %v10690_v44 }
 0x859   : > { %v1351_v47 = vpop.xlane.xlu0 %1350 }
 0x85a   : > { %9800 = vrcp.f32 %v1351_v47 }
 0x85d   : > { %v1357_v11 = vpop.xlane.xlu0 %1356 }
 0x860   : > { %v1354_v9 = vpop.xlane.xlu1 %1353 }
 0x864   : > { %v9801_v48 = vpop.eup %9800  ;;  %v1360_v10 = vpop.xlane.xlu1 %1359 }
 0x865   : > { %v1362_v50 = vmul.f32 %v9801_v48, %v9793_v39 }
 0x867   : > { %7837 = vmatprep.mubr.msk.f32.mxu0 %vm1066_vm3, %v1362_v50 }
 0x86a   : > { %v10695_v52 = vpop.f32.mrb[20].mxu1 }
 0x86b   : > { %v10697_v53 = vpop.f32.mrb[21].mxu1 }
 0x86c   : > { %v9507_v54 = vpack.i.bf16 %v10695_v52, %v10697_v53 }
 0x86e   : > { %v7881_v56 = vpop.f32.mrb[22].mxu1 }
 0x86f   : > { %v1850_v60 = vpop.f32.mrb[23].mxu1  ;;  %v1872_v61 = vsel %vm1066_vm3, %v7881_v56, -inf }
 0x870   : > { %1873 = vmax.xlane.f32.xlu1 %v1872_v61  ;;  %v1869_v58 = vsel %vm1066_vm3, %v1850_v60, -inf }
 0x871   : > { %1870 = vmax.xlane.f32.xlu0 %v1869_v58 }
 0x872   : > { %v7884_v57 = vpop.f32.mrb[24].mxu1 }
 0x873   : > { %v1860_v63 = vpop.f32.mrb[25].mxu1  ;;  %v1878_v0 = vsel %vm1066_vm3, %v7884_v57, -inf }
 0x874   : > { %1879 = vmax.xlane.f32.xlu1 %v1878_v0  ;;  %v1875_v7 = vsel %vm1066_vm3, %v1860_v63, -inf }
 0x875   : > { %1876 = vmax.xlane.f32.xlu0 %v1875_v7 }
 0x885   : > { %9378 = vrot.lane.b32.xlu1 %v10527_v59, %s12293_s27 }
 0x88b   : > { %9373 = vrot.lane.b32.xlu0 %v10521_v55, %s12293_s27 }
 0x8fd   : > { %v1874_v13 = vpop.xlane.xlu1 %1873 }
 0x8fe   : > { %v1882_v15 = vsub.f32 %v7881_v56, %v1874_v13  ;;  %v1871_v16 = vpop.xlane.xlu0 %1870 }
 0x8ff   : > { %v1881_v12 = vsub.f32 %v1850_v60, %v1871_v16 }
 0x900   : > { %v1887_v17 = vmul.f32 1.442695, %v1882_v15 }
 0x901   : > { %v1885_v19 = vmul.f32 1.442695, %v1881_v12  ;;  %v1880_v14 = vpop.xlane.xlu1 %1879 }
 0x902   : > { %9802 = vpow2.f32 %v1887_v17  ;;  %v1877_v20 = vpop.xlane.xlu0 %1876 }
 0x903   : > { %9804 = vpow2.f32 %v1885_v19  ;;  %v1883_v0 = vsub.f32 %v1860_v63, %v1877_v20 }
 0x904   : > { %9806 = vrcp.f32 %v1354_v9 }
 0x905   : > { %9808 = vrcp.f32 %v1357_v11  ;;  %v9379_v21 = vpop.permute.xlu1 %9378 }
 0x906   : > { %v9374_v22 = vpop.permute.xlu0 %9373  ;;  %v9381_v62 = vunpack.i.h.bf16 %v9379_v21  ;;  %v9380_v24 = vunpack.i.l.bf16 %v9379_v21  ;;  %9810 = vrcp.f32 %v1360_v10 }
 0x907   : > { %v9376_v3 = vunpack.i.h.bf16 %v9374_v22  ;;  %v9375_v8 = vunpack.i.l.bf16 %v9374_v22 }
 0x908   : > { %v8695_v36 = vpack.c.bf16 %v9381_v62, %v9380_v24 }
 0x909   : > { %v8691_v39 = vpack.c.bf16 %v9376_v3, %v9375_v8 }
 0x90b   : > { %8692 = vmatprep.subr.bf16.mxu0 %v8691_v39 }
 0x90c   : > { %v10709_v38 = vpop.eup %9802  ;;  %8694 = vmatpush3.bf16.msra.mxu0 %v8691_v39 }
 0x90d   : > { %v9805_v35 = vpop.eup %9804  ;;  %8696 = vmatprep.subr.bf16.mxu0 %v8695_v36  ;;  %v1896_v42 = vsel %vm1066_vm3, %v10709_v38, 0.0 }
 0x90e   : > { %v9807_v47 = vpop.eup %9806  ;;  %1897 = vadd.xlane.f32.xlu1 %v1896_v42  ;;  %v1893_v48 = vsel %vm1066_vm3, %v9805_v35, 0.0 }
 0x90f   : > { %v9809_v50 = vpop.eup %9808  ;;  %1894 = vadd.xlane.f32.xlu0 %v1893_v48  ;;  %v1364_v56 = vmul.f32 %v9807_v47, %v10680_v41 }
 0x910   : > { %8698 = vmatpush3.bf16.msra.mxu0 %v8695_v36  ;;  %v9811_v60 = vpop.eup %9810  ;;  %v1366_v61 = vmul.f32 %v9809_v50, %v10676_v40  ;;  %v1884_v40 = vsub.f32 %v7884_v57, %v1880_v14 }
 0x911   : > { %v1368_v58 = vmul.f32 %v9811_v60, %v10684_v37  ;;  %v1889_v37 = vmul.f32 1.442695, %v1883_v0 }
 0x912   : > { %v1891_v41 = vmul.f32 1.442695, %v1884_v40 }
 0x913   : > { %7838 = vmatmul.mubr.msk.f32.vlgmr.msra.gmra.mrb[14].mxu0 %vm1066_vm3, %v1364_v56 }
 0x914   : > { %7840 = vmatprep.mubr.msk.f32.mxu0 %vm1066_vm3, %v1366_v61  ;;  %9812 = vpow2.f32 %v1891_v41 }
 0x915   : > { %9814 = vpow2.f32 %v1889_v37 }
 0x917   : > { %7841 = vmatmul.mubr.msk.f32.gmra.mrb[16].mxu0 %vm1066_vm3, %v1368_v58 }
 0x91e   : > { %v9813_v7 = vpop.eup %9812 }
 0x91f   : > { %9388 = vrot.lane.b32.xlu1 %v10527_v59, %s12287_s22  ;;  %v1902_v9 = vsel %vm1066_vm3, %v9813_v7, 0.0  ;;  %v9815_v10 = vpop.eup %9814 }
 0x920   : > { %v1899_v11 = vsel %vm1066_vm3, %v9815_v10, 0.0 }
 0x923   : > { %9393 = vrot.lane.b32.xlu1 %v10519_v51, %s12291_s23 }
 0x925   : > { %9383 = vrot.lane.b32.xlu0 %v10521_v55, %s12287_s22 }
 0x927   : > { %9398 = vrot.lane.b32.xlu1 %v10529_v1, %s12291_s23 }
 0x944   : > { %1903 = vadd.xlane.f32.xlu0 %v1902_v9 }
 0x94b   : > { %1900 = vadd.xlane.f32.xlu1 %v1899_v11 }
 0x95a   : > { %2022 = vrot.lane.b32.xlu0 %v10506_v33, %s12291_s23 }
 0x95c   : > { %2024 = vrot.lane.b32.xlu1 %v10535_v2, %s12291_s23 }
 0x95e   : > { %2026 = vrot.lane.b32.xlu0 %v10537_v4, %s12291_s23 }
 0x960   : > { %2028 = vrot.lane.b32.xlu1 %v10543_v6, %s12291_s23 }
 0x99b   : > { %v1898_v57 = vpop.xlane.xlu1 %1897 }
 0x99c   : > { %v1895_v63 = vpop.xlane.xlu0 %1894 }
 0x99d   : > { %9816 = vrcp.f32 %v1895_v63 }
 0x99e   : > { %9818 = vrcp.f32 %v1898_v57 }
 0x99f   : > { %v9389_v13 = vpop.permute.xlu1 %9388 }
 0x9a0   : > { %v9384_v15 = vpop.permute.xlu0 %9383  ;;  %v9391_v16 = vunpack.i.h.bf16 %v9389_v13  ;;  %v9390_v12 = vunpack.i.l.bf16 %v9389_v13 }
 0x9a1   : > { %v9386_v17 = vunpack.i.h.bf16 %v9384_v15  ;;  %v9385_v19 = vunpack.i.l.bf16 %v9384_v15 }
 0x9a2   : > { %v8735_v62 = vpack.c.bf16 %v9391_v16, %v9390_v12 }
 0x9a3   : > { %v9394_v14 = vpop.permute.xlu1 %9393  ;;  %v8731_v20 = vpack.c.bf16 %v9386_v17, %v9385_v19 }
 0x9a4   : > { %v9396_v21 = vunpack.i.h.bf16 %v9394_v14  ;;  %v9395_v22 = vunpack.i.l.bf16 %v9394_v14 }
 0x9a5   : > { %8732 = vmatprep.subr.bf16.mxu0 %v8731_v20 }
 0x9a6   : > { %8734 = vmatpush3.bf16.msra.mxu0 %v8731_v20  ;;  %v8739_v39 = vpack.c.bf16 %v9396_v21, %v9395_v22 }
 0x9a7   : > { %v9817_v24 = vpop.eup %9816  ;;  %8736 = vmatprep.subr.bf16.mxu0 %v8735_v62  ;;  %v9399_v42 = vpop.permute.xlu1 %9398 }
 0x9a8   : > { %v9819_v3 = vpop.eup %9818  ;;  %v1906_v8 = vmul.f32 %v9817_v24, %v9805_v35  ;;  %v9401_v47 = vunpack.i.h.bf16 %v9399_v42  ;;  %v9400_v48 = vunpack.i.l.bf16 %v9399_v42 }
 0x9a9   : > { %v1908_v36 = vmul.f32 %v9819_v3, %v10709_v38 }
 0x9aa   : > { %8738 = vmatpush3.bf16.msra.mxu0 %v8735_v62  ;;  %7893 = vmatprep.mubr.msk.f32.mxu0 %vm1066_vm3, %v1906_v8  ;;  %v8745_v50 = vpack.c.bf16 %v9401_v47, %v9400_v48 }
 0x9ab   : > { %8741 = vmatprep.subr.msk.bf16.mxu0 %vm10515_vm2, %v8739_v39 }
 0x9ad   : > { %7894 = vmatmul.mubr.msk.f32.vlgmr.msra.gmra.mrb[18].mxu0 %vm1066_vm3, %v1908_v36 }
 0x9b3   : > { %8744 = vmatpush3.bf16.xpose.msk.msra.mxu0 %vm10515_vm2, %v8739_v39 }
 0x9b4   : > { %8747 = vmatprep.subr.msk.bf16.mxu0 %vm10515_vm2, %v8745_v50 }
 0x9bb   : > { %8750 = vmatpush3.bf16.xpose.msk.msra.mxu0 %vm10515_vm2, %v8745_v50 }
 0x9d1   : > { %v1904_v35 = vpop.xlane.xlu0 %1903 }
 0x9d2   : > { %9820 = vrcp.f32 %v1904_v35 }
 0x9d5   : > { %v2023_v58 = vpop.permute.xlu0 %2022 }
 0x9d8   : > { %v1901_v38 = vpop.xlane.xlu1 %1900 }
 0x9d9   : > { %9822 = vrcp.f32 %v1901_v38  ;;  %v2027_v57 = vpop.permute.xlu0 %2026 }
 0x9dc   : > { %v9821_v56 = vpop.eup %9820  ;;  %v2025_v37 = vpop.permute.xlu1 %2024 }
 0x9dd   : > { %v1912_v40 = vmul.f32 %v9821_v56, %v9813_v7 }
 0x9e0   : > { %v2029_v63 = vpop.permute.xlu1 %2028 }
 0x9e3   : > { %v9823_v60 = vpop.eup %9822 }
 0x9e4   : > { %v1910_v61 = vmul.f32 %v9823_v60, %v9815_v10 }
 0x9e6   : > { %v10749_v41 = vpop.f32.mrb[14].mxu0  ;;  %7896 = vmatprep.mubr.msk.f32.mxu0 %vm1066_vm3, %v1910_v61 }
 0x9e7   : > { %v10752_v0 = vpop.f32.mrb[15].mxu0  ;;  %7897 = vmatmul.mubr.msk.f32.gmra.mrb[20].mxu0 %vm1066_vm3, %v1912_v40 }
 0x9e8   : > { %v9472_v9 = vpack.i.bf16 %v10749_v41, %v10752_v0  ;;  %7907 = vmatprep.mubr.msk.f32.mxu0 %vm956_vm1, %v2023_v58 }
 0x9ea   : > { %v10758_v11 = vpop.f32.mrb[16].mxu0 }
 0x9eb   : > { %v10760_v10 = vpop.f32.mrb[17].mxu0  ;;  %7908 = vmatmul.mubr.msk.f32.vlgmr.msra.gmra.mrb[22].mxu0 %vm956_vm1, %v2025_v37 }
 0x9ec   : > { %v9502_v7 = vpack.i.bf16 %v10758_v11, %v10760_v10  ;;  %7910 = vmatprep.mubr.msk.f32.mxu0 %vm956_vm1, %v2027_v57 }
 0x9ef   : > { %7911 = vmatmul.mubr.msk.f32.gmra.mrb[24].mxu0 %vm956_vm1, %v2029_v63 }
 0xa80   : > { %v10767_v13 = vpop.f32.mrb[18].mxu0 }
 0xa81   : > { %v10769_v15 = vpop.f32.mrb[19].mxu0 }
 0xa82   : > { %v9482_v16 = vpack.i.bf16 %v10767_v13, %v10769_v15 }
 0xaba   : > { %v10773_v12 = vpop.f32.mrb[20].mxu0 }
 0xabb   : > { %v10775_v17 = vpop.f32.mrb[21].mxu0 }
 0xabc   : > { %v9512_v19 = vpack.i.bf16 %v10773_v12, %v10775_v17 }
 0xabe   : > { %v7909_v14 = vpop.f32.mrb[22].mxu0 }
 0xabf   : > { %v2120_v20 = vpop.f32.mrb[23].mxu0  ;;  %v2142_v21 = vsel %vm1066_vm3, %v7909_v14, -inf }
 0xac0   : > { %2143 = vmax.xlane.f32.xlu1 %v2142_v21  ;;  %v2139_v22 = vsel %vm1066_vm3, %v2120_v20, -inf }
 0xac1   : > { %2140 = vmax.xlane.f32.xlu0 %v2139_v22 }
 0xac2   : > { %v7912_v62 = vpop.f32.mrb[24].mxu0 }
 0xac3   : > { %v2130_v24 = vpop.f32.mrb[25].mxu0  ;;  %v2148_v8 = vsel %vm1066_vm3, %v7912_v62, -inf }
 0xac4   : > { %v2145_v3 = vsel %vm1066_vm3, %v2130_v24, -inf }
 0xac5   : > { %2146 = vmax.xlane.f32.xlu0 %v2145_v3 }
 0xac9   : > { %2149 = vmax.xlane.f32.xlu0 %v2148_v8 }
 0xb4d   : > { %v2144_v39 = vpop.xlane.xlu1 %2143 }
 0xb4e   : > { %v2152_v36 = vsub.f32 %v7909_v14, %v2144_v39  ;;  %v2141_v42 = vpop.xlane.xlu0 %2140 }
 0xb4f   : > { %v2151_v47 = vsub.f32 %v2120_v20, %v2141_v42 }
 0xb50   : > { %v2157_v48 = vmul.f32 1.442695, %v2152_v36 }
 0xb51   : > { %v2155_v50 = vmul.f32 1.442695, %v2151_v47 }
 0xb52   : > { %9824 = vpow2.f32 %v2157_v48  ;;  %v2147_v61 = vpop.xlane.xlu0 %2146 }
 0xb53   : > { %9826 = vpow2.f32 %v2155_v50  ;;  %v2153_v58 = vsub.f32 %v2130_v24, %v2147_v61 }
 0xb55   : > { %v2159_v40 = vmul.f32 1.442695, %v2153_v58 }
 0xb56   : > { %v2150_v37 = vpop.xlane.xlu0 %2149 }
 0xb57   : > { %v2154_v57 = vsub.f32 %v7912_v62, %v2150_v37  ;;  %9828 = vpow2.f32 %v2159_v40 }
 0xb59   : > { %v2161_v63 = vmul.f32 1.442695, %v2154_v57 }
 0xb5b   : > { %9830 = vpow2.f32 %v2161_v63 }
 0xb5c   : > { %v9825_v35 = vpop.eup %9824 }
 0xb5d   : > { %v9827_v38 = vpop.eup %9826  ;;  %v2166_v56 = vsel %vm1066_vm3, %v9825_v35, 0.0 }
 0xb5e   : > { %2167 = vadd.xlane.f32.xlu1 %v2166_v56  ;;  %v2163_v60 = vsel %vm1066_vm3, %v9827_v38, 0.0 }
 0xb5f   : > { %2164 = vadd.xlane.f32.xlu0 %v2163_v60 }
 0xb61   : > { %v9829_v14 = vpop.eup %9828 }
 0xb62   : > { %v2169_v20 = vsel %vm1066_vm3, %v9829_v14, 0.0 }
 0xb65   : > { %v9831_v21 = vpop.eup %9830 }
 0xb66   : > { %v2172_v22 = vsel %vm1066_vm3, %v9831_v21, 0.0 }
 0xb6f   : > { %9408 = vrot.lane.b32.xlu1 %v10527_v59, %s12291_s23 }
 0xb73   : > { %9413 = vrot.lane.b32.xlu1 %v10519_v51, %s12285_s24 }
 0xb75   : > { %9403 = vrot.lane.b32.xlu0 %v10521_v55, %s12291_s23 }
 0xb77   : > { %9418 = vrot.lane.b32.xlu1 %v10529_v1, %s12285_s24 }
 0xb94   : > { %2170 = vadd.xlane.f32.xlu0 %v2169_v20 }
 0xb9b   : > { %2173 = vadd.xlane.f32.xlu1 %v2172_v22 }
 0xbaa   : > { %2292 = vrot.lane.b32.xlu0 %v10506_v33, %s12285_s24 }
 0xbac   : > { %2294 = vrot.lane.b32.xlu1 %v10535_v2, %s12285_s24 }
 0xbae   : > { %2296 = vrot.lane.b32.xlu0 %v10537_v4, %s12285_s24 }
 0xbb0   : > { %2298 = vrot.lane.b32.xlu1 %v10543_v6, %s12285_s24 }
 0xbeb   : > { %v2168_v62 = vpop.xlane.xlu1 %2167 }
 0xbec   : > { %v2165_v24 = vpop.xlane.xlu0 %2164 }
 0xbed   : > { %9832 = vrcp.f32 %v2165_v24 }
 0xbee   : > { %9834 = vrcp.f32 %v2168_v62 }
 0xbef   : > { %v9409_v3 = vpop.permute.xlu1 %9408 }
 0xbf0   : > { %v9404_v8 = vpop.permute.xlu0 %9403  ;;  %v9411_v39 = vunpack.i.h.bf16 %v9409_v3  ;;  %v9410_v36 = vunpack.i.l.bf16 %v9409_v3 }
 0xbf1   : > { %v9406_v42 = vunpack.i.h.bf16 %v9404_v8  ;;  %v9405_v47 = vunpack.i.l.bf16 %v9404_v8 }
 0xbf2   : > { %v8755_v61 = vpack.c.bf16 %v9411_v39, %v9410_v36 }
 0xbf3   : > { %v9414_v48 = vpop.permute.xlu1 %9413  ;;  %v8751_v50 = vpack.c.bf16 %v9406_v42, %v9405_v47 }
 0xbf4   : > { %v9416_v56 = vunpack.i.h.bf16 %v9414_v48  ;;  %v9415_v60 = vunpack.i.l.bf16 %v9414_v48 }
 0xbf5   : > { %8752 = vmatprep.subr.bf16.mxu1 %v8751_v50 }
 0xbf6   : > { %8754 = vmatpush3.bf16.msra.mxu1 %v8751_v50  ;;  %v8759_v57 = vpack.c.bf16 %v9416_v56, %v9415_v60 }
 0xbf7   : > { %v9833_v58 = vpop.eup %9832  ;;  %8756 = vmatprep.subr.bf16.mxu1 %v8755_v61  ;;  %v9419_v20 = vpop.permute.xlu1 %9418 }
 0xbf8   : > { %v9835_v40 = vpop.eup %9834  ;;  %v2176_v37 = vmul.f32 %v9833_v58, %v9827_v38  ;;  %v9421_v22 = vunpack.i.h.bf16 %v9419_v20  ;;  %v9420_v62 = vunpack.i.l.bf16 %v9419_v20 }
 0xbf9   : > { %v2178_v63 = vmul.f32 %v9835_v40, %v9825_v35 }
 0xbfa   : > { %8758 = vmatpush3.bf16.msra.mxu1 %v8755_v61  ;;  %7921 = vmatprep.mubr.msk.f32.mxu1 %vm1066_vm3, %v2176_v37  ;;  %v8765_v24 = vpack.c.bf16 %v9421_v22, %v9420_v62 }
 0xbfb   : > { %8761 = vmatprep.subr.msk.bf16.mxu1 %vm10515_vm2, %v8759_v57 }
 0xbfd   : > { %7922 = vmatmul.mubr.msk.f32.vlgmr.msra.gmra.mrb[26].mxu1 %vm1066_vm3, %v2178_v63 }
 0xc03   : > { %8764 = vmatpush3.bf16.xpose.msk.msra.mxu1 %vm10515_vm2, %v8759_v57 }
 0xc04   : > { %8767 = vmatprep.subr.msk.bf16.mxu1 %vm10515_vm2, %v8765_v24 }
 0xc0b   : > { %8770 = vmatpush3.bf16.xpose.msk.msra.mxu1 %vm10515_vm2, %v8765_v24 }
 0xc21   : > { %v2171_v38 = vpop.xlane.xlu0 %2170 }
 0xc22   : > { %9836 = vrcp.f32 %v2171_v38 }
 0xc25   : > { %v2293_v36 = vpop.permute.xlu0 %2292 }
 0xc28   : > { %v2174_v35 = vpop.xlane.xlu1 %2173 }
 0xc29   : > { %9838 = vrcp.f32 %v2174_v35  ;;  %v2297_v48 = vpop.permute.xlu0 %2296 }
 0xc2c   : > { %v9837_v3 = vpop.eup %9836  ;;  %v2295_v47 = vpop.permute.xlu1 %2294 }
 0xc2d   : > { %v2180_v8 = vmul.f32 %v9837_v3, %v9829_v14 }
 0xc2f   : > { %7924 = vmatprep.mubr.msk.f32.mxu1 %vm1066_vm3, %v2180_v8 }
 0xc30   : > { %v2299_v50 = vpop.permute.xlu1 %2298 }
 0xc33   : > { %v9839_v39 = vpop.eup %9838 }
 0xc34   : > { %v2182_v42 = vmul.f32 %v9839_v39, %v9831_v21 }
 0xc36   : > { %7925 = vmatmul.mubr.msk.f32.gmra.mrb[28].mxu1 %vm1066_vm3, %v2182_v42 }
 0xc37   : > { %7935 = vmatprep.mubr.msk.f32.mxu1 %vm956_vm1, %v2293_v36 }
 0xc3a   : > { %7936 = vmatmul.mubr.msk.f32.vlgmr.msra.gmra.mrb[30].mxu1 %vm956_vm1, %v2295_v47 }
 0xc3b   : > { %7938 = vmatprep.mubr.msk.f32.mxu1 %vm956_vm1, %v2297_v48 }
 0xc3e   : > { %7939 = vmatmul.mubr.msk.f32.gmra.mrb[32].mxu1 %vm956_vm1, %v2299_v50 }
 0xcd0   : > { %v10819_v56 = vpop.f32.mrb[26].mxu1 }
 0xcd1   : > { %v10821_v14 = vpop.f32.mrb[27].mxu1 }
 0xcd2   : > { %v9487_v21 = vpack.i.bf16 %v10819_v56, %v10821_v14  ;;  %v3246_v14 = vld [vmem:[%s12267_s6] sm:$0xff] }
 0xd09   : > { %v10825_v60 = vpop.f32.mrb[28].mxu1 }
 0xd0a   : > { %v10827_v61 = vpop.f32.mrb[29].mxu1 }
 0xd0d   : > { %v7937_v40 = vpop.f32.mrb[30].mxu1 }
 0xd0e   : > { %v2390_v37 = vpop.f32.mrb[31].mxu1  ;;  %v2412_v57 = vsel %vm1066_vm3, %v7937_v40, -inf }
 0xd0f   : > { %2413 = vmax.xlane.f32.xlu1 %v2412_v57  ;;  %v2409_v63 = vsel %vm1066_vm3, %v2390_v37, -inf }
 0xd10   : > { %2410 = vmax.xlane.f32.xlu0 %v2409_v63 }
 0xd11   : > { %v7940_v20 = vpop.f32.mrb[32].mxu1 }
 0xd12   : > { %v2400_v22 = vpop.f32.mrb[33].mxu1  ;;  %v2418_v24 = vsel %vm1066_vm3, %v7940_v20, -inf }
 0xd13   : > { %v2415_v62 = vsel %vm1066_vm3, %v2400_v22, -inf }
 0xd14   : > { %2416 = vmax.xlane.f32.xlu0 %v2415_v62 }
 0xd18   : > { %2419 = vmax.xlane.f32.xlu0 %v2418_v24 }
 0xd9c   : > { %v2414_v38 = vpop.xlane.xlu1 %2413 }
 0xd9d   : > { %v2422_v35 = vsub.f32 %v7937_v40, %v2414_v38  ;;  %v2411_v3 = vpop.xlane.xlu0 %2410 }
 0xd9e   : > { %v2421_v8 = vsub.f32 %v2390_v37, %v2411_v3 }
 0xd9f   : > { %v2427_v39 = vmul.f32 1.442695, %v2422_v35 }
 0xda0   : > { %v2425_v36 = vmul.f32 1.442695, %v2421_v8 }
 0xda1   : > { %9840 = vpow2.f32 %v2427_v39  ;;  %v2417_v40 = vpop.xlane.xlu0 %2416 }
 0xda2   : > { %9842 = vpow2.f32 %v2425_v36  ;;  %v2423_v37 = vsub.f32 %v2400_v22, %v2417_v40 }
 0xda4   : > { %v2429_v57 = vmul.f32 1.442695, %v2423_v37 }
 0xda5   : > { %v2420_v63 = vpop.xlane.xlu0 %2419 }
 0xda6   : > { %v2424_v62 = vsub.f32 %v7940_v20, %v2420_v63  ;;  %9844 = vpow2.f32 %v2429_v57 }
 0xda8   : > { %v2431_v24 = vmul.f32 1.442695, %v2424_v62 }
 0xdaa   : > { %9846 = vpow2.f32 %v2431_v24 }
 0xdab   : > { %v9841_v42 = vpop.eup %9840 }
 0xdac   : > { %v9843_v47 = vpop.eup %9842  ;;  %v2436_v48 = vsel %vm1066_vm3, %v9841_v42, 0.0 }
 0xdad   : > { %2437 = vadd.xlane.f32.xlu1 %v2436_v48  ;;  %v2433_v50 = vsel %vm1066_vm3, %v9843_v47, 0.0 }
 0xdae   : > { %2434 = vadd.xlane.f32.xlu0 %v2433_v50 }
 0xdb0   : > { %v9845_v38 = vpop.eup %9844 }
 0xdb1   : > { %v2439_v35 = vsel %vm1066_vm3, %v9845_v38, 0.0 }
 0xdb4   : > { %v9847_v3 = vpop.eup %9846 }
 0xdb5   : > { %v2442_v8 = vsel %vm1066_vm3, %v9847_v3, 0.0 }
 0xdbe   : > { %9428 = vrot.lane.b32.xlu1 %v10527_v59, %s12285_s24 }
 0xdc2   : > { %9433 = vrot.lane.b32.xlu1 %v10519_v51, %s12283_s30 }
 0xdc4   : > { %9423 = vrot.lane.b32.xlu0 %v10521_v55, %s12285_s24 }
 0xdc6   : > { %9438 = vrot.lane.b32.xlu1 %v10529_v1, %s12283_s30 }
 0xde3   : > { %2440 = vadd.xlane.f32.xlu0 %v2439_v35 }
 0xdea   : > { %2443 = vadd.xlane.f32.xlu1 %v2442_v8 }
 0xdf9   : > { %2562 = vrot.lane.b32.xlu0 %v10506_v33, %s12283_s30 }
 0xdfb   : > { %2564 = vrot.lane.b32.xlu1 %v10535_v2, %s12283_s30 }
 0xdfd   : > { %2566 = vrot.lane.b32.xlu0 %v10537_v4, %s12283_s30 }
 0xdff   : > { %2568 = vrot.lane.b32.xlu1 %v10543_v6, %s12283_s30 }
 0xe3a   : > { %v2438_v20 = vpop.xlane.xlu1 %2437 }
 0xe3b   : > { %v2435_v22 = vpop.xlane.xlu0 %2434 }
 0xe3c   : > { %9848 = vrcp.f32 %v2435_v22 }
 0xe3d   : > { %9850 = vrcp.f32 %v2438_v20 }
 0xe3e   : > { %v9429_v39 = vpop.permute.xlu1 %9428 }
 0xe3f   : > { %v9424_v36 = vpop.permute.xlu0 %9423  ;;  %v9431_v48 = vunpack.i.h.bf16 %v9429_v39  ;;  %v9430_v50 = vunpack.i.l.bf16 %v9429_v39 }
 0xe40   : > { %v9426_v40 = vunpack.i.h.bf16 %v9424_v36  ;;  %v9425_v37 = vunpack.i.l.bf16 %v9424_v36 }
 0xe41   : > { %v8775_v35 = vpack.c.bf16 %v9431_v48, %v9430_v50 }
 0xe42   : > { %v9434_v57 = vpop.permute.xlu1 %9433  ;;  %v8771_v63 = vpack.c.bf16 %v9426_v40, %v9425_v37 }
 0xe43   : > { %v9436_v62 = vunpack.i.h.bf16 %v9434_v57  ;;  %v9435_v24 = vunpack.i.l.bf16 %v9434_v57 }
 0xe44   : > { %8772 = vmatprep.subr.bf16.mxu0 %v8771_v63 }
 0xe45   : > { %8774 = vmatpush3.bf16.msra.mxu0 %v8771_v63  ;;  %v8779_v58 = vpack.c.bf16 %v9436_v62, %v9435_v24 }
 0xe46   : > { %v9849_v8 = vpop.eup %9848  ;;  %8776 = vmatprep.subr.bf16.mxu0 %v8775_v35  ;;  %v9439_v22 = vpop.permute.xlu1 %9438 }
 0xe47   : > { %v9851_v30 = vpop.eup %9850  ;;  %v2446_v49 = vmul.f32 %v9849_v8, %v9843_v47  ;;  %v9441_v39 = vunpack.i.h.bf16 %v9439_v22  ;;  %v9440_v36 = vunpack.i.l.bf16 %v9439_v22 }
 0xe48   : > { %v2448_v20 = vmul.f32 %v9851_v30, %v9841_v42 }
 0xe49   : > { %8778 = vmatpush3.bf16.msra.mxu0 %v8775_v35  ;;  %7949 = vmatprep.mubr.msk.f32.mxu0 %vm1066_vm3, %v2446_v49  ;;  %v8785_v40 = vpack.c.bf16 %v9441_v39, %v9440_v36 }
 0xe4a   : > { %8781 = vmatprep.subr.msk.bf16.mxu0 %vm10515_vm2, %v8779_v58 }
 0xe4c   : > { %7950 = vmatmul.mubr.msk.f32.vlgmr.msra.gmra.mrb[26].mxu0 %vm1066_vm3, %v2448_v20 }
 0xe52   : > { %8784 = vmatpush3.bf16.xpose.msk.msra.mxu0 %vm10515_vm2, %v8779_v58 }
 0xe53   : > { %8787 = vmatprep.subr.msk.bf16.mxu0 %vm10515_vm2, %v8785_v40 }
 0xe5a   : > { %8790 = vmatpush3.bf16.xpose.msk.msra.mxu0 %vm10515_vm2, %v8785_v40 }
 0xe70   : > { %v2441_v49 = vpop.xlane.xlu0 %2440 }
 0xe71   : > { %9852 = vrcp.f32 %v2441_v49 }
 0xe74   : > { %v2563_v50 = vpop.permute.xlu0 %2562 }
 0xe77   : > { %v2444_v30 = vpop.xlane.xlu1 %2443 }
 0xe78   : > { %9854 = vrcp.f32 %v2444_v30  ;;  %v2567_v57 = vpop.permute.xlu0 %2566 }
 0xe7b   : > { %v9853_v42 = vpop.eup %9852  ;;  %v2565_v58 = vpop.permute.xlu1 %2564 }
 0xe7c   : > { %v2450_v47 = vmul.f32 %v9853_v42, %v9845_v38 }
 0xe7e   : > { %7952 = vmatprep.mubr.msk.f32.mxu0 %vm1066_vm3, %v2450_v47 }
 0xe7f   : > { %v2569_v63 = vpop.permute.xlu1 %2568 }
 0xe82   : > { %v9855_v48 = vpop.eup %9854 }
 0xe83   : > { %v2452_v37 = vmul.f32 %v9855_v48, %v9847_v3 }
 0xe85   : > { %7953 = vmatmul.mubr.msk.f32.gmra.mrb[28].mxu0 %vm1066_vm3, %v2452_v37 }
 0xe86   : > { %7963 = vmatprep.mubr.msk.f32.mxu0 %vm956_vm1, %v2563_v50 }
 0xe89   : > { %7964 = vmatmul.mubr.msk.f32.vlgmr.msra.gmra.mrb[30].mxu0 %vm956_vm1, %v2565_v58 }
 0xe8a   : > { %7966 = vmatprep.mubr.msk.f32.mxu0 %vm956_vm1, %v2567_v57 }
 0xe8d   : > { %7967 = vmatmul.mubr.msk.f32.gmra.mrb[32].mxu0 %vm956_vm1, %v2569_v63 }
 0xf1f   : > { %v10871_v62 = vpop.f32.mrb[26].mxu0 }
 0xf20   : > { %v10873_v38 = vpop.f32.mrb[27].mxu0 }
 0xf21   : > { %v9492_v3 = vpack.i.bf16 %v10871_v62, %v10873_v38  ;;  %v3248_v62 = vld [vmem:[%s12267_s6 + $0x10] sm:$0xff] }
 0xf58   : > { %v10877_v24 = vpop.f32.mrb[28].mxu0 }
 0xf59   : > { %v10879_v35 = vpop.f32.mrb[29].mxu0 }
 0xf5c   : > { %v7965_v20 = vpop.f32.mrb[30].mxu0 }
 0xf5d   : > { %v2660_v22 = vpop.f32.mrb[31].mxu0  ;;  %v2682_v39 = vsel %vm1066_vm3, %v7965_v20, -inf }
 0xf5e   : > { %2683 = vmax.xlane.f32.xlu1 %v2682_v39  ;;  %v2679_v36 = vsel %vm1066_vm3, %v2660_v22, -inf }
 0xf5f   : > { %2680 = vmax.xlane.f32.xlu0 %v2679_v36 }
 0xf60   : > { %v7968_v40 = vpop.f32.mrb[32].mxu0 }
 0xf61   : > { %v2670_v49 = vpop.f32.mrb[33].mxu0  ;;  %v2688_v42 = vsel %vm1066_vm3, %v7968_v40, -inf }
 0xf62   : > { %v2685_v30 = vsel %vm1066_vm3, %v2670_v49, -inf }
 0xf63   : > { %2686 = vmax.xlane.f32.xlu0 %v2685_v30 }
 0xf67   : > { %2689 = vmax.xlane.f32.xlu0 %v2688_v42 }
 0xfeb   : > { %v2684_v47 = vpop.xlane.xlu1 %2683 }
 0xfec   : > { %v2692_v48 = vsub.f32 %v7965_v20, %v2684_v47  ;;  %v2681_v50 = vpop.xlane.xlu0 %2680 }
 0xfed   : > { %v2691_v37 = vsub.f32 %v2660_v22, %v2681_v50 }
 0xfee   : > { %v2697_v58 = vmul.f32 1.442695, %v2692_v48 }
 0xfef   : > { %v2695_v57 = vmul.f32 1.442695, %v2691_v37 }
 0xff0   : > { %9856 = vpow2.f32 %v2697_v58  ;;  %v2687_v20 = vpop.xlane.xlu0 %2686 }
 0xff1   : > { %9858 = vpow2.f32 %v2695_v57  ;;  %v2693_v22 = vsub.f32 %v2670_v49, %v2687_v20 }
 0xff3   : > { %v2699_v30 = vmul.f32 1.442695, %v2693_v22 }
 0xff4   : > { %v2690_v42 = vpop.xlane.xlu0 %2689 }
 0xff5   : > { %v2694_v47 = vsub.f32 %v7968_v40, %v2690_v42  ;;  %9860 = vpow2.f32 %v2699_v30 }
 0xffa   : > { %v9857_v63 = vpop.eup %9856 }
 0xffb   : > { %v9859_v39 = vpop.eup %9858  ;;  %v2706_v36 = vsel %vm1066_vm3, %v9857_v63, 0.0 }
 0xffc   : > { %2707 = vadd.xlane.f32.xlu1 %v2706_v36  ;;  %v2703_v8 = vsel %vm1066_vm3, %v9859_v39, 0.0 }
 0xffd   : > { %2704 = vadd.xlane.f32.xlu0 %v2703_v8  ;;  %v2701_v8 = vmul.f32 1.442695, %v2694_v47 }
 0xfff   : > { %9862 = vpow2.f32 %v2701_v8  ;;  %v9861_v48 = vpop.eup %9860 }
0x1000   : > { %v2709_v50 = vsel %vm1066_vm3, %v9861_v48, 0.0 }
0x1009   : > { %v9863_v37 = vpop.eup %9862 }
0x100d   : > { %9448 = vrot.lane.b32.xlu1 %v10527_v59, %s12283_s30 }
0x1011   : > { %9453 = vrot.lane.b32.xlu1 %v10519_v51, %s12281_s15  ;;  %v2712_v51 = vsel %vm1066_vm3, %v9863_v37, 0.0 }
0x1013   : > { %9443 = vrot.lane.b32.xlu0 %v10521_v55, %s12283_s30 }
0x1015   : > { %9458 = vrot.lane.b32.xlu1 %v10529_v1, %s12281_s15 }
0x1032   : > { %2710 = vadd.xlane.f32.xlu0 %v2709_v50 }
0x1039   : > { %2713 = vadd.xlane.f32.xlu1 %v2712_v51 }
0x1048   : > { %2832 = vrot.lane.b32.xlu0 %v10506_v33, %s12281_s15 }
0x104a   : > { %2834 = vrot.lane.b32.xlu1 %v10535_v2, %s12281_s15 }
0x104c   : > { %2836 = vrot.lane.b32.xlu0 %v10537_v4, %s12281_s15 }
0x104e   : > { %2838 = vrot.lane.b32.xlu1 %v10543_v6, %s12281_s15 }
0x1089   : > { %v2708_v1 = vpop.xlane.xlu1 %2707 }
0x108a   : > { %v2705_v40 = vpop.xlane.xlu0 %2704 }
0x108b   : > { %9864 = vrcp.f32 %v2705_v40 }
0x108c   : > { %9866 = vrcp.f32 %v2708_v1 }
0x108d   : > { %v9449_v49 = vpop.permute.xlu1 %9448 }
0x108e   : > { %v9444_v58 = vpop.permute.xlu0 %9443  ;;  %v9451_v57 = vunpack.i.h.bf16 %v9449_v49  ;;  %v9450_v36 = vunpack.i.l.bf16 %v9449_v49 }
0x108f   : > { %v9446_v20 = vunpack.i.h.bf16 %v9444_v58  ;;  %v9445_v22 = vunpack.i.l.bf16 %v9444_v58 }
0x1090   : > { %v8795_v47 = vpack.c.bf16 %v9451_v57, %v9450_v36 }
0x1091   : > { %v9454_v33 = vpop.permute.xlu1 %9453  ;;  %v8791_v30 = vpack.c.bf16 %v9446_v20, %v9445_v22 }
0x1092   : > { %v9456_v42 = vunpack.i.h.bf16 %v9454_v33  ;;  %v9455_v2 = vunpack.i.l.bf16 %v9454_v33 }
0x1093   : > { %8792 = vmatprep.subr.bf16.mxu1 %v8791_v30 }
0x1094   : > { %8794 = vmatpush3.bf16.msra.mxu1 %v8791_v30  ;;  %v8799_v50 = vpack.c.bf16 %v9456_v42, %v9455_v2 }
0x1095   : > { %v9865_v4 = vpop.eup %9864  ;;  %8796 = vmatprep.subr.bf16.mxu1 %v8795_v47  ;;  %v9459_v1 = vpop.permute.xlu1 %9458 }
0x1096   : > { %v9867_v6 = vpop.eup %9866  ;;  %v2716_v8 = vmul.f32 %v9865_v4, %v9859_v39  ;;  %v9461_v40 = vunpack.i.h.bf16 %v9459_v1  ;;  %v9460_v49 = vunpack.i.l.bf16 %v9459_v1 }
0x1097   : > { %v2718_v51 = vmul.f32 %v9867_v6, %v9857_v63 }
0x1098   : > { %8798 = vmatpush3.bf16.msra.mxu1 %v8795_v47  ;;  %7977 = vmatprep.mubr.msk.f32.mxu1 %vm1066_vm3, %v2716_v8  ;;  %v8805_v58 = vpack.c.bf16 %v9461_v40, %v9460_v49 }
0x1099   : > { %8801 = vmatprep.subr.msk.bf16.mxu1 %vm10515_vm2, %v8799_v50 }
0x109b   : > { %7978 = vmatmul.mubr.msk.f32.vlgmr.msra.gmra.mrb[34].mxu1 %vm1066_vm3, %v2718_v51 }
0x10a1   : > { %8804 = vmatpush3.bf16.xpose.msk.msra.mxu1 %vm10515_vm2, %v8799_v50 }
0x10a2   : > { %8807 = vmatprep.subr.msk.bf16.mxu1 %vm10515_vm2, %v8805_v58 }
0x10a9   : > { %8810 = vmatpush3.bf16.xpose.msk.msra.mxu1 %vm10515_vm2, %v8805_v58 }
0x10bf   : > { %v2711_v39 = vpop.xlane.xlu0 %2710 }
0x10c0   : > { %9868 = vrcp.f32 %v2711_v39 }
0x10c3   : > { %v2833_v22 = vpop.permute.xlu0 %2832 }
0x10c6   : > { %v2714_v63 = vpop.xlane.xlu1 %2713 }
0x10c7   : > { %9870 = vrcp.f32 %v2714_v63  ;;  %v2837_v42 = vpop.permute.xlu0 %2836 }
0x10ca   : > { %v9869_v57 = vpop.eup %9868  ;;  %v2835_v30 = vpop.permute.xlu1 %2834 }
0x10cb   : > { %v2720_v36 = vmul.f32 %v9869_v57, %v9861_v48 }
0x10cd   : > { %7980 = vmatprep.mubr.msk.f32.mxu1 %vm1066_vm3, %v2720_v36 }
0x10ce   : > { %v2839_v2 = vpop.permute.xlu1 %2838 }
0x10d1   : > { %v9871_v20 = vpop.eup %9870 }
0x10d2   : > { %v2722_v33 = vmul.f32 %v9871_v20, %v9863_v37 }
0x10d4   : > { %7981 = vmatmul.mubr.msk.f32.gmra.mrb[36].mxu1 %vm1066_vm3, %v2722_v33 }
0x10d5   : > { %7991 = vmatprep.mubr.msk.f32.mxu1 %vm956_vm1, %v2833_v22 }
0x10d8   : > { %7992 = vmatmul.mubr.msk.f32.vlgmr.msra.gmra.mrb[38].mxu1 %vm956_vm1, %v2835_v30 }
0x10d9   : > { %7994 = vmatprep.mubr.msk.f32.mxu1 %vm956_vm1, %v2837_v42 }
0x10dc   : > { %7995 = vmatmul.mubr.msk.f32.gmra.mrb[40].mxu1 %vm956_vm1, %v2839_v2 }
0x116e   : > { %v7979_v47 = vpop.f32.mrb[34].mxu1 }
0x116f   : > { %v2813_v48 = vpop.f32.mrb[35].mxu1 }
0x1170   : > { %v9497_v4 = vpack.i.bf16 %v7979_v47, %v2813_v48 }
0x11a7   : > { %v10923_v6 = vpop.f32.mrb[36].mxu1 }
0x11a8   : > { %v10925_v8 = vpop.f32.mrb[37].mxu1 }
0x11ab   : > { %v7993_v50 = vpop.f32.mrb[38].mxu1 }
0x11ac   : > { %v2930_v51 = vpop.f32.mrb[39].mxu1  ;;  %v2952_v1 = vsel %vm1066_vm3, %v7993_v50, -inf }
0x11ad   : > { %2953 = vmax.xlane.f32.xlu1 %v2952_v1  ;;  %v2949_v40 = vsel %vm1066_vm3, %v2930_v51, -inf }
0x11ae   : > { %2950 = vmax.xlane.f32.xlu0 %v2949_v40 }
0x11af   : > { %v7996_v49 = vpop.f32.mrb[40].mxu1 }
0x11b0   : > { %v2940_v58 = vpop.f32.mrb[41].mxu1  ;;  %v2958_v63 = vsel %vm1066_vm3, %v7996_v49, -inf }
0x11b1   : > { %v2955_v39 = vsel %vm1066_vm3, %v2940_v58, -inf }
0x11b2   : > { %2956 = vmax.xlane.f32.xlu0 %v2955_v39 }
0x11b6   : > { %2959 = vmax.xlane.f32.xlu0 %v2958_v63 }
0x123a   : > { %v2954_v57 = vpop.xlane.xlu1 %2953 }
0x123b   : > { %v2962_v36 = vsub.f32 %v7993_v50, %v2954_v57  ;;  %v2951_v20 = vpop.xlane.xlu0 %2950 }
0x123c   : > { %v2961_v22 = vsub.f32 %v2930_v51, %v2951_v20  ;;  %v3253_v20 = vld [vmem:[%s12267_s6 + $0x38] sm:$0xff] }
0x123d   : > { %v2967_v33 = vmul.f32 1.442695, %v2962_v36 }
0x123e   : > { %v2965_v30 = vmul.f32 1.442695, %v2961_v22 }
0x123f   : > { %9872 = vpow2.f32 %v2967_v33  ;;  %v2957_v42 = vpop.xlane.xlu0 %2956  ;;  %v3254_v33 = vld [vmem:[%s12267_s6 + $0x40] sm:$0xff] }
0x1240   : > { %9874 = vpow2.f32 %v2965_v30  ;;  %v2963_v2 = vsub.f32 %v2940_v58, %v2957_v42  ;;  %v3255_v30 = vld [vmem:[%s12267_s6 + $0x48] sm:$0xff] }
0x1241   : > { %v8835_v42 = vpack.c.bf16 %v3255_v30, %v3254_v33 }
0x1242   : > { %v2969_v47 = vmul.f32 1.442695, %v2963_v2  ;;  %v3256_v2 = vld [vmem:[%s12267_s6 + $0x50] sm:$0xff] }
0x1243   : > { %v2960_v48 = vpop.xlane.xlu0 %2959 }
0x1244   : > { %9876 = vpow2.f32 %v2969_v47  ;;  %v2964_v1 = vsub.f32 %v7996_v49, %v2960_v48  ;;  %v3252_v49 = vld [vmem:[%s12267_s6 + $0x30] sm:$0xff]  ;;  %v3257_v47 = vld [vmem:[%s12267_s6 + $0x58] sm:$0xff] }
0x1245   : > { %v8831_v22 = vpack.c.bf16 %v3253_v20, %v3252_v49  ;;  %v8839_v48 = vpack.c.bf16 %v3257_v47, %v3256_v2 }
0x1246   : > { %v2971_v40 = vmul.f32 1.442695, %v2964_v1  ;;  %v3258_v1 = vld [vmem:[%s12267_s6 + $0x60] sm:$0xff] }
0x1248   : > { %9878 = vpow2.f32 %v2971_v40  ;;  %v3259_v40 = vld [vmem:[%s12267_s6 + $0x68] sm:$0xff] }
0x1249   : > { %v9873_v39 = vpop.eup %9872 }
0x124a   : > { %v9875_v37 = vpop.eup %9874  ;;  %v2976_v63 = vsel %vm1066_vm3, %v9873_v39, 0.0 }
0x124b   : > { %2977 = vadd.xlane.f32.xlu1 %v2976_v63  ;;  %v2973_v50 = vsel %vm1066_vm3, %v9875_v37, 0.0  ;;  %v3260_v63 = vld [vmem:[%s12267_s6 + $0x70] sm:$0xff] }
0x124c   : > { %2974 = vadd.xlane.f32.xlu0 %v2973_v50  ;;  %v3261_v50 = vld [vmem:[%s12267_s6 + $0x78] sm:$0xff] }
0x124e   : > { %v9877_v51 = vpop.eup %9876 }
0x124f   : > { %v2979_v57 = vsel %vm1066_vm3, %v9877_v51, 0.0 }
0x1250   : > { %2980 = vadd.xlane.f32.xlu0 %v2979_v57 }
0x1252   : > { %v9879_v36 = vpop.eup %9878 }
0x1253   : > { %v2982_v58 = vsel %vm1066_vm3, %v9879_v36, 0.0 }
0x1254   : > { %2983 = vadd.xlane.f32.xlu1 %v2982_v58 }
0x1265   : > { %9468 = vrot.lane.b32.xlu1 %v10527_v59, %s12281_s15 }
0x1266   : > { %9463 = vrot.lane.b32.xlu0 %v10521_v55, %s12281_s15  ;;  %v12311_v55 = vpack.i.bf16 %v10877_v24, %v10879_v35  ;;  %v3250_v35 = vld [vmem:[%s12267_s6 + $0x20] sm:$0xff] }
0x1269   : > { %9473 = vrot.lane.b32.xlu1 %v9472_v9, %s12281_s15 }
0x126a   : > { %9483 = vrot.lane.b32.xlu0 %v9482_v16, %s12285_s24 }
0x126d   : > { %9478 = vrot.lane.b32.xlu1 %v9477_v46, %s12283_s30 }
0x126e   : > { %9493 = vrot.lane.b32.xlu0 %v9492_v3, %s12287_s22  ;;  %v3249_v3 = vld [vmem:[%s12267_s6 + $0x18] sm:$0xff] }
0x126f   : > { %v8823_v24 = vpack.c.bf16 %v3249_v3, %v3248_v62 }
0x1271   : > { %9488 = vrot.lane.b32.xlu1 %v9487_v21, %s12291_s23  ;;  %v3247_v21 = vld [vmem:[%s12267_s6 + $0x8] sm:$0xff] }
0x1272   : > { %9508 = vrot.lane.b32.xlu0 %v9507_v54, %s12283_s30  ;;  %v8819_v38 = vpack.c.bf16 %v3247_v21, %v3246_v14  ;;  %s12312_s30 = smov 64  }
0x1275   : > { %9498 = vrot.lane.b32.xlu1 %v9497_v4, %s12289_s21  ;;  %v3251_v4 = vld [vmem:[%s12267_s6 + $0x28] sm:$0xff]  ;;  %s7248_s21 = sshll.u32 %s10216_s29, 4  ;;  %s10124_s29 = smov [#allocation2]  }
0x1279   : > { %9503 = vrot.lane.b32.xlu1 %v9502_v7, %s12281_s15  ;;  %s12314_s15 = smov 96  }
0x127d   : > { %9513 = vrot.lane.b32.xlu1 %v9512_v19, %s12285_s24  ;;  %s12219_s24 = scalar_lea.hbm %s12274_s13, %s7248_s21 }
0x1281   : > { %9528 = vrot.lane.b32.xlu1 %v12311_v55, %s12287_s22  ;;  %s12322_s22 = smov 16  }
0x12d8   : > { %v2978_v43 = vpop.xlane.xlu1 %2977 }
0x12d9   : > { %v2975_v59 = vpop.xlane.xlu0 %2974 }
0x12da   : > { %9880 = vrcp.f32 %v2975_v59 }
0x12db   : > { %9882 = vrcp.f32 %v2978_v43 }
0x12dd   : > { %v2981_v44 = vpop.xlane.xlu0 %2980 }
0x12de   : > { %9884 = vrcp.f32 %v2981_v44  ;;  %v12313_v44 = vpack.i.bf16 %v10825_v60, %v10827_v61 }
0x12e1   : > { %v2984_v46 = vpop.xlane.xlu1 %2983  ;;  %v9464_v52 = vpop.permute.xlu0 %9463 }
0x12e2   : > { %v9466_v53 = vunpack.i.h.bf16 %v9464_v52  ;;  %v9465_v54 = vunpack.i.l.bf16 %v9464_v52  ;;  %9886 = vrcp.f32 %v2984_v46  ;;  %v12315_v46 = vpack.i.bf16 %v10923_v6, %v10925_v8 }
0x12e4   : > { %v9881_v41 = vpop.eup %9880  ;;  %v8811_v0 = vpack.c.bf16 %v9466_v53, %v9465_v54 }
0x12e5   : > { %v9469_v9 = vpop.permute.xlu1 %9468  ;;  %v2986_v11 = vmul.f32 %v9881_v41, %v9875_v37  ;;  %v9883_v15 = vpop.eup %9882  ;;  %v8827_v37 = vpack.c.bf16 %v3251_v4, %v3250_v35 }
0x12e6   : > { %v9471_v10 = vunpack.i.h.bf16 %v9469_v9  ;;  %v9470_v7 = vunpack.i.l.bf16 %v9469_v9  ;;  %8812 = vmatprep.subr.bf16.mxu0 %v8811_v0  ;;  %v2988_v12 = vmul.f32 %v9883_v15, %v9873_v39  ;;  %v8843_v39 = vpack.c.bf16 %v3259_v40, %v3258_v1  ;;  %v9484_v41 = vpop.permute.xlu0 %9483 }
0x12e7   : > { %8814 = vmatpush3.bf16.msra.mxu0 %v8811_v0  ;;  %8005 = vmatprep.mubr.msk.f32.mxu0 %vm1066_vm3, %v2986_v11 }
0x12e8   : > { %v8815_v13 = vpack.c.bf16 %v9471_v10, %v9470_v7  ;;  %v9885_v16 = vpop.eup %9884 }
0x12e9   : > { %v2990_v19 = vmul.f32 %v9885_v16, %v9877_v51  ;;  %v8847_v51 = vpack.c.bf16 %v3261_v50, %v3260_v63  ;;  %v9474_v52 = vpop.permute.xlu1 %9473 }
0x12ea   : > { %8816 = vmatprep.subr.bf16.mxu0 %v8815_v13  ;;  %v9476_v9 = vunpack.i.h.bf16 %v9474_v52  ;;  %v9475_v11 = vunpack.i.l.bf16 %v9474_v52 }
0x12eb   : > { %8818 = vmatpush3.bf16.msra.mxu0 %v8815_v13  ;;  %v9494_v13 = vpop.permute.xlu0 %9493 }
0x12ec   : > { %v9887_v17 = vpop.eup %9886  ;;  %8820 = vmatprep.subr.bf16.mxu0 %v8819_v38  ;;  %v3215_v60 = vsel %vm956_vm1, %v10607_v28, %v9476_v9  ;;  %v3214_v61 = vsel %vm956_vm1, %v10609_v29, %v9475_v11  ;;  %v9495_v35 = vunpack.i.l.bf16 %v9494_v13 }
0x12ed   : > { %v2992_v56 = vmul.f32 %v9887_v17, %v9879_v36  ;;  %v9479_v53 = vpop.permute.xlu1 %9478  ;;  %v9486_v17 = vunpack.i.h.bf16 %v9484_v41 }
0x12ee   : > { %8006 = vmatmul.mubr.msk.f32.vlgmr.msra.gmra.mrb[34].mxu0 %vm1066_vm3, %v2988_v12  ;;  %v9481_v10 = vunpack.i.h.bf16 %v9479_v53  ;;  %v9480_v7 = vunpack.i.l.bf16 %v9479_v53 }
0x12ef   : > { %8008 = vmatprep.mubr.msk.f32.mxu0 %vm1066_vm3, %v2990_v19  ;;  %8822 = vmatpush3.bf16.msra.mxu0 %v8819_v38  ;;  %v9485_v19 = vunpack.i.l.bf16 %v9484_v41 }
0x12f0   : > { %8824 = vmatprep.subr.bf16.mxu0 %v8823_v24  ;;  %v3218_v6 = vsel %vm1066_vm3, %v3214_v61, %v9480_v7  ;;  %v3219_v8 = vsel %vm1066_vm3, %v3215_v60, %v9481_v10 }
0x12f1   : > { %v9489_v54 = vpop.permute.xlu1 %9488  ;;  %v3222_v14 = vsel %vm466_vm0, %v3218_v6, %v9485_v19  ;;  %v3223_v21 = vsel %vm466_vm0, %v3219_v8, %v9486_v17  ;;  %v12299_v8 = vsub.s32 3, %v10493_v26 }
0x12f2   : > { %8009 = vmatmul.mubr.msk.f32.gmra.mrb[36].mxu0 %vm1066_vm3, %v2992_v56  ;;  %v9491_v16 = vunpack.i.h.bf16 %v9489_v54  ;;  %v9490_v12 = vunpack.i.l.bf16 %v9489_v54  ;;  %v9509_v56 = vpop.permute.xlu0 %9508 }
0x12f3   : > { %8826 = vmatpush3.bf16.msra.mxu0 %v8823_v24  ;;  %v9496_v24 = vunpack.i.h.bf16 %v9494_v13  ;;  %v9510_v63 = vunpack.i.l.bf16 %v9509_v56 }
0x12f4   : > { %8828 = vmatprep.subr.bf16.mxu0 %v8827_v37  ;;  %v3227_v28 = vsel %vm3226_vm4, %v3222_v14, %v9490_v12  ;;  %v3228_v29 = vsel %vm3226_vm4, %v3223_v21, %v9491_v16  ;;  %v11076_v16 = vld [vmem:[%s12273_s12] sm:$0xff] }
0x12f5   : > { %v9499_v0 = vpop.permute.xlu1 %9498  ;;  %v3232_v20 = vsel %vm3231_vm5, %v3227_v28, %v9495_v35  ;;  %v3265_v12 = vrot.slane %v11076_v16, %v12299_v8 }
0x12f6   : > { %v9501_v62 = vunpack.i.h.bf16 %v9499_v0  ;;  %v9500_v38 = vunpack.i.l.bf16 %v9499_v0 }
0x12f7   : > { %8830 = vmatpush3.bf16.msra.mxu0 %v8827_v37 }
0x12f8   : > { %8832 = vmatprep.subr.bf16.mxu0 %v8831_v22 }
0x12f9   : > { %v9504_v15 = vpop.permute.xlu1 %9503 }
0x12fa   : > { %v9506_v4 = vunpack.i.h.bf16 %v9504_v15  ;;  %v9505_v37 = vunpack.i.l.bf16 %v9504_v15 }
0x12fb   : > { %8834 = vmatpush3.bf16.msra.mxu0 %v8831_v22  ;;  %v3233_v22 = vsel %vm3231_vm5, %v3228_v29, %v9496_v24 }
0x12fc   : > { %8836 = vmatprep.subr.bf16.mxu0 %v8835_v42  ;;  %v3238_v2 = vsel %vm3236_vm6, %v3233_v22, %v9501_v62  ;;  %v3217_v47 = vsel %vm956_vm1, %v10611_v32, %v9506_v4  ;;  %v3415_v4 = vld [vmem:[%s12268_s7] sm:$0xff] }
0x12fd   : > { %v9514_v3 = vpop.permute.xlu1 %9513 }
0x12fe   : > { %v9516_v1 = vunpack.i.h.bf16 %v9514_v3  ;;  %v9515_v40 = vunpack.i.l.bf16 %v9514_v3 }
0x12ff   : > { %8838 = vmatpush3.bf16.msra.mxu0 %v8835_v42  ;;  %v3237_v42 = vsel %vm3236_vm6, %v3232_v20, %v9500_v38  ;;  %v3420_v20 = vld [vmem:[%s12268_s7 + $0x28] sm:$0xff] }
0x1300   : > { %8840 = vmatprep.subr.bf16.mxu0 %v8839_v48 }
0x1301   : > { %v9529_v50 = vpop.permute.xlu1 %9528 }
0x1302   : > { %v9531_v53 = vunpack.i.h.bf16 %v9529_v50  ;;  %v9530_v54 = vunpack.i.l.bf16 %v9529_v50 }
0x1303   : > { %8842 = vmatpush3.bf16.msra.mxu0 %v8839_v48  ;;  %v3216_v48 = vsel %vm956_vm1, %v10613_v34, %v9505_v37 }
0x1304   : > { %8844 = vmatprep.subr.bf16.mxu0 %v8843_v39 }
0x1307   : > { %8846 = vmatpush3.bf16.msra.mxu0 %v8843_v39  ;;  %v9511_v39 = vunpack.i.h.bf16 %v9509_v56 }
0x1308   : > { %8848 = vmatprep.subr.bf16.mxu0 %v8847_v51 }
0x130b   : > { %8850 = vmatpush3.bf16.msra.mxu0 %v8847_v51 }
0x13c1   : > { %v8007_v57 = vpop.f32.mrb[34].mxu0 }
0x13c2   : > { %v3083_v36 = vpop.f32.mrb[35].mxu0 }
0x13c3   : > { %v9517_v58 = vpack.i.bf16 %v8007_v57, %v3083_v36 }
0x13c5   : > { %9518 = vrot.lane.b32.xlu0 %v9517_v58, %s12293_s27  ;;  %v8010_v55 = vpop.f32.mrb[36].mxu0  ;;  %v3220_v58 = vsel %vm1066_vm3, %v3216_v48, %v9510_v63 }
0x13c6   : > { %v3093_v59 = vpop.f32.mrb[37].mxu0  ;;  %v3224_v34 = vsel %vm466_vm0, %v3220_v58, %v9515_v40 }
0x13c7   : > { %v9537_v43 = vpack.i.bf16 %v8010_v55, %v3093_v59  ;;  %v3221_v55 = vsel %vm1066_vm3, %v3217_v47, %v9511_v39 }
0x13c9   : > { %9523 = vrot.lane.b32.xlu0 %v12313_v44, %s12312_s30  ;;  %9538 = vrot.lane.b32.xlu1 %v9537_v43, %s12293_s27  ;;  %v3225_v43 = vsel %vm466_vm0, %v3221_v55, %v9516_v1 }
0x13cd   : > { %9533 = vrot.lane.b32.xlu0 %v12315_v46, %s12314_s15 }
0x1437   : > { %v9519_v49 = vpop.permute.xlu0 %9518 }
0x1438   : > { %v9521_v33 = vunpack.i.h.bf16 %v9519_v49  ;;  %v9520_v30 = vunpack.i.l.bf16 %v9519_v49 }
0x143a   : > { %v3242_v51 = vsel %vm3241_vm7, %v3237_v42, %v9520_v30  ;;  %v3243_v57 = vsel %vm3241_vm7, %v3238_v2, %v9521_v33 }
0x143b   : > { %v9524_v36 = vpop.permute.xlu0 %9523  ;;  %8043 = vmatprep.mubr.f32.mxu0 %v3242_v51  ;;  %v9539_v52 = vpop.permute.xlu1 %9538 }
0x143c   : > { %v9526_v59 = vunpack.i.h.bf16 %v9524_v36  ;;  %v9525_v32 = vunpack.i.l.bf16 %v9524_v36  ;;  %8044 = vmatmul.mubr.f32.vlgmr.msra.gmra.mrb[38].mxu0 %v3243_v57  ;;  %v9541_v11 = vunpack.i.h.bf16 %v9539_v52  ;;  %v9540_v10 = vunpack.i.l.bf16 %v9539_v52  ;;  %v3425_v52 = vld [vmem:[%s12268_s7 + $0x50] sm:$0xff] }
0x143e   : > { %v3230_v44 = vsel %vm3226_vm4, %v3225_v43, %v9526_v59  ;;  %v3229_v46 = vsel %vm3226_vm4, %v3224_v34, %v9525_v32  ;;  %v3421_v59 = vld [vmem:[%s12268_s7 + $0x30] sm:$0xff]  ;;  %v3422_v32 = vld [vmem:[%s12268_s7 + $0x38] sm:$0xff]  ;;  %v3423_v43 = vld [vmem:[%s12268_s7 + $0x40] sm:$0xff] }
0x143f   : > { %v9534_v41 = vpop.permute.xlu0 %9533  ;;  %v3234_v7 = vsel %vm3231_vm5, %v3229_v46, %v9530_v54  ;;  %v3235_v13 = vsel %vm3231_vm5, %v3230_v44, %v9531_v53  ;;  %v8863_v34 = vpack.c.bf16 %v3422_v32, %v3421_v59  ;;  %v3424_v44 = vld [vmem:[%s12268_s7 + $0x48] sm:$0xff]  ;;  %v3426_v53 = vld [vmem:[%s12268_s7 + $0x58] sm:$0xff] }
0x1440   : > { %v9536_v0 = vunpack.i.h.bf16 %v9534_v41  ;;  %v9535_v9 = vunpack.i.l.bf16 %v9534_v41  ;;  %v8867_v46 = vpack.c.bf16 %v3424_v44, %v3423_v43  ;;  %v8871_v54 = vpack.c.bf16 %v3426_v53, %v3425_v52  ;;  %v3427_v41 = vld [vmem:[%s12268_s7 + $0x60] sm:$0xff] }
0x1442   : > { %v3239_v15 = vsel %vm3236_vm6, %v3234_v7, %v9535_v9  ;;  %v3240_v60 = vsel %vm3236_vm6, %v3235_v13, %v9536_v0  ;;  %v3428_v0 = vld [vmem:[%s12268_s7 + $0x68] sm:$0xff]  ;;  %v3429_v9 = vld [vmem:[%s12268_s7 + $0x70] sm:$0xff]  ;;  %v3524_v13 = vld [vmem:[%s12269_s8] sm:$0xff] }
0x1443   : > { %v3244_v61 = vsel %vm3241_vm7, %v3239_v15, %v9540_v10  ;;  %v3245_v6 = vsel %vm3241_vm7, %v3240_v60, %v9541_v11  ;;  %v8875_v11 = vpack.c.bf16 %v3428_v0, %v3427_v41  ;;  %v3430_v10 = vld [vmem:[%s12268_s7 + $0x78] sm:$0xff]  ;;  %v3525_v15 = vld [vmem:[%s12269_s8 + $0x8] sm:$0xff]  ;;  %v3526_v60 = vld [vmem:[%s12269_s8 + $0x10] sm:$0xff] }
0x1444   : > { %8046 = vmatprep.mubr.f32.mxu0 %v3244_v61  ;;  %v8879_v7 = vpack.c.bf16 %v3430_v10, %v3429_v9  ;;  %v8883_v61 = vpack.c.bf16 %v3525_v15, %v3524_v13  ;;  %v3538_v10 = vld [vmem:[%s12269_s8 + $0x70] sm:$0xff]  ;;  %v12296_v13 = vsub.s32 6, %v10493_v26 }
0x1445   : > { %8047 = vmatmul.mubr.f32.gmra.mrb[40].mxu0 %v3245_v6  ;;  %v3527_v6 = vld [vmem:[%s12269_s8 + $0x18] sm:$0xff] }
0x1446   : > { %8884 = vmatprep.subr.bf16.mxu0 %v8883_v61 }
0x1447   : > { %8886 = vmatpush3.bf16.msra.mxu0 %v8883_v61 }
0x150f   : > { %v8045_v17 = vpop.f32.mrb[38].mxu0 }
0x1510   : > { %v3338_v19 = vadd.f32 %v8045_v17, %v3265_v12  ;;  %v3332_v56 = vpop.f32.mrb[39].mxu0  ;;  %v3528_v17 = vld [vmem:[%s12269_s8 + $0x20] sm:$0xff] }
0x1511   : > { %v3333_v14 = vadd.f32 %v3332_v56, %v3265_v12 }
0x1512   : > { %v3352_v21 = vadd.f32 %v3338_v19, %v10478_v23  ;;  %v3417_v23 = vld [vmem:[%s12268_s7 + $0x10] sm:$0xff]  ;;  %v3529_v19 = vld [vmem:[%s12269_s8 + $0x28] sm:$0xff] }
0x1513   : > { %v3351_v28 = vadd.f32 %v3333_v14, %v10471_v18  ;;  %v3416_v18 = vld [vmem:[%s12268_s7 + $0x8] sm:$0xff]  ;;  %v8891_v56 = vpack.c.bf16 %v3529_v19, %v3528_v17  ;;  %v3530_v14 = vld [vmem:[%s12269_s8 + $0x30] sm:$0xff] }
0x1514   : > { %3357 = vadd.xlane.f32.xlu1 %v3352_v21  ;;  %v8851_v37 = vpack.c.bf16 %v3416_v18, %v3415_v4  ;;  %v3536_v4 = vld [vmem:[%s12269_s8 + $0x60] sm:$0xff]  ;;  %v3537_v18 = vld [vmem:[%s12269_s8 + $0x68] sm:$0xff] }
0x1515   : > { %3355 = vadd.xlane.f32.xlu0 %v3351_v28 }
0x1516   : > { %8852 = vmatprep.subr.bf16.mxu1 %v8851_v37 }
0x1517   : > { %8854 = vmatpush3.bf16.msra.mxu1 %v8851_v37 }
0x1518   : > { %v8048_v29 = vpop.f32.mrb[40].mxu0 }
0x1519   : > { %v3342_v62 = vpop.f32.mrb[41].mxu0  ;;  %v3348_v3 = vadd.f32 %v8048_v29, %v3265_v12  ;;  %v3532_v29 = vld [vmem:[%s12269_s8 + $0x40] sm:$0xff] }
0x151a   : > { %v3343_v38 = vadd.f32 %v3342_v62, %v3265_v12  ;;  %v8887_v12 = vpack.c.bf16 %v3527_v6, %v3526_v60  ;;  %v3533_v62 = vld [vmem:[%s12269_s8 + $0x48] sm:$0xff] }
0x151b   : > { %v3354_v35 = vadd.f32 %v3348_v3, %v10487_v5  ;;  %v3419_v5 = vld [vmem:[%s12268_s7 + $0x20] sm:$0xff]  ;;  %v3534_v3 = vld [vmem:[%s12269_s8 + $0x50] sm:$0xff] }
0x151c   : > { %v3353_v24 = vadd.f32 %v3343_v38, %v10481_v25  ;;  %v3418_v25 = vld [vmem:[%s12268_s7 + $0x18] sm:$0xff]  ;;  %v8859_v22 = vpack.c.bf16 %v3420_v20, %v3419_v5  ;;  %8888 = vmatprep.subr.bf16.mxu0 %v8887_v12  ;;  %v8899_v38 = vpack.c.bf16 %v3533_v62, %v3532_v29  ;;  %v12295_v62 = vsub.s32 7, %v10493_v26 }
0x151d   : > { %v8855_v49 = vpack.c.bf16 %v3418_v25, %v3417_v23  ;;  %8890 = vmatpush3.bf16.msra.mxu0 %v8887_v12  ;;  %v8907_v23 = vpack.c.bf16 %v3537_v18, %v3536_v4 }
0x151e   : > { %3359 = vadd.xlane.f32.xlu0 %v3353_v24  ;;  %8892 = vmatprep.subr.bf16.mxu0 %v8891_v56 }
0x151f   : > { %8856 = vmatprep.subr.bf16.mxu1 %v8855_v49 }
0x1520   : > { %8858 = vmatpush3.bf16.msra.mxu1 %v8855_v49 }
0x1521   : > { %8860 = vmatprep.subr.bf16.mxu1 %v8859_v22  ;;  %8894 = vmatpush3.bf16.msra.mxu0 %v8891_v56 }
0x1522   : > { %3361 = vadd.xlane.f32.xlu0 %v3354_v35 }
0x1524   : > { %8862 = vmatpush3.bf16.msra.mxu1 %v8859_v22 }
0x1525   : > { %8864 = vmatprep.subr.bf16.mxu1 %v8863_v34 }
0x1528   : > { %8866 = vmatpush3.bf16.msra.mxu1 %v8863_v34 }
0x1529   : > { %8868 = vmatprep.subr.bf16.mxu1 %v8867_v46 }
0x152c   : > { %8870 = vmatpush3.bf16.msra.mxu1 %v8867_v46 }
0x152d   : > { %8872 = vmatprep.subr.bf16.mxu1 %v8871_v54 }
0x1530   : > { %8874 = vmatpush3.bf16.msra.mxu1 %v8871_v54 }
0x1531   : > { %8876 = vmatprep.subr.bf16.mxu1 %v8875_v11 }
0x1534   : > { %8878 = vmatpush3.bf16.msra.mxu1 %v8875_v11  ;;  %v12316_v11 = vmov 0.0  }
0x1535   : > { %8880 = vmatprep.subr.bf16.mxu1 %v8879_v7 }
0x1538   : > { %8882 = vmatpush3.bf16.msra.mxu1 %v8879_v7  ;;  %v3539_v7 = vld [vmem:[%s12269_s8 + $0x78] sm:$0xff] }
0x15a1   : > { %v3358_v33 = vpop.xlane.xlu1 %3357 }
0x15a2   : > { %v3364_v30 = vmul.f32 0.0078125, %v3358_v33  ;;  %v3356_v42 = vpop.xlane.xlu0 %3355 }
0x15a3   : > { %v3363_v2 = vmul.f32 0.0078125, %v3356_v42 }
0x15a4   : > { %v11103_v47 = vsub.f32 %v3352_v21, %v3364_v30  ;;  %v3531_v21 = vld [vmem:[%s12269_s8 + $0x38] sm:$0xff]  ;;  %v12298_v30 = vsub.s32 4, %v10493_v26 }
0x15a5   : > { %v11105_v48 = vsub.f32 %v3351_v28, %v3363_v2  ;;  %v8895_v28 = vpack.c.bf16 %v3531_v21, %v3530_v14 }
0x15a6   : > { %v3372_v1 = vmul.f32 %v11103_v47, %v11103_v47 }
0x15a7   : > { %v3371_v40 = vmul.f32 %v11105_v48, %v11105_v48  ;;  %8896 = vmatprep.subr.bf16.mxu0 %v8895_v28 }
0x15a8   : > { %3377 = vadd.xlane.f32.xlu1 %v3372_v1  ;;  %8898 = vmatpush3.bf16.msra.mxu0 %v8895_v28  ;;  %v12297_v1 = vsub.s32 5, %v10493_v26 }
0x15a9   : > { %3375 = vadd.xlane.f32.xlu0 %v3371_v40  ;;  %8900 = vmatprep.subr.bf16.mxu0 %v8899_v38 }
0x15aa   : > { %v3410_v32 = vrot.slane %v11076_v16, %v12297_v1 }
0x15ab   : > { %v3360_v39 = vpop.xlane.xlu0 %3359 }
0x15ac   : > { %v3365_v63 = vmul.f32 0.0078125, %v3360_v39  ;;  %8902 = vmatpush3.bf16.msra.mxu0 %v8899_v38  ;;  %v3402_v39 = vrot.slane %v11076_v16, %v12298_v30  ;;  %v3543_v38 = vrot.slane %v11076_v16, %v12295_v62 }
0x15ae   : > { %v11111_v50 = vsub.f32 %v3353_v24, %v3365_v63  ;;  %v3535_v24 = vld [vmem:[%s12269_s8 + $0x58] sm:$0xff] }
0x15af   : > { %v3362_v51 = vpop.xlane.xlu0 %3361 }
0x15b0   : > { %v3366_v57 = vmul.f32 0.0078125, %v3362_v51  ;;  %v3373_v36 = vmul.f32 %v11111_v50, %v11111_v50 }
0x15b2   : > { %v11115_v58 = vsub.f32 %v3354_v35, %v3366_v57  ;;  %3379 = vadd.xlane.f32.xlu0 %v3373_v36  ;;  %v8903_v35 = vpack.c.bf16 %v3535_v24, %v3534_v3 }
0x15b4   : > { %v3374_v55 = vmul.f32 %v11115_v58, %v11115_v58  ;;  %8904 = vmatprep.subr.bf16.mxu0 %v8903_v35 }
0x15b5   : > { %8906 = vmatpush3.bf16.msra.mxu0 %v8903_v35 }
0x15b6   : > { %3381 = vadd.xlane.f32.xlu1 %v3374_v55  ;;  %8908 = vmatprep.subr.bf16.mxu0 %v8907_v23 }
0x15b9   : > { %8910 = vmatpush3.bf16.msra.mxu0 %v8907_v23 }
0x1635   : > { %v3378_v37 = vpop.xlane.xlu1 %3377 }
0x1636   : > { %v3384_v25 = vmul.f32 0.0078125, %v3378_v37  ;;  %v3376_v49 = vpop.xlane.xlu0 %3375 }
0x1637   : > { %v3383_v5 = vmul.f32 0.0078125, %v3376_v49 }
0x1638   : > { %v3388_v20 = vadd.f32 1e-05, %v3384_v25 }
0x1639   : > { %v3387_v22 = vadd.f32 1e-05, %v3383_v5 }
0x163a   : > { %9888 = vrsqrt.f32 %v3388_v20 }
0x163b   : > { %9890 = vrsqrt.f32 %v3387_v22 }
0x163f   : > { %v3380_v33 = vpop.xlane.xlu0 %3379 }
0x1640   : > { %v3385_v42 = vmul.f32 0.0078125, %v3380_v33  ;;  %v7060_v33 = vld [vmem:[%s12266_s5 + $0x1a0] sm:$0xff] }
0x1642   : > { %v3389_v2 = vadd.f32 1e-05, %v3385_v42  ;;  %v7056_v42 = vld [vmem:[%s12266_s5 + $0x180] sm:$0xff] }
0x1643   : > { %v3382_v40 = vpop.xlane.xlu1 %3381 }
0x1644   : > { %v9889_v63 = vpop.eup %9888  ;;  %9892 = vrsqrt.f32 %v3389_v2  ;;  %v3386_v51 = vmul.f32 0.0078125, %v3382_v40  ;;  %v7059_v40 = vld [vmem:[%s12266_s5 + $0x198] sm:$0xff] }
0x1645   : > { %v9891_v57 = vpop.eup %9890  ;;  %v3396_v36 = vmul.f32 %v9889_v63, %v11103_v47  ;;  %v7061_v63 = vld [vmem:[%s12266_s5 + $0x1a8] sm:$0xff] }
0x1646   : > { %v3390_v55 = vadd.f32 1e-05, %v3386_v51  ;;  %v3395_v59 = vmul.f32 %v9891_v57, %v11105_v48  ;;  %v8917_v51 = vpack.c.bf16 %v7059_v40, %v7056_v42  ;;  %v7083_v42 = vld [vmem:[%s12266_s5 + $0x258] sm:$0xff] }
0x1647   : > { %v3404_v34 = vmul.f32 %v3402_v39, %v3396_v36  ;;  %v7063_v36 = vld [vmem:[%s12266_s5 + $0x1b8] sm:$0xff] }
0x1648   : > { %9894 = vrsqrt.f32 %v3390_v55  ;;  %v3403_v43 = vmul.f32 %v3402_v39, %v3395_v59  ;;  %v7066_v55 = vld [vmem:[%s12266_s5 + $0x1d0] sm:$0xff] }
0x1649   : > { %v3412_v46 = vadd.f32 %v3410_v32, %v3404_v34  ;;  %v7062_v59 = vld [vmem:[%s12266_s5 + $0x1b0] sm:$0xff]  ;;  %v7065_v34 = vld [vmem:[%s12266_s5 + $0x1c8] sm:$0xff] }
0x164a   : > { %v3411_v44 = vadd.f32 %v3410_v32, %v3403_v43  ;;  %v7064_v43 = vld [vmem:[%s12266_s5 + $0x1c0] sm:$0xff] }
0x164c   : > { %8081 = vmatprep.mubr.f32.mxu1 %v3411_v44 }
0x164d   : > { %8082 = vmatmul.mubr.f32.vlgmr.msra.gmra.mrb[42].mxu1 %v3412_v46 }
0x164e   : > { %v9893_v52 = vpop.eup %9892 }
0x164f   : > { %v3397_v53 = vmul.f32 %v9893_v52, %v11111_v50  ;;  %v8911_v50 = vpack.c.bf16 %v3539_v7, %v3538_v10 }
0x1651   : > { %v3405_v54 = vmul.f32 %v3402_v39, %v3397_v53  ;;  %8912 = vmatprep.subr.bf16.mxu0 %v8911_v50  ;;  %v7069_v53 = vld [vmem:[%s12266_s5 + $0x1e8] sm:$0xff] }
0x1652   : > { %v9895_v41 = vpop.eup %9894  ;;  %8914 = vmatpush3.bf16.msra.mxu0 %v8911_v50 }
0x1653   : > { %v3413_v47 = vadd.f32 %v3410_v32, %v3405_v54  ;;  %v3398_v0 = vmul.f32 %v9895_v41, %v11115_v58  ;;  %v3434_v58 = vrot.slane %v11076_v16, %v12296_v13  ;;  %v7057_v16 = vld [vmem:[%s12266_s5 + $0x188] sm:$0xff]  ;;  %v7072_v54 = vld [vmem:[%s12266_s5 + $0x200] sm:$0xff] }
0x1654   : > { %v8915_v2 = vpack.c.bf16 %v7060_v33, %v7057_v16  ;;  %v7068_v41 = vld [vmem:[%s12266_s5 + $0x1e0] sm:$0xff] }
0x1655   : > { %8084 = vmatprep.mubr.f32.mxu1 %v3413_v47  ;;  %v3406_v48 = vmul.f32 %v3402_v39, %v3398_v0  ;;  %v7058_v39 = vld [vmem:[%s12266_s5 + $0x190] sm:$0xff]  ;;  %v7071_v0 = vld [vmem:[%s12266_s5 + $0x1f8] sm:$0xff]  ;;  %v7080_v33 = vld [vmem:[%s12266_s5 + $0x240] sm:$0xff] }
0x1656   : > { %v8947_v57 = vpack.c.bf16 %v7061_v63, %v7058_v39  ;;  %8916 = vmatprep.subr.bf16.mxu1 %v8915_v2  ;;  %v8925_v7 = vpack.c.bf16 %v7071_v0, %v7068_v41  ;;  %v7082_v2 = vld [vmem:[%s12266_s5 + $0x250] sm:$0xff]  ;;  %v8933_v40 = vpack.c.bf16 %v7083_v42, %v7080_v33  ;;  %v7085_v39 = vld [vmem:[%s12266_s5 + $0x268] sm:$0xff]  ;;  %v7095_v41 = vld [vmem:[%s12266_s5 + $0x2b8] sm:$0xff] }
0x1657   : > { %v3414_v9 = vadd.f32 %v3410_v32, %v3406_v48  ;;  %v8919_v32 = vpack.c.bf16 %v7066_v55, %v7063_v36  ;;  %8918 = vmatpush1.bf16.msra.mxu1 %v8917_v51  ;;  %v7070_v48 = vld [vmem:[%s12266_s5 + $0x1f0] sm:$0xff]  ;;  %v8963_v63 = vpack.c.bf16 %v7085_v39, %v7082_v2  ;;  %v7087_v51 = vld [vmem:[%s12266_s5 + $0x278] sm:$0xff]  ;;  %v7097_v0 = vld [vmem:[%s12266_s5 + $0x2c8] sm:$0xff] }
0x1658   : > { %8948 = vmatprep.subr.bf16.mxu0 %v8947_v57  ;;  %v7086_v55 = vld [vmem:[%s12266_s5 + $0x270] sm:$0xff] }
0x1659   : > { %8085 = vmatmul.mubr.f32.gmra.mrb[44].mxu1 %v3414_v9  ;;  %8920 = vmatprep.subr.bf16.mxu1 %v8919_v32  ;;  %v7088_v32 = vld [vmem:[%s12266_s5 + $0x280] sm:$0xff] }
0x165a   : > { %3809 = vmatprep.mubr.f32.mxu1 %v12316_v11 }
0x1720   : > { %v8083_v15 = vpop.f32.mrb[42].mxu1 }
0x1721   : > { %v3507_v60 = vadd.f32 %v8083_v15, %v3434_v58  ;;  %v3501_v61 = vpop.f32.mrb[43].mxu1 }
0x1722   : > { %v3502_v6 = vadd.f32 %v3501_v61, %v3434_v58 }
0x1723   : > { %v3521_v17 = vmax.f32 %v3507_v60, 0.0 }
0x1724   : > { %v3520_v12 = vmax.f32 %v3502_v6, 0.0 }
0x1726   : > { %8119 = vmatprep.mubr.f32.mxu0 %v3520_v12 }
0x1727   : > { %8120 = vmatmul.mubr.f32.vlgmr.msra.gmra.mrb[42].mxu0 %v3521_v17 }
0x1728   : > { %8950 = vmatpush3.bf16.msra.mxu0 %v8947_v57  ;;  %v7090_v57 = vld [vmem:[%s12266_s5 + $0x290] sm:$0xff] }
0x1729   : > { %v8935_v36 = vpack.c.bf16 %v7090_v57, %v7087_v51 }
0x172c   : > { %v8086_v19 = vpop.f32.mrb[44].mxu1 }
0x172d   : > { %v3517_v56 = vadd.f32 %v8086_v19, %v3434_v58  ;;  %v3511_v14 = vpop.f32.mrb[45].mxu1 }
0x172e   : > { %v3512_v21 = vadd.f32 %v3511_v14, %v3434_v58 }
0x172f   : > { %v3523_v29 = vmax.f32 %v3517_v56, 0.0 }
0x1730   : > { %v3522_v28 = vmax.f32 %v3512_v21, 0.0 }
0x1732   : > { %8122 = vmatprep.mubr.f32.mxu0 %v3522_v28 }
0x1733   : > { %8123 = vmatmul.mubr.f32.gmra.mrb[44].mxu0 %v3523_v29 }
0x17fa   : > { %v8121_v3 = vpop.f32.mrb[42].mxu0 }
0x17fb   : > { %v3616_v24 = vadd.f32 %v8121_v3, %v3543_v38  ;;  %v3610_v35 = vpop.f32.mrb[43].mxu0 }
0x17fc   : > { %v3611_v4 = vadd.f32 %v3610_v35, %v3543_v38  ;;  %v7078_v35 = vld [vmem:[%s12266_s5 + $0x230] sm:$0xff] }
0x17fd   : > { %v3630_v18 = vadd.f32 %v3616_v24, %v3412_v46  ;;  %v8921_v46 = vpack.c.bf16 %v7065_v34, %v7062_v59  ;;  %v7075_v24 = vld [vmem:[%s12266_s5 + $0x218] sm:$0xff]  ;;  %v7089_v59 = vld [vmem:[%s12266_s5 + $0x288] sm:$0xff] }
0x17fe   : > { %v3629_v23 = vadd.f32 %v3611_v4, %v3411_v44  ;;  %v7067_v44 = vld [vmem:[%s12266_s5 + $0x1d8] sm:$0xff]  ;;  %v8927_v4 = vpack.c.bf16 %v7078_v35, %v7075_v24  ;;  %v8937_v34 = vpack.c.bf16 %v7089_v59, %v7086_v55  ;;  %v709_v35 = vld [vmem:[%s12273_s12 + $0x8] sm:$0x3] }
0x17ff   : > { %3635 = vadd.xlane.f32.xlu1 %v3630_v18  ;;  %v8951_v52 = vpack.c.bf16 %v7067_v44, %v7064_v43  ;;  %8922 = vmatpush1.bf16.msra.mxu1 %v8921_v46  ;;  %v7091_v43 = vld [vmem:[%s12266_s5 + $0x298] sm:$0xff]  ;;  %v7093_v46 = vld [vmem:[%s12266_s5 + $0x2a8] sm:$0xff]  ;;  %v3688_v42 = vrot.slane %v709_v35, %v10504_v31 }
0x1800   : > { %3633 = vadd.xlane.f32.xlu0 %v3629_v23  ;;  %v8967_v44 = vpack.c.bf16 %v7091_v43, %v7088_v32 }
0x1801   : > { %8952 = vmatprep.subr.bf16.mxu0 %v8951_v52 }
0x1802   : > { %8954 = vmatpush3.bf16.msra.mxu0 %v8951_v52  ;;  %v7096_v52 = vld [vmem:[%s12266_s5 + $0x2c0] sm:$0xff] }
0x1806   : > { %v8124_v37 = vpop.f32.mrb[44].mxu0 }
0x1807   : > { %v3626_v25 = vadd.f32 %v8124_v37, %v3543_v38  ;;  %v3620_v49 = vpop.f32.mrb[45].mxu0  ;;  %v7076_v37 = vld [vmem:[%s12266_s5 + $0x220] sm:$0xff] }
0x1808   : > { %v3621_v5 = vadd.f32 %v3620_v49, %v3543_v38  ;;  %v7079_v49 = vld [vmem:[%s12266_s5 + $0x238] sm:$0xff] }
0x1809   : > { %v3632_v20 = vadd.f32 %v3626_v25, %v3414_v9  ;;  %v7073_v9 = vld [vmem:[%s12266_s5 + $0x208] sm:$0xff] }
0x180a   : > { %v3631_v22 = vadd.f32 %v3621_v5, %v3413_v47  ;;  %v8923_v47 = vpack.c.bf16 %v7072_v54, %v7069_v53  ;;  %v8955_v10 = vpack.c.bf16 %v7073_v9, %v7070_v48  ;;  %v8959_v5 = vpack.c.bf16 %v7079_v49, %v7076_v37  ;;  %v7092_v53 = vld [vmem:[%s12266_s5 + $0x2a0] sm:$0xff] }
0x180b   : > { %3639 = vadd.xlane.f32.xlu1 %v3632_v20  ;;  %v8939_v54 = vpack.c.bf16 %v7096_v52, %v7093_v46  ;;  %v8941_v48 = vpack.c.bf16 %v7095_v41, %v7092_v53 }
0x180c   : > { %3637 = vadd.xlane.f32.xlu0 %v3631_v22  ;;  %8924 = vmatprep.subr.bf16.mxu1 %v8923_v47  ;;  %v7094_v47 = vld [vmem:[%s12266_s5 + $0x2b0] sm:$0xff] }
0x180d   : > { %8956 = vmatprep.subr.bf16.mxu0 %v8955_v10  ;;  %8926 = vmatpush1.bf16.msra.mxu1 %v8925_v7  ;;  %v8971_v9 = vpack.c.bf16 %v7097_v0, %v7094_v47  ;;  %v7102_v7 = vld [vmem:[%s12266_s5 + $0x2f0] sm:$0xff] }
0x180e   : > { %8958 = vmatpush3.bf16.msra.mxu0 %v8955_v10  ;;  %8928 = vmatprep.subr.bf16.mxu1 %v8927_v4  ;;  %v7099_v10 = vld [vmem:[%s12266_s5 + $0x2d8] sm:$0xff] }
0x180f   : > { %8960 = vmatprep.subr.bf16.mxu0 %v8959_v5 }
0x1812   : > { %8962 = vmatpush3.bf16.msra.mxu0 %v8959_v5 }
0x1813   : > { %8964 = vmatprep.subr.bf16.mxu0 %v8963_v63 }
0x1816   : > { %8966 = vmatpush3.bf16.msra.mxu0 %v8963_v63 }
0x1817   : > { %8968 = vmatprep.subr.bf16.mxu0 %v8967_v44 }
0x181a   : > { %8970 = vmatpush3.bf16.msra.mxu0 %v8967_v44 }
0x181b   : > { %8972 = vmatprep.subr.bf16.mxu0 %v8971_v9 }
0x181e   : > { %8974 = vmatpush3.bf16.msra.mxu0 %v8971_v9 }
0x188c   : > { %v3636_v50 = vpop.xlane.xlu1 %3635 }
0x188d   : > { %v3642_v58 = vmul.f32 0.0078125, %v3636_v50  ;;  %v3634_v15 = vpop.xlane.xlu0 %3633  ;;  %v7098_v50 = vld [vmem:[%s12266_s5 + $0x2d0] sm:$0xff] }
0x188e   : > { %v3641_v60 = vmul.f32 0.0078125, %v3634_v15  ;;  %v7101_v15 = vld [vmem:[%s12266_s5 + $0x2e8] sm:$0xff] }
0x188f   : > { %v11272_v61 = vsub.f32 %v3630_v18, %v3642_v58  ;;  %v7074_v18 = vld [vmem:[%s12266_s5 + $0x210] sm:$0xff]  ;;  %v8943_v58 = vpack.c.bf16 %v7102_v7, %v7099_v10 }
0x1890   : > { %v11274_v6 = vsub.f32 %v3629_v23, %v3641_v60  ;;  %v7077_v23 = vld [vmem:[%s12266_s5 + $0x228] sm:$0xff]  ;;  %v7100_v60 = vld [vmem:[%s12266_s5 + $0x2e0] sm:$0xff] }
0x1891   : > { %v3650_v12 = vmul.f32 %v11272_v61, %v11272_v61  ;;  %v8929_v25 = vpack.c.bf16 %v7077_v23, %v7074_v18 }
0x1892   : > { %v3649_v17 = vmul.f32 %v11274_v6, %v11274_v6 }
0x1893   : > { %3655 = vadd.xlane.f32.xlu1 %v3650_v12  ;;  %8930 = vmatpush1.bf16.msra.mxu1 %v8929_v25  ;;  %v7103_v12 = vld [vmem:[%s12266_s5 + $0x2f8] sm:$0xff]  ;;  %v3680_v25 = vrot.slane %v709_v35, %v10496_v27 }
0x1894   : > { %3653 = vadd.xlane.f32.xlu0 %v3649_v17  ;;  %v8945_v17 = vpack.c.bf16 %v7101_v15, %v7098_v50 }
0x1898   : > { %v3640_v19 = vpop.xlane.xlu1 %3639 }
0x1899   : > { %v3644_v56 = vmul.f32 0.0078125, %v3640_v19  ;;  %v3638_v14 = vpop.xlane.xlu0 %3637  ;;  %v8975_v19 = vpack.c.bf16 %v7103_v12, %v7100_v60 }
0x189a   : > { %v3643_v21 = vmul.f32 0.0078125, %v3638_v14 }
0x189b   : > { %v11280_v28 = vsub.f32 %v3632_v20, %v3644_v56  ;;  %v7081_v20 = vld [vmem:[%s12266_s5 + $0x248] sm:$0xff]  ;;  %8976 = vmatprep.subr.bf16.mxu0 %v8975_v19 }
0x189c   : > { %v11282_v29 = vsub.f32 %v3631_v22, %v3643_v21  ;;  %v7084_v22 = vld [vmem:[%s12266_s5 + $0x260] sm:$0xff]  ;;  %8978 = vmatpush3.bf16.msra.mxu0 %v8975_v19 }
0x189d   : > { %v3652_v38 = vmul.f32 %v11280_v28, %v11280_v28  ;;  %v8931_v16 = vpack.c.bf16 %v7084_v22, %v7081_v20 }
0x189e   : > { %v3651_v3 = vmul.f32 %v11282_v29, %v11282_v29 }
0x189f   : > { %3659 = vadd.xlane.f32.xlu1 %v3652_v38  ;;  %8932 = vmatprep.subr.bf16.mxu1 %v8931_v16 }
0x18a0   : > { %3657 = vadd.xlane.f32.xlu0 %v3651_v3  ;;  %8934 = vmatpush1.bf16.msra.mxu1 %v8933_v40 }
0x18a1   : > { %8936 = vmatprep.subr.bf16.mxu1 %v8935_v36 }
0x18a4   : > { %8938 = vmatpush1.bf16.msra.mxu1 %v8937_v34  ;;  %v12317_v34 = vsub.s32 2, %v10493_v26 }
0x18a5   : > { %8940 = vmatprep.subr.bf16.mxu1 %v8939_v54 }
0x18a8   : > { %8942 = vmatpush1.bf16.msra.mxu1 %v8941_v48 }
0x18a9   : > { %8944 = vmatprep.subr.bf16.mxu1 %v8943_v58 }
0x18ac   : > { %8946 = vmatpush1.bf16.msra.mxu1 %v8945_v17 }
0x1920   : > { %v3656_v56 = vpop.xlane.xlu1 %3655 }
0x1921   : > { %v3662_v14 = vmul.f32 0.0078125, %v3656_v56  ;;  %v3654_v21 = vpop.xlane.xlu0 %3653 }
0x1922   : > { %v3661_v38 = vmul.f32 0.0078125, %v3654_v21 }
0x1923   : > { %v3666_v3 = vadd.f32 1e-05, %v3662_v14 }
0x1924   : > { %v3665_v24 = vadd.f32 1e-05, %v3661_v38 }
0x1925   : > { %9896 = vrsqrt.f32 %v3666_v3 }
0x1926   : > { %9898 = vrsqrt.f32 %v3665_v24 }
0x192c   : > { %v3660_v4 = vpop.xlane.xlu1 %3659 }
0x192d   : > { %v3664_v18 = vmul.f32 0.0078125, %v3660_v4  ;;  %v3658_v23 = vpop.xlane.xlu0 %3657 }
0x192e   : > { %v3663_v37 = vmul.f32 0.0078125, %v3658_v23 }
0x192f   : > { %v9897_v49 = vpop.eup %9896  ;;  %v3668_v5 = vadd.f32 1e-05, %v3664_v18 }
0x1930   : > { %v9899_v20 = vpop.eup %9898  ;;  %v3674_v22 = vmul.f32 %v9897_v49, %v11272_v61  ;;  %v3667_v16 = vadd.f32 1e-05, %v3663_v37 }
0x1931   : > { %v3673_v33 = vmul.f32 %v9899_v20, %v11274_v6  ;;  %9900 = vrsqrt.f32 %v3668_v5 }
0x1932   : > { %9902 = vrsqrt.f32 %v3667_v16  ;;  %v3682_v2 = vmul.f32 %v3680_v25, %v3674_v22 }
0x1933   : > { %v3681_v40 = vmul.f32 %v3680_v25, %v3673_v33 }
0x1934   : > { %v11387_v63 = vadd.f32 %v3688_v42, %v3682_v2 }
0x1935   : > { %v11385_v39 = vadd.f32 %v3688_v42, %v3681_v40 }
0x1937   : > { %3810 = vmatmul.mubr.f32.vlgmr.msra.gmra.mrb[46].mxu1 %v11385_v39  ;;  %8157 = vmatprep.mubr.f32.mxu0 %v11385_v39 }
0x1938   : > { %8158 = vmatmul.mubr.f32.vlgmr.msra.gmra.mrb[46].mxu0 %v11387_v63  ;;  %3815 = vmatprep.mubr.f32.mxu1 %v12316_v11 }
0x193b   : > { %v9901_v61 = vpop.eup %9900  ;;  %3816 = vmatmul.mubr.f32.gmra.mrb[48].mxu1 %v11387_v63 }
0x193c   : > { %v9903_v6 = vpop.eup %9902  ;;  %3821 = vmatprep.mubr.f32.mxu1 %v12316_v11  ;;  %v3676_v51 = vmul.f32 %v9901_v61, %v11280_v28  ;;  %v7054_v28 = vld [vmem:[%s12273_s12 + $0x10] sm:$0xff] }
0x193d   : > { %v3675_v57 = vmul.f32 %v9903_v6, %v11282_v29  ;;  %v3922_v29 = vrot.slane %v7054_v28, %v10496_v27  ;;  %v3938_v43 = vrot.slane %v7054_v28, %v12317_v34  ;;  %v3930_v53 = vrot.slane %v7054_v28, %v10504_v31 }
0x193e   : > { %v3684_v36 = vmul.f32 %v3680_v25, %v3676_v51 }
0x193f   : > { %v3683_v55 = vmul.f32 %v3680_v25, %v3675_v57 }
0x1940   : > { %v11399_v32 = vadd.f32 %v3688_v42, %v3684_v36 }
0x1941   : > { %v11397_v59 = vadd.f32 %v3688_v42, %v3683_v55 }
0x1943   : > { %3822 = vmatmul.mubr.f32.gmra.mrb[50].mxu1 %v11397_v59  ;;  %8160 = vmatprep.mubr.f32.mxu0 %v11397_v59 }
0x1944   : > { %8161 = vmatmul.mubr.f32.gmra.mrb[48].mxu0 %v11399_v32  ;;  %3827 = vmatprep.mubr.f32.mxu1 %v12316_v11 }
0x1947   : > { %3828 = vmatmul.mubr.f32.gmra.mrb[52].mxu1 %v11399_v32 }
0x1a0a   : > { %v3811_v44 = vpop.f32.mrb[46].mxu1 }
0x1a0b   : > { %v11412_v46 = vadd.f32 %v3922_v29, %v3811_v44  ;;  %v3813_v52 = vpop.f32.mrb[47].mxu1  ;;  %v8159_v54 = vpop.f32.mrb[46].mxu0 }
0x1a0c   : > { %v3940_v41 = vadd.f32 %v8159_v54, %v3938_v43  ;;  %v3900_v47 = vpop.f32.mrb[47].mxu0  ;;  %v3931_v9 = vadd.f32 %v3930_v53, %v3813_v52 }
0x1a0d   : > { %v3939_v0 = vadd.f32 %v3938_v43, %v3900_v47  ;;  %8171 = vmatprep.mubr.msk.f32.mxu1 %vm956_vm1, %v11412_v46 }
0x1a0e   : > { %v3817_v48 = vpop.f32.mrb[48].mxu1 }
0x1a0f   : > { %v3819_v10 = vpop.f32.mrb[49].mxu1  ;;  %v8991_v7 = vpack.c.bf16 %v3940_v41, %v3939_v0  ;;  %v11417_v50 = vpack.i.bf16 %v3940_v41, %v3939_v0  ;;  %v11433_v25 = vadd.f32 %v3922_v29, %v3817_v48 }
0x1a10   : > { %v3932_v58 = vadd.f32 %v3930_v53, %v3819_v10 }
0x1a12   : > { %v8979_v15 = vpack.c.bf16 %v3932_v58, %v3931_v9  ;;  %v11419_v60 = vpack.i.bf16 %v3932_v58, %v3931_v9 }
0x1a14   : > { %8981 = vmatprep.subr.msk.bf16.mxu1 %vm10515_vm2, %v8979_v15 }
0x1a15   : > { %8984 = vmatpush3.bf16.xpose.msk.msra.mxu1 %vm10515_vm2, %v8979_v15 }
0x1a16   : > { %v3823_v12 = vpop.f32.mrb[50].mxu1 }
0x1a17   : > { %v3825_v17 = vpop.f32.mrb[51].mxu1  ;;  %v8162_v19 = vpop.f32.mrb[48].mxu0  ;;  %v11435_v49 = vadd.f32 %v3922_v29, %v3823_v12 }
0x1a18   : > { %v3942_v56 = vadd.f32 %v8162_v19, %v3938_v43  ;;  %v3910_v14 = vpop.f32.mrb[49].mxu0  ;;  %v3933_v3 = vadd.f32 %v3930_v53, %v3825_v17 }
0x1a19   : > { %v3941_v21 = vadd.f32 %v3938_v43, %v3910_v14 }
0x1a1a   : > { %v3829_v38 = vpop.f32.mrb[52].mxu1 }
0x1a1b   : > { %v3831_v24 = vpop.f32.mrb[53].mxu1  ;;  %v8995_v35 = vpack.c.bf16 %v3942_v56, %v3941_v21  ;;  %v11425_v4 = vpack.i.bf16 %v3942_v56, %v3941_v21  ;;  %v11441_v5 = vadd.f32 %v3922_v29, %v3829_v38 }
0x1a1c   : > { %v3934_v18 = vadd.f32 %v3930_v53, %v3831_v24 }
0x1a1e   : > { %v8985_v23 = vpack.c.bf16 %v3934_v18, %v3933_v3  ;;  %v11427_v37 = vpack.i.bf16 %v3934_v18, %v3933_v3 }
0x1a20   : > { %8987 = vmatprep.subr.msk.bf16.mxu1 %vm10515_vm2, %v8985_v23 }
0x1a21   : > { %8990 = vmatpush3.bf16.xpose.msk.msra.mxu1 %vm10515_vm2, %v8985_v23 }
0x1a22   : > { %8992 = vmatprep.subr.bf16.mxu1 %v8991_v7 }
0x1a28   : > { %8172 = vmatmul.mubr.msk.f32.vlgmr.msra.gmra.mrb[54].mxu1 %vm956_vm1, %v11433_v25 }
0x1a29   : > { %8174 = vmatprep.mubr.msk.f32.mxu1 %vm956_vm1, %v11435_v49  ;;  %8994 = vmatpush3.bf16.msra.mxu1 %v8991_v7 }
0x1a2a   : > { %8996 = vmatprep.subr.bf16.mxu1 %v8995_v35 }
0x1a2c   : > { %8175 = vmatmul.mubr.msk.f32.gmra.mrb[56].mxu1 %vm956_vm1, %v11441_v5 }
0x1a2d   : > { %8998 = vmatpush3.bf16.msra.mxu1 %v8995_v35 }
0x1afb   : > { %v8173_v20 = vpop.f32.mrb[54].mxu1 }
0x1afc   : > { %v4033_v22 = vpop.f32.mrb[55].mxu1  ;;  %v4055_v16 = vsel %vm1066_vm3, %v8173_v20, -inf }
0x1afd   : > { %4056 = vmax.xlane.f32.xlu1 %v4055_v16  ;;  %v4052_v33 = vsel %vm1066_vm3, %v4033_v22, -inf }
0x1afe   : > { %4053 = vmax.xlane.f32.xlu0 %v4052_v33 }
0x1aff   : > { %v8176_v42 = vpop.f32.mrb[56].mxu1 }
0x1b00   : > { %v4043_v2 = vpop.f32.mrb[57].mxu1  ;;  %v4061_v40 = vsel %vm1066_vm3, %v8176_v42, -inf }
0x1b01   : > { %4062 = vmax.xlane.f32.xlu1 %v4061_v40  ;;  %v4058_v61 = vsel %vm1066_vm3, %v4043_v2, -inf }
0x1b02   : > { %4059 = vmax.xlane.f32.xlu0 %v4058_v61 }
0x1b8a   : > { %v4057_v6 = vpop.xlane.xlu1 %4056 }
0x1b8b   : > { %v4065_v51 = vsub.f32 %v8173_v20, %v4057_v6  ;;  %v4054_v57 = vpop.xlane.xlu0 %4053 }
0x1b8c   : > { %v4064_v36 = vsub.f32 %v4033_v22, %v4054_v57 }
0x1b8d   : > { %v4070_v55 = vmul.f32 1.442695, %v4065_v51 }
0x1b8e   : > { %v4068_v28 = vmul.f32 1.442695, %v4064_v36  ;;  %v4063_v29 = vpop.xlane.xlu1 %4062 }
0x1b8f   : > { %9904 = vpow2.f32 %v4070_v55  ;;  %v4067_v34 = vsub.f32 %v8176_v42, %v4063_v29  ;;  %v4060_v43 = vpop.xlane.xlu0 %4059 }
0x1b90   : > { %9906 = vpow2.f32 %v4068_v28  ;;  %v4066_v44 = vsub.f32 %v4043_v2, %v4060_v43 }
0x1b91   : > { %v4074_v52 = vmul.f32 1.442695, %v4067_v34 }
0x1b92   : > { %v4072_v53 = vmul.f32 1.442695, %v4066_v44 }
0x1b93   : > { %9908 = vpow2.f32 %v4074_v52 }
0x1b94   : > { %9910 = vpow2.f32 %v4072_v53 }
0x1b99   : > { %v9905_v54 = vpop.eup %9904 }
0x1b9a   : > { %v9907_v41 = vpop.eup %9906  ;;  %v4079_v47 = vsel %vm1066_vm3, %v9905_v54, 0.0 }
0x1b9b   : > { %4080 = vadd.xlane.f32.xlu1 %v4079_v47  ;;  %v4076_v0 = vsel %vm1066_vm3, %v9907_v41, 0.0 }
0x1b9c   : > { %4077 = vadd.xlane.f32.xlu0 %v4076_v0 }
0x1b9d   : > { %v9909_v48 = vpop.eup %9908 }
0x1b9e   : > { %v9911_v9 = vpop.eup %9910  ;;  %v4085_v10 = vsel %vm1066_vm3, %v9909_v48, 0.0 }
0x1b9f   : > { %4086 = vadd.xlane.f32.xlu1 %v4085_v10  ;;  %v4082_v7 = vsel %vm1066_vm3, %v9911_v9, 0.0 }
0x1ba0   : > { %4083 = vadd.xlane.f32.xlu0 %v4082_v7 }
0x1bb0   : > { %9548 = vrot.lane.b32.xlu1 %v11427_v37, %s12318_s14 }
0x1bb4   : > { %4193 = vrot.lane.b32.xlu1 %v11412_v46, %s12318_s14 }
0x1bb6   : > { %9543 = vrot.lane.b32.xlu0 %v11419_v60, %s12318_s14 }
0x1bb8   : > { %4195 = vrot.lane.b32.xlu1 %v11433_v25, %s12318_s14 }
0x1bba   : > { %4197 = vrot.lane.b32.xlu0 %v11435_v49, %s12318_s14 }
0x1bbc   : > { %4199 = vrot.lane.b32.xlu1 %v11441_v5, %s12318_s14 }
0x1c28   : > { %v4081_v58 = vpop.xlane.xlu1 %4080 }
0x1c29   : > { %9912 = vrcp.f32 %v4081_v58  ;;  %v4078_v15 = vpop.xlane.xlu0 %4077 }
0x1c2a   : > { %9914 = vrcp.f32 %v4078_v15 }
0x1c2c   : > { %v4087_v12 = vpop.xlane.xlu1 %4086 }
0x1c2d   : > { %9916 = vrcp.f32 %v4087_v12  ;;  %v4084_v17 = vpop.xlane.xlu0 %4083 }
0x1c2e   : > { %9918 = vrcp.f32 %v4084_v17 }
0x1c30   : > { %v9549_v19 = vpop.permute.xlu1 %9548 }
0x1c31   : > { %v9544_v56 = vpop.permute.xlu0 %9543  ;;  %v9551_v24 = vunpack.i.h.bf16 %v9549_v19  ;;  %v9550_v35 = vunpack.i.l.bf16 %v9549_v19 }
0x1c32   : > { %v9546_v14 = vunpack.i.h.bf16 %v9544_v56  ;;  %v9545_v21 = vunpack.i.l.bf16 %v9544_v56 }
0x1c33   : > { %v9913_v38 = vpop.eup %9912  ;;  %v9005_v33 = vpack.c.bf16 %v9551_v24, %v9550_v35 }
0x1c34   : > { %v9915_v3 = vpop.eup %9914  ;;  %v8999_v18 = vpack.c.bf16 %v9546_v14, %v9545_v21  ;;  %v4091_v20 = vmul.f32 %v9913_v38, %v9905_v54  ;;  %v4194_v40 = vpop.permute.xlu1 %4193 }
0x1c35   : > { %v4089_v23 = vmul.f32 %v9915_v3, %v9907_v41  ;;  %v4198_v6 = vpop.permute.xlu0 %4197 }
0x1c36   : > { %9001 = vmatprep.subr.msk.bf16.mxu1 %vm10515_vm2, %v8999_v18 }
0x1c37   : > { %v9917_v22 = vpop.eup %9916  ;;  %8185 = vmatprep.mubr.msk.f32.mxu1 %vm1066_vm3, %v4089_v23 }
0x1c38   : > { %v9919_v16 = vpop.eup %9918  ;;  %8186 = vmatmul.mubr.msk.f32.vlgmr.msra.gmra.mrb[58].mxu1 %vm1066_vm3, %v4091_v20  ;;  %v4095_v2 = vmul.f32 %v9917_v22, %v9909_v48  ;;  %v4196_v61 = vpop.permute.xlu1 %4195 }
0x1c39   : > { %9004 = vmatpush3.bf16.xpose.msk.msra.mxu1 %vm10515_vm2, %v8999_v18  ;;  %v4093_v42 = vmul.f32 %v9919_v16, %v9911_v9 }
0x1c3a   : > { %9007 = vmatprep.subr.msk.bf16.mxu1 %vm10515_vm2, %v9005_v33 }
0x1c3b   : > { %8188 = vmatprep.mubr.msk.f32.mxu1 %vm1066_vm3, %v4093_v42 }
0x1c3c   : > { %8189 = vmatmul.mubr.msk.f32.gmra.mrb[60].mxu1 %vm1066_vm3, %v4095_v2  ;;  %v4200_v51 = vpop.permute.xlu1 %4199 }
0x1c3d   : > { %8199 = vmatprep.mubr.msk.f32.mxu1 %vm956_vm1, %v4194_v40 }
0x1c41   : > { %9010 = vmatpush3.bf16.xpose.msk.msra.mxu1 %vm10515_vm2, %v9005_v33 }
0x1c48   : > { %8200 = vmatmul.mubr.msk.f32.vlgmr.msra.gmra.mrb[62].mxu1 %vm956_vm1, %v4196_v61 }
0x1c49   : > { %8202 = vmatprep.mubr.msk.f32.mxu1 %vm956_vm1, %v4198_v6 }
0x1c4c   : > { %8203 = vmatmul.mubr.msk.f32.gmra.mrb[64].mxu1 %vm956_vm1, %v4200_v51 }
0x1d0b   : > { %v11481_v57 = vpop.f32.mrb[58].mxu1 }
0x1d0c   : > { %v11483_v36 = vpop.f32.mrb[59].mxu1 }
0x1d0f   : > { %v11485_v55 = vpop.f32.mrb[60].mxu1 }
0x1d10   : > { %v11487_v28 = vpop.f32.mrb[61].mxu1 }
0x1d1b   : > { %v8201_v29 = vpop.f32.mrb[62].mxu1 }
0x1d1c   : > { %v4291_v34 = vpop.f32.mrb[63].mxu1  ;;  %v4313_v43 = vsel %vm1066_vm3, %v8201_v29, -inf }
0x1d1d   : > { %4314 = vmax.xlane.f32.xlu1 %v4313_v43  ;;  %v4310_v44 = vsel %vm1066_vm3, %v4291_v34, -inf }
0x1d1e   : > { %4311 = vmax.xlane.f32.xlu0 %v4310_v44 }
0x1d1f   : > { %v8204_v52 = vpop.f32.mrb[64].mxu1 }
0x1d20   : > { %v4301_v53 = vpop.f32.mrb[65].mxu1  ;;  %v4319_v41 = vsel %vm1066_vm3, %v8204_v52, -inf }
0x1d21   : > { %v4316_v54 = vsel %vm1066_vm3, %v4301_v53, -inf }
0x1d22   : > { %4317 = vmax.xlane.f32.xlu0 %v4316_v54 }
0x1d26   : > { %4320 = vmax.xlane.f32.xlu0 %v4319_v41 }
0x1daa   : > { %v4315_v47 = vpop.xlane.xlu1 %4314 }
0x1dab   : > { %v4323_v0 = vsub.f32 %v8201_v29, %v4315_v47  ;;  %v4312_v48 = vpop.xlane.xlu0 %4311 }
0x1dac   : > { %v4322_v9 = vsub.f32 %v4291_v34, %v4312_v48 }
0x1dad   : > { %v4328_v10 = vmul.f32 1.442695, %v4323_v0 }
0x1dae   : > { %v4326_v7 = vmul.f32 1.442695, %v4322_v9 }
0x1daf   : > { %9920 = vpow2.f32 %v4328_v10  ;;  %v4318_v19 = vpop.xlane.xlu0 %4317 }
0x1db0   : > { %9922 = vpow2.f32 %v4326_v7  ;;  %v4324_v56 = vsub.f32 %v4301_v53, %v4318_v19 }
0x1db2   : > { %v4330_v14 = vmul.f32 1.442695, %v4324_v56 }
0x1db3   : > { %v4321_v21 = vpop.xlane.xlu0 %4320 }
0x1db4   : > { %v4325_v38 = vsub.f32 %v8204_v52, %v4321_v21  ;;  %9924 = vpow2.f32 %v4330_v14 }
0x1db6   : > { %v4332_v3 = vmul.f32 1.442695, %v4325_v38 }
0x1db8   : > { %9926 = vpow2.f32 %v4332_v3 }
0x1db9   : > { %v9921_v58 = vpop.eup %9920 }
0x1dba   : > { %v9923_v15 = vpop.eup %9922  ;;  %v4337_v12 = vsel %vm1066_vm3, %v9921_v58, 0.0 }
0x1dbb   : > { %4338 = vadd.xlane.f32.xlu1 %v4337_v12  ;;  %v4334_v17 = vsel %vm1066_vm3, %v9923_v15, 0.0 }
0x1dbc   : > { %4335 = vadd.xlane.f32.xlu0 %v4334_v17 }
0x1dbe   : > { %v9925_v24 = vpop.eup %9924 }
0x1dbf   : > { %v4340_v35 = vsel %vm1066_vm3, %v9925_v24, 0.0 }
0x1dc2   : > { %v9927_v18 = vpop.eup %9926 }
0x1dc3   : > { %v4343_v23 = vsel %vm1066_vm3, %v9927_v18, 0.0 }
0x1dcc   : > { %9558 = vrot.lane.b32.xlu1 %v11425_v4, %s12318_s14 }
0x1dd0   : > { %9563 = vrot.lane.b32.xlu1 %v11419_v60, %s12314_s15 }
0x1dd2   : > { %9553 = vrot.lane.b32.xlu0 %v11417_v50, %s12318_s14 }
0x1dd4   : > { %9568 = vrot.lane.b32.xlu1 %v11427_v37, %s12314_s15 }
0x1df1   : > { %4341 = vadd.xlane.f32.xlu0 %v4340_v35 }
0x1df8   : > { %4344 = vadd.xlane.f32.xlu1 %v4343_v23 }
0x1e07   : > { %4467 = vrot.lane.b32.xlu0 %v11412_v46, %s12314_s15 }
0x1e09   : > { %4469 = vrot.lane.b32.xlu1 %v11433_v25, %s12314_s15 }
0x1e0b   : > { %4471 = vrot.lane.b32.xlu0 %v11435_v49, %s12314_s15 }
0x1e0d   : > { %4473 = vrot.lane.b32.xlu1 %v11441_v5, %s12314_s15 }
0x1e48   : > { %v4339_v20 = vpop.xlane.xlu1 %4338 }
0x1e49   : > { %v4336_v22 = vpop.xlane.xlu0 %4335 }
0x1e4a   : > { %9928 = vrcp.f32 %v4336_v22 }
0x1e4b   : > { %9930 = vrcp.f32 %v4339_v20 }
0x1e4c   : > { %v9559_v16 = vpop.permute.xlu1 %9558 }
0x1e4d   : > { %v9554_v33 = vpop.permute.xlu0 %9553  ;;  %v9561_v42 = vunpack.i.h.bf16 %v9559_v16  ;;  %v9560_v2 = vunpack.i.l.bf16 %v9559_v16 }
0x1e4e   : > { %v9556_v40 = vunpack.i.h.bf16 %v9554_v33  ;;  %v9555_v61 = vunpack.i.l.bf16 %v9554_v33 }
0x1e4f   : > { %v9015_v43 = vpack.c.bf16 %v9561_v42, %v9560_v2 }
0x1e50   : > { %v9564_v6 = vpop.permute.xlu1 %9563  ;;  %v9011_v51 = vpack.c.bf16 %v9556_v40, %v9555_v61 }
0x1e51   : > { %v9566_v29 = vunpack.i.h.bf16 %v9564_v6  ;;  %v9565_v34 = vunpack.i.l.bf16 %v9564_v6 }
0x1e52   : > { %9012 = vmatprep.subr.bf16.mxu0 %v9011_v51 }
0x1e53   : > { %9014 = vmatpush3.bf16.msra.mxu0 %v9011_v51  ;;  %v9019_v54 = vpack.c.bf16 %v9566_v29, %v9565_v34 }
0x1e54   : > { %v9929_v44 = vpop.eup %9928  ;;  %9016 = vmatprep.subr.bf16.mxu0 %v9015_v43  ;;  %v9569_v47 = vpop.permute.xlu1 %9568 }
0x1e55   : > { %v9931_v52 = vpop.eup %9930  ;;  %v4347_v53 = vmul.f32 %v9929_v44, %v9923_v15  ;;  %v9571_v0 = vunpack.i.h.bf16 %v9569_v47  ;;  %v9570_v48 = vunpack.i.l.bf16 %v9569_v47 }
0x1e56   : > { %v4349_v41 = vmul.f32 %v9931_v52, %v9921_v58 }
0x1e57   : > { %9018 = vmatpush3.bf16.msra.mxu0 %v9015_v43  ;;  %8213 = vmatprep.mubr.msk.f32.mxu0 %vm1066_vm3, %v4347_v53  ;;  %v9025_v9 = vpack.c.bf16 %v9571_v0, %v9570_v48 }
0x1e58   : > { %9021 = vmatprep.subr.msk.bf16.mxu0 %vm10515_vm2, %v9019_v54 }
0x1e5a   : > { %8214 = vmatmul.mubr.msk.f32.vlgmr.msra.gmra.mrb[50].mxu0 %vm1066_vm3, %v4349_v41 }
0x1e60   : > { %9024 = vmatpush3.bf16.xpose.msk.msra.mxu0 %vm10515_vm2, %v9019_v54 }
0x1e61   : > { %9027 = vmatprep.subr.msk.bf16.mxu0 %vm10515_vm2, %v9025_v9 }
0x1e68   : > { %9030 = vmatpush3.bf16.xpose.msk.msra.mxu0 %vm10515_vm2, %v9025_v9 }
0x1e7e   : > { %v4342_v10 = vpop.xlane.xlu0 %4341 }
0x1e7f   : > { %9932 = vrcp.f32 %v4342_v10 }
0x1e82   : > { %v4468_v17 = vpop.permute.xlu0 %4467 }
0x1e85   : > { %v4345_v7 = vpop.xlane.xlu1 %4344 }
0x1e86   : > { %9934 = vrcp.f32 %v4345_v7  ;;  %v4472_v14 = vpop.permute.xlu0 %4471 }
0x1e89   : > { %v9933_v58 = vpop.eup %9932  ;;  %v4470_v56 = vpop.permute.xlu1 %4469 }
0x1e8a   : > { %v4351_v15 = vmul.f32 %v9933_v58, %v9925_v24 }
0x1e8c   : > { %8216 = vmatprep.mubr.msk.f32.mxu0 %vm1066_vm3, %v4351_v15 }
0x1e8d   : > { %v4474_v21 = vpop.permute.xlu1 %4473 }
0x1e90   : > { %v9935_v12 = vpop.eup %9934 }
0x1e91   : > { %v4353_v19 = vmul.f32 %v9935_v12, %v9927_v18 }
0x1e93   : > { %8217 = vmatmul.mubr.msk.f32.gmra.mrb[52].mxu0 %vm1066_vm3, %v4353_v19 }
0x1e94   : > { %8227 = vmatprep.mubr.msk.f32.mxu0 %vm956_vm1, %v4468_v17 }
0x1e97   : > { %8228 = vmatmul.mubr.msk.f32.vlgmr.msra.gmra.mrb[54].mxu0 %vm956_vm1, %v4470_v56 }
0x1e98   : > { %8230 = vmatprep.mubr.msk.f32.mxu0 %vm956_vm1, %v4472_v14 }
0x1e9b   : > { %8231 = vmatmul.mubr.msk.f32.gmra.mrb[56].mxu0 %vm956_vm1, %v4474_v21 }
0x1f2d   : > { %v11529_v38 = vpop.f32.mrb[50].mxu0 }
0x1f2e   : > { %v11531_v3 = vpop.f32.mrb[51].mxu0 }
0x1f2f   : > { %v9682_v24 = vpack.i.bf16 %v11529_v38, %v11531_v3 }
0x1f66   : > { %v11535_v35 = vpop.f32.mrb[52].mxu0 }
0x1f67   : > { %v11537_v18 = vpop.f32.mrb[53].mxu0 }
0x1f68   : > { %v9702_v23 = vpack.i.bf16 %v11535_v35, %v11537_v18 }
0x1f6a   : > { %v8229_v20 = vpop.f32.mrb[54].mxu0 }
0x1f6b   : > { %v4565_v22 = vpop.f32.mrb[55].mxu0  ;;  %v4587_v16 = vsel %vm1066_vm3, %v8229_v20, -inf }
0x1f6c   : > { %4588 = vmax.xlane.f32.xlu1 %v4587_v16  ;;  %v4584_v33 = vsel %vm1066_vm3, %v4565_v22, -inf }
0x1f6d   : > { %4585 = vmax.xlane.f32.xlu0 %v4584_v33 }
0x1f6e   : > { %v8232_v42 = vpop.f32.mrb[56].mxu0 }
0x1f6f   : > { %v4575_v2 = vpop.f32.mrb[57].mxu0  ;;  %v4593_v61 = vsel %vm1066_vm3, %v8232_v42, -inf }
0x1f70   : > { %v4590_v40 = vsel %vm1066_vm3, %v4575_v2, -inf }
0x1f71   : > { %4591 = vmax.xlane.f32.xlu0 %v4590_v40 }
0x1f75   : > { %4594 = vmax.xlane.f32.xlu0 %v4593_v61 }
0x1ff9   : > { %v4589_v6 = vpop.xlane.xlu1 %4588 }
0x1ffa   : > { %v4597_v51 = vsub.f32 %v8229_v20, %v4589_v6  ;;  %v4586_v29 = vpop.xlane.xlu0 %4585 }
0x1ffb   : > { %v4596_v34 = vsub.f32 %v4565_v22, %v4586_v29 }
0x1ffc   : > { %v4602_v43 = vmul.f32 1.442695, %v4597_v51 }
0x1ffd   : > { %v4600_v44 = vmul.f32 1.442695, %v4596_v34 }
0x1ffe   : > { %9936 = vpow2.f32 %v4602_v43  ;;  %v4592_v47 = vpop.xlane.xlu0 %4591 }
0x1fff   : > { %9938 = vpow2.f32 %v4600_v44  ;;  %v4598_v0 = vsub.f32 %v4575_v2, %v4592_v47 }
0x2001   : > { %v4604_v48 = vmul.f32 1.442695, %v4598_v0 }
0x2002   : > { %v4595_v9 = vpop.xlane.xlu0 %4594 }
0x2003   : > { %v4599_v10 = vsub.f32 %v8232_v42, %v4595_v9  ;;  %9940 = vpow2.f32 %v4604_v48 }
0x2005   : > { %v4606_v7 = vmul.f32 1.442695, %v4599_v10 }
0x2007   : > { %9942 = vpow2.f32 %v4606_v7 }
0x2008   : > { %v9937_v52 = vpop.eup %9936 }
0x2009   : > { %v9939_v53 = vpop.eup %9938  ;;  %v4611_v54 = vsel %vm1066_vm3, %v9937_v52, 0.0 }
0x200a   : > { %4612 = vadd.xlane.f32.xlu1 %v4611_v54  ;;  %v4608_v41 = vsel %vm1066_vm3, %v9939_v53, 0.0 }
0x200b   : > { %4609 = vadd.xlane.f32.xlu0 %v4608_v41 }
0x200d   : > { %v9941_v58 = vpop.eup %9940 }
0x200e   : > { %v4614_v15 = vsel %vm1066_vm3, %v9941_v58, 0.0 }
0x2011   : > { %v9943_v12 = vpop.eup %9942 }
0x2012   : > { %v4617_v17 = vsel %vm1066_vm3, %v9943_v12, 0.0 }
0x201b   : > { %9578 = vrot.lane.b32.xlu1 %v11425_v4, %s12314_s15 }
0x201f   : > { %9583 = vrot.lane.b32.xlu1 %v11419_v60, %s12319_s16 }
0x2021   : > { %9573 = vrot.lane.b32.xlu0 %v11417_v50, %s12314_s15 }
0x2023   : > { %9588 = vrot.lane.b32.xlu1 %v11427_v37, %s12319_s16 }
0x2040   : > { %4615 = vadd.xlane.f32.xlu0 %v4614_v15 }
0x2047   : > { %4618 = vadd.xlane.f32.xlu1 %v4617_v17 }
0x2056   : > { %4737 = vrot.lane.b32.xlu0 %v11412_v46, %s12319_s16 }
0x2058   : > { %4739 = vrot.lane.b32.xlu1 %v11433_v25, %s12319_s16 }
0x205a   : > { %4741 = vrot.lane.b32.xlu0 %v11435_v49, %s12319_s16 }
0x205c   : > { %4743 = vrot.lane.b32.xlu1 %v11441_v5, %s12319_s16 }
0x2097   : > { %v4613_v19 = vpop.xlane.xlu1 %4612 }
0x2098   : > { %v4610_v56 = vpop.xlane.xlu0 %4609 }
0x2099   : > { %9944 = vrcp.f32 %v4610_v56 }
0x209a   : > { %9946 = vrcp.f32 %v4613_v19 }
0x209b   : > { %v9579_v14 = vpop.permute.xlu1 %9578 }
0x209c   : > { %v9574_v21 = vpop.permute.xlu0 %9573  ;;  %v9581_v20 = vunpack.i.h.bf16 %v9579_v14  ;;  %v9580_v22 = vunpack.i.l.bf16 %v9579_v14 }
0x209d   : > { %v9576_v16 = vunpack.i.h.bf16 %v9574_v21  ;;  %v9575_v33 = vunpack.i.l.bf16 %v9574_v21 }
0x209e   : > { %v9035_v6 = vpack.c.bf16 %v9581_v20, %v9580_v22 }
0x209f   : > { %v9584_v42 = vpop.permute.xlu1 %9583  ;;  %v9031_v2 = vpack.c.bf16 %v9576_v16, %v9575_v33 }
0x20a0   : > { %v9586_v40 = vunpack.i.h.bf16 %v9584_v42  ;;  %v9585_v61 = vunpack.i.l.bf16 %v9584_v42 }
0x20a1   : > { %9032 = vmatprep.subr.bf16.mxu1 %v9031_v2 }
0x20a2   : > { %9034 = vmatpush3.bf16.msra.mxu1 %v9031_v2  ;;  %v9039_v43 = vpack.c.bf16 %v9586_v40, %v9585_v61 }
0x20a3   : > { %v9945_v51 = vpop.eup %9944  ;;  %9036 = vmatprep.subr.bf16.mxu1 %v9035_v6  ;;  %v9589_v54 = vpop.permute.xlu1 %9588 }
0x20a4   : > { %v9947_v29 = vpop.eup %9946  ;;  %v4621_v34 = vmul.f32 %v9945_v51, %v9939_v53  ;;  %v9591_v41 = vunpack.i.h.bf16 %v9589_v54  ;;  %v9590_v47 = vunpack.i.l.bf16 %v9589_v54 }
0x20a5   : > { %v4623_v44 = vmul.f32 %v9947_v29, %v9937_v52 }
0x20a6   : > { %9038 = vmatpush3.bf16.msra.mxu1 %v9035_v6  ;;  %8241 = vmatprep.mubr.msk.f32.mxu1 %vm1066_vm3, %v4621_v34  ;;  %v9045_v0 = vpack.c.bf16 %v9591_v41, %v9590_v47 }
0x20a7   : > { %9041 = vmatprep.subr.msk.bf16.mxu1 %vm10515_vm2, %v9039_v43 }
0x20a9   : > { %8242 = vmatmul.mubr.msk.f32.vlgmr.msra.gmra.mrb[66].mxu1 %vm1066_vm3, %v4623_v44 }
0x20af   : > { %9044 = vmatpush3.bf16.xpose.msk.msra.mxu1 %vm10515_vm2, %v9039_v43 }
0x20b0   : > { %9047 = vmatprep.subr.msk.bf16.mxu1 %vm10515_vm2, %v9045_v0 }
0x20b7   : > { %9050 = vmatpush3.bf16.xpose.msk.msra.mxu1 %vm10515_vm2, %v9045_v0 }
0x20cd   : > { %v4616_v53 = vpop.xlane.xlu0 %4615 }
0x20ce   : > { %9948 = vrcp.f32 %v4616_v53 }
0x20d1   : > { %v4738_v7 = vpop.permute.xlu0 %4737 }
0x20d4   : > { %v4619_v52 = vpop.xlane.xlu1 %4618 }
0x20d5   : > { %9950 = vrcp.f32 %v4619_v52  ;;  %v4742_v19 = vpop.permute.xlu0 %4741 }
0x20d8   : > { %v9949_v48 = vpop.eup %9948  ;;  %v4740_v17 = vpop.permute.xlu1 %4739 }
0x20d9   : > { %v4625_v9 = vmul.f32 %v9949_v48, %v9941_v58 }
0x20db   : > { %8244 = vmatprep.mubr.msk.f32.mxu1 %vm1066_vm3, %v4625_v9 }
0x20dc   : > { %v4744_v56 = vpop.permute.xlu1 %4743 }
0x20df   : > { %v9951_v10 = vpop.eup %9950 }
0x20e0   : > { %v4627_v15 = vmul.f32 %v9951_v10, %v9943_v12 }
0x20e2   : > { %8245 = vmatmul.mubr.msk.f32.gmra.mrb[68].mxu1 %vm1066_vm3, %v4627_v15 }
0x20e3   : > { %8255 = vmatprep.mubr.msk.f32.mxu1 %vm956_vm1, %v4738_v7 }
0x20e6   : > { %8256 = vmatmul.mubr.msk.f32.vlgmr.msra.gmra.mrb[70].mxu1 %vm956_vm1, %v4740_v17 }
0x20e7   : > { %8258 = vmatprep.mubr.msk.f32.mxu1 %vm956_vm1, %v4742_v19 }
0x20ea   : > { %8259 = vmatmul.mubr.msk.f32.gmra.mrb[72].mxu1 %vm956_vm1, %v4744_v56 }
0x217c   : > { %v11581_v14 = vpop.f32.mrb[66].mxu1 }
0x217d   : > { %v11583_v58 = vpop.f32.mrb[67].mxu1 }
0x217e   : > { %v9687_v12 = vpack.i.bf16 %v11581_v14, %v11583_v58 }
0x21b5   : > { %v11587_v21 = vpop.f32.mrb[68].mxu1 }
0x21b6   : > { %v11589_v20 = vpop.f32.mrb[69].mxu1 }
0x21b7   : > { %v9712_v22 = vpack.i.bf16 %v11587_v21, %v11589_v20 }
0x21b9   : > { %v8257_v16 = vpop.f32.mrb[70].mxu1 }
0x21ba   : > { %v4835_v33 = vpop.f32.mrb[71].mxu1  ;;  %v4857_v42 = vsel %vm1066_vm3, %v8257_v16, -inf }
0x21bb   : > { %4858 = vmax.xlane.f32.xlu1 %v4857_v42  ;;  %v4854_v2 = vsel %vm1066_vm3, %v4835_v33, -inf }
0x21bc   : > { %4855 = vmax.xlane.f32.xlu0 %v4854_v2 }
0x21bd   : > { %v8260_v40 = vpop.f32.mrb[72].mxu1 }
0x21be   : > { %v4845_v61 = vpop.f32.mrb[73].mxu1  ;;  %v4863_v51 = vsel %vm1066_vm3, %v8260_v40, -inf }
0x21bf   : > { %v4860_v6 = vsel %vm1066_vm3, %v4845_v61, -inf }
0x21c0   : > { %4861 = vmax.xlane.f32.xlu0 %v4860_v6 }
0x21c4   : > { %4864 = vmax.xlane.f32.xlu0 %v4863_v51 }
0x2248   : > { %v4859_v29 = vpop.xlane.xlu1 %4858 }
0x2249   : > { %v4867_v34 = vsub.f32 %v8257_v16, %v4859_v29  ;;  %v4856_v43 = vpop.xlane.xlu0 %4855 }
0x224a   : > { %v4866_v44 = vsub.f32 %v4835_v33, %v4856_v43 }
0x224b   : > { %v4872_v54 = vmul.f32 1.442695, %v4867_v34 }
0x224c   : > { %v4870_v41 = vmul.f32 1.442695, %v4866_v44 }
0x224d   : > { %9952 = vpow2.f32 %v4872_v54  ;;  %v4862_v48 = vpop.xlane.xlu0 %4861 }
0x224e   : > { %9954 = vpow2.f32 %v4870_v41  ;;  %v4868_v9 = vsub.f32 %v4845_v61, %v4862_v48 }
0x2250   : > { %v4874_v10 = vmul.f32 1.442695, %v4868_v9 }
0x2251   : > { %v4865_v7 = vpop.xlane.xlu0 %4864 }
0x2252   : > { %v4869_v15 = vsub.f32 %v8260_v40, %v4865_v7  ;;  %9956 = vpow2.f32 %v4874_v10 }
0x2254   : > { %v4876_v17 = vmul.f32 1.442695, %v4869_v15 }
0x2256   : > { %9958 = vpow2.f32 %v4876_v17 }
0x2257   : > { %v9953_v47 = vpop.eup %9952 }
0x2258   : > { %v9955_v0 = vpop.eup %9954  ;;  %v4881_v53 = vsel %vm1066_vm3, %v9953_v47, 0.0 }
0x2259   : > { %4882 = vadd.xlane.f32.xlu1 %v4881_v53  ;;  %v4878_v52 = vsel %vm1066_vm3, %v9955_v0, 0.0 }
0x225a   : > { %4879 = vadd.xlane.f32.xlu0 %v4878_v52 }
0x225c   : > { %v9957_v19 = vpop.eup %9956 }
0x225d   : > { %v4884_v56 = vsel %vm1066_vm3, %v9957_v19, 0.0 }
0x2260   : > { %v9959_v16 = vpop.eup %9958 }
0x2261   : > { %v4887_v33 = vsel %vm1066_vm3, %v9959_v16, 0.0 }
0x226a   : > { %9598 = vrot.lane.b32.xlu1 %v11425_v4, %s12319_s16 }
0x226e   : > { %9603 = vrot.lane.b32.xlu1 %v11419_v60, %s12312_s30 }
0x2270   : > { %9593 = vrot.lane.b32.xlu0 %v11417_v50, %s12319_s16 }
0x2272   : > { %9608 = vrot.lane.b32.xlu1 %v11427_v37, %s12312_s30 }
0x228f   : > { %4885 = vadd.xlane.f32.xlu0 %v4884_v56 }
0x2296   : > { %4888 = vadd.xlane.f32.xlu1 %v4887_v33 }
0x22a5   : > { %5007 = vrot.lane.b32.xlu0 %v11412_v46, %s12312_s30 }
0x22a7   : > { %5009 = vrot.lane.b32.xlu1 %v11433_v25, %s12312_s30 }
0x22a9   : > { %5011 = vrot.lane.b32.xlu0 %v11435_v49, %s12312_s30 }
0x22ab   : > { %5013 = vrot.lane.b32.xlu1 %v11441_v5, %s12312_s30 }
0x22e6   : > { %v4883_v42 = vpop.xlane.xlu1 %4882 }
0x22e7   : > { %v4880_v2 = vpop.xlane.xlu0 %4879 }
0x22e8   : > { %9960 = vrcp.f32 %v4880_v2 }
0x22e9   : > { %9962 = vrcp.f32 %v4883_v42 }
0x22ea   : > { %v9599_v40 = vpop.permute.xlu1 %9598 }
0x22eb   : > { %v9594_v61 = vpop.permute.xlu0 %9593  ;;  %v9601_v6 = vunpack.i.h.bf16 %v9599_v40  ;;  %v9600_v51 = vunpack.i.l.bf16 %v9599_v40 }
0x22ec   : > { %v9596_v29 = vunpack.i.h.bf16 %v9594_v61  ;;  %v9595_v34 = vunpack.i.l.bf16 %v9594_v61 }
0x22ed   : > { %v9055_v54 = vpack.c.bf16 %v9601_v6, %v9600_v51 }
0x22ee   : > { %v9051_v43 = vpack.c.bf16 %v9596_v29, %v9595_v34  ;;  %v9604_v44 = vpop.permute.xlu1 %9603 }
0x22ef   : > { %v9606_v41 = vunpack.i.h.bf16 %v9604_v44  ;;  %v9605_v53 = vunpack.i.l.bf16 %v9604_v44 }
0x22f0   : > { %9052 = vmatprep.subr.bf16.mxu0 %v9051_v43 }
0x22f1   : > { %9054 = vmatpush3.bf16.msra.mxu0 %v9051_v43  ;;  %v9059_v10 = vpack.c.bf16 %v9606_v41, %v9605_v53 }
0x22f2   : > { %v9961_v52 = vpop.eup %9960  ;;  %9056 = vmatprep.subr.bf16.mxu0 %v9055_v54  ;;  %v9609_v15 = vpop.permute.xlu1 %9608 }
0x22f3   : > { %v9963_v48 = vpop.eup %9962  ;;  %v4891_v9 = vmul.f32 %v9961_v52, %v9955_v0  ;;  %v9611_v17 = vunpack.i.h.bf16 %v9609_v15  ;;  %v9610_v56 = vunpack.i.l.bf16 %v9609_v15 }
0x22f4   : > { %v4893_v7 = vmul.f32 %v9963_v48, %v9953_v47 }
0x22f5   : > { %9058 = vmatpush3.bf16.msra.mxu0 %v9055_v54  ;;  %8269 = vmatprep.mubr.msk.f32.mxu0 %vm1066_vm3, %v4891_v9  ;;  %v9065_v33 = vpack.c.bf16 %v9611_v17, %v9610_v56 }
0x22f6   : > { %9061 = vmatprep.subr.msk.bf16.mxu0 %vm10515_vm2, %v9059_v10 }
0x22f8   : > { %8270 = vmatmul.mubr.msk.f32.vlgmr.msra.gmra.mrb[58].mxu0 %vm1066_vm3, %v4893_v7 }
0x22fe   : > { %9064 = vmatpush3.bf16.xpose.msk.msra.mxu0 %vm10515_vm2, %v9059_v10 }
0x22ff   : > { %9067 = vmatprep.subr.msk.bf16.mxu0 %vm10515_vm2, %v9065_v33 }
0x2306   : > { %9070 = vmatpush3.bf16.xpose.msk.msra.mxu0 %vm10515_vm2, %v9065_v33 }
0x231c   : > { %v4886_v0 = vpop.xlane.xlu0 %4885 }
0x231d   : > { %9964 = vrcp.f32 %v4886_v0 }
0x2320   : > { %v5008_v61 = vpop.permute.xlu0 %5007 }
0x2323   : > { %v4889_v47 = vpop.xlane.xlu1 %4888 }
0x2324   : > { %9966 = vrcp.f32 %v4889_v47  ;;  %v5012_v29 = vpop.permute.xlu0 %5011 }
0x2327   : > { %v9965_v42 = vpop.eup %9964  ;;  %v5010_v51 = vpop.permute.xlu1 %5009 }
0x2328   : > { %v4895_v2 = vmul.f32 %v9965_v42, %v9957_v19 }
0x232a   : > { %8272 = vmatprep.mubr.msk.f32.mxu0 %vm1066_vm3, %v4895_v2 }
0x232b   : > { %v5014_v34 = vpop.permute.xlu1 %5013 }
0x232e   : > { %v9967_v40 = vpop.eup %9966 }
0x232f   : > { %v4897_v6 = vmul.f32 %v9967_v40, %v9959_v16 }
0x2331   : > { %8273 = vmatmul.mubr.msk.f32.gmra.mrb[60].mxu0 %vm1066_vm3, %v4897_v6 }
0x2332   : > { %8283 = vmatprep.mubr.msk.f32.mxu0 %vm956_vm1, %v5008_v61 }
0x2335   : > { %8284 = vmatmul.mubr.msk.f32.vlgmr.msra.gmra.mrb[62].mxu0 %vm956_vm1, %v5010_v51 }
0x2336   : > { %8286 = vmatprep.mubr.msk.f32.mxu0 %vm956_vm1, %v5012_v29 }
0x2339   : > { %8287 = vmatmul.mubr.msk.f32.gmra.mrb[64].mxu0 %vm956_vm1, %v5014_v34 }
0x23cb   : > { %v11633_v43 = vpop.f32.mrb[58].mxu0 }
0x23cc   : > { %v11635_v19 = vpop.f32.mrb[59].mxu0 }
0x23cd   : > { %v9692_v16 = vpack.i.bf16 %v11633_v43, %v11635_v19 }
0x2404   : > { %v11639_v44 = vpop.f32.mrb[60].mxu0 }
0x2405   : > { %v11641_v54 = vpop.f32.mrb[61].mxu0 }
0x2408   : > { %v8285_v53 = vpop.f32.mrb[62].mxu0 }
0x2409   : > { %v5105_v52 = vpop.f32.mrb[63].mxu0  ;;  %v5127_v48 = vsel %vm1066_vm3, %v8285_v53, -inf }
0x240a   : > { %5128 = vmax.xlane.f32.xlu1 %v5127_v48  ;;  %v5124_v9 = vsel %vm1066_vm3, %v5105_v52, -inf }
0x240b   : > { %5125 = vmax.xlane.f32.xlu0 %v5124_v9 }
0x240c   : > { %v8288_v10 = vpop.f32.mrb[64].mxu0 }
0x240d   : > { %v5115_v7 = vpop.f32.mrb[65].mxu0  ;;  %v5133_v17 = vsel %vm1066_vm3, %v8288_v10, -inf }
0x240e   : > { %v5130_v15 = vsel %vm1066_vm3, %v5115_v7, -inf }
0x240f   : > { %5131 = vmax.xlane.f32.xlu0 %v5130_v15 }
0x2413   : > { %5134 = vmax.xlane.f32.xlu0 %v5133_v17 }
0x2497   : > { %v5129_v56 = vpop.xlane.xlu1 %5128 }
0x2498   : > { %v5137_v33 = vsub.f32 %v8285_v53, %v5129_v56  ;;  %v5126_v0 = vpop.xlane.xlu0 %5125 }
0x2499   : > { %v5136_v47 = vsub.f32 %v5105_v52, %v5126_v0 }
0x249a   : > { %v5142_v42 = vmul.f32 1.442695, %v5137_v33 }
0x249b   : > { %v5140_v2 = vmul.f32 1.442695, %v5136_v47 }
0x249c   : > { %9968 = vpow2.f32 %v5142_v42  ;;  %v5132_v29 = vpop.xlane.xlu0 %5131 }
0x249d   : > { %9970 = vpow2.f32 %v5140_v2  ;;  %v5138_v34 = vsub.f32 %v5115_v7, %v5132_v29 }
0x249f   : > { %v5144_v53 = vmul.f32 1.442695, %v5138_v34 }
0x24a0   : > { %v5135_v52 = vpop.xlane.xlu0 %5134 }
0x24a1   : > { %v5139_v48 = vsub.f32 %v8288_v10, %v5135_v52  ;;  %9972 = vpow2.f32 %v5144_v53 }
0x24a3   : > { %v5146_v9 = vmul.f32 1.442695, %v5139_v48 }
0x24a5   : > { %9974 = vpow2.f32 %v5146_v9 }
0x24a6   : > { %v9969_v40 = vpop.eup %9968 }
0x24a7   : > { %v9971_v61 = vpop.eup %9970  ;;  %v5151_v6 = vsel %vm1066_vm3, %v9969_v40, 0.0 }
0x24a8   : > { %5152 = vadd.xlane.f32.xlu1 %v5151_v6  ;;  %v5148_v51 = vsel %vm1066_vm3, %v9971_v61, 0.0 }
0x24a9   : > { %5149 = vadd.xlane.f32.xlu0 %v5148_v51 }
0x24ab   : > { %v9973_v15 = vpop.eup %9972 }
0x24ac   : > { %v5154_v17 = vsel %vm1066_vm3, %v9973_v15, 0.0 }
0x24af   : > { %v9975_v56 = vpop.eup %9974 }
0x24b0   : > { %v5157_v33 = vsel %vm1066_vm3, %v9975_v56, 0.0 }
0x24b9   : > { %9618 = vrot.lane.b32.xlu1 %v11425_v4, %s12312_s30 }
0x24bd   : > { %9623 = vrot.lane.b32.xlu1 %v11419_v60, %s12320_s17 }
0x24bf   : > { %9613 = vrot.lane.b32.xlu0 %v11417_v50, %s12312_s30 }
0x24c1   : > { %9628 = vrot.lane.b32.xlu1 %v11427_v37, %s12320_s17 }
0x24de   : > { %5155 = vadd.xlane.f32.xlu0 %v5154_v17 }
0x24e5   : > { %5158 = vadd.xlane.f32.xlu1 %v5157_v33 }
0x24f4   : > { %5277 = vrot.lane.b32.xlu0 %v11412_v46, %s12320_s17 }
0x24f6   : > { %5279 = vrot.lane.b32.xlu1 %v11433_v25, %s12320_s17 }
0x24f8   : > { %5281 = vrot.lane.b32.xlu0 %v11435_v49, %s12320_s17 }
0x24fa   : > { %5283 = vrot.lane.b32.xlu1 %v11441_v5, %s12320_s17 }
0x2535   : > { %v5153_v10 = vpop.xlane.xlu1 %5152 }
0x2536   : > { %v5150_v7 = vpop.xlane.xlu0 %5149 }
0x2537   : > { %9976 = vrcp.f32 %v5150_v7 }
0x2538   : > { %9978 = vrcp.f32 %v5153_v10 }
0x2539   : > { %v9619_v0 = vpop.permute.xlu1 %9618 }
0x253a   : > { %v9614_v47 = vpop.permute.xlu0 %9613  ;;  %v9621_v42 = vunpack.i.h.bf16 %v9619_v0  ;;  %v9620_v2 = vunpack.i.l.bf16 %v9619_v0 }
0x253b   : > { %v9616_v6 = vunpack.i.h.bf16 %v9614_v47  ;;  %v9615_v51 = vunpack.i.l.bf16 %v9614_v47 }
0x253c   : > { %v9075_v53 = vpack.c.bf16 %v9621_v42, %v9620_v2 }
0x253d   : > { %v9071_v29 = vpack.c.bf16 %v9616_v6, %v9615_v51  ;;  %v9624_v34 = vpop.permute.xlu1 %9623 }
0x253e   : > { %v9626_v52 = vunpack.i.h.bf16 %v9624_v34  ;;  %v9625_v48 = vunpack.i.l.bf16 %v9624_v34 }
0x253f   : > { %9072 = vmatprep.subr.bf16.mxu1 %v9071_v29 }
0x2540   : > { %9074 = vmatpush3.bf16.msra.mxu1 %v9071_v29  ;;  %v9079_v62 = vpack.c.bf16 %v9626_v52, %v9625_v48 }
0x2541   : > { %v9977_v9 = vpop.eup %9976  ;;  %9076 = vmatprep.subr.bf16.mxu1 %v9075_v53  ;;  %v9629_v7 = vpop.permute.xlu1 %9628 }
0x2542   : > { %v9979_v17 = vpop.eup %9978  ;;  %v5161_v33 = vmul.f32 %v9977_v9, %v9971_v61  ;;  %v9631_v0 = vunpack.i.h.bf16 %v9629_v7  ;;  %v9630_v47 = vunpack.i.l.bf16 %v9629_v7 }
0x2543   : > { %v5163_v10 = vmul.f32 %v9979_v17, %v9969_v40 }
0x2544   : > { %9078 = vmatpush3.bf16.msra.mxu1 %v9075_v53  ;;  %8297 = vmatprep.mubr.msk.f32.mxu1 %vm1066_vm3, %v5161_v33  ;;  %v9085_v42 = vpack.c.bf16 %v9631_v0, %v9630_v47 }
0x2545   : > { %9081 = vmatprep.subr.msk.bf16.mxu1 %vm10515_vm2, %v9079_v62 }
0x2547   : > { %8298 = vmatmul.mubr.msk.f32.vlgmr.msra.gmra.mrb[74].mxu1 %vm1066_vm3, %v5163_v10 }
0x254d   : > { %9084 = vmatpush3.bf16.xpose.msk.msra.mxu1 %vm10515_vm2, %v9079_v62 }
0x254e   : > { %9087 = vmatprep.subr.msk.bf16.mxu1 %vm10515_vm2, %v9085_v42 }
0x2555   : > { %9090 = vmatpush3.bf16.xpose.msk.msra.mxu1 %vm10515_vm2, %v9085_v42 }
0x256b   : > { %v5156_v61 = vpop.xlane.xlu0 %5155 }
0x256c   : > { %9980 = vrcp.f32 %v5156_v61 }
0x256f   : > { %v5278_v29 = vpop.permute.xlu0 %5277 }
0x2572   : > { %v5159_v40 = vpop.xlane.xlu1 %5158 }
0x2573   : > { %9982 = vrcp.f32 %v5159_v40  ;;  %v5282_v53 = vpop.permute.xlu0 %5281 }
0x2576   : > { %v9981_v2 = vpop.eup %9980  ;;  %v5280_v62 = vpop.permute.xlu1 %5279 }
0x2577   : > { %v5165_v6 = vmul.f32 %v9981_v2, %v9973_v15 }
0x2579   : > { %8300 = vmatprep.mubr.msk.f32.mxu1 %vm1066_vm3, %v5165_v6 }
0x257a   : > { %v5284_v52 = vpop.permute.xlu1 %5283 }
0x257d   : > { %v9983_v51 = vpop.eup %9982 }
0x257e   : > { %v5167_v34 = vmul.f32 %v9983_v51, %v9975_v56 }
0x2580   : > { %8301 = vmatmul.mubr.msk.f32.gmra.mrb[76].mxu1 %vm1066_vm3, %v5167_v34 }
0x2581   : > { %8311 = vmatprep.mubr.msk.f32.mxu1 %vm956_vm1, %v5278_v29 }
0x2584   : > { %8312 = vmatmul.mubr.msk.f32.vlgmr.msra.gmra.mrb[78].mxu1 %vm956_vm1, %v5280_v62 }
0x2585   : > { %8314 = vmatprep.mubr.msk.f32.mxu1 %vm956_vm1, %v5282_v53 }
0x2588   : > { %8315 = vmatmul.mubr.msk.f32.gmra.mrb[80].mxu1 %vm956_vm1, %v5284_v52 }
0x261a   : > { %v11685_v48 = vpop.f32.mrb[74].mxu1 }
0x261b   : > { %v11687_v15 = vpop.f32.mrb[75].mxu1 }
0x261c   : > { %v9697_v56 = vpack.i.bf16 %v11685_v48, %v11687_v15 }
0x2653   : > { %v11691_v9 = vpop.f32.mrb[76].mxu1 }
0x2654   : > { %v11693_v17 = vpop.f32.mrb[77].mxu1 }
0x2657   : > { %v8313_v10 = vpop.f32.mrb[78].mxu1 }
0x2658   : > { %v5375_v7 = vpop.f32.mrb[79].mxu1  ;;  %v5397_v0 = vsel %vm1066_vm3, %v8313_v10, -inf }
0x2659   : > { %5398 = vmax.xlane.f32.xlu1 %v5397_v0  ;;  %v5394_v47 = vsel %vm1066_vm3, %v5375_v7, -inf }
0x265a   : > { %5395 = vmax.xlane.f32.xlu0 %v5394_v47 }
0x265b   : > { %v8316_v42 = vpop.f32.mrb[80].mxu1 }
0x265c   : > { %v5385_v61 = vpop.f32.mrb[81].mxu1  ;;  %v5403_v2 = vsel %vm1066_vm3, %v8316_v42, -inf }
0x265d   : > { %v5400_v40 = vsel %vm1066_vm3, %v5385_v61, -inf }
0x265e   : > { %5401 = vmax.xlane.f32.xlu0 %v5400_v40 }
0x2662   : > { %5404 = vmax.xlane.f32.xlu0 %v5403_v2 }
0x26e6   : > { %v5399_v6 = vpop.xlane.xlu1 %5398 }
0x26e7   : > { %v5407_v51 = vsub.f32 %v8313_v10, %v5399_v6  ;;  %v5396_v29 = vpop.xlane.xlu0 %5395 }
0x26e8   : > { %v5406_v34 = vsub.f32 %v5375_v7, %v5396_v29 }
0x26e9   : > { %v5412_v62 = vmul.f32 1.442695, %v5407_v51 }
0x26ea   : > { %v5410_v53 = vmul.f32 1.442695, %v5406_v34 }
0x26eb   : > { %9984 = vpow2.f32 %v5412_v62  ;;  %v5402_v10 = vpop.xlane.xlu0 %5401 }
0x26ec   : > { %9986 = vpow2.f32 %v5410_v53  ;;  %v5408_v7 = vsub.f32 %v5385_v61, %v5402_v10 }
0x26ee   : > { %v5414_v40 = vmul.f32 1.442695, %v5408_v7 }
0x26ef   : > { %v5405_v2 = vpop.xlane.xlu0 %5404 }
0x26f0   : > { %v5409_v6 = vsub.f32 %v8316_v42, %v5405_v2  ;;  %9988 = vpow2.f32 %v5414_v40 }
0x26f2   : > { %v5416_v51 = vmul.f32 1.442695, %v5409_v6 }
0x26f4   : > { %9990 = vpow2.f32 %v5416_v51 }
0x26f5   : > { %v9985_v52 = vpop.eup %9984 }
0x26f6   : > { %v9987_v0 = vpop.eup %9986  ;;  %v5421_v47 = vsel %vm1066_vm3, %v9985_v52, 0.0 }
0x26f7   : > { %5422 = vadd.xlane.f32.xlu1 %v5421_v47  ;;  %v5418_v13 = vsel %vm1066_vm3, %v9987_v0, 0.0 }
0x26f8   : > { %5419 = vadd.xlane.f32.xlu0 %v5418_v13 }
0x26fa   : > { %v9989_v13 = vpop.eup %9988 }
0x26fb   : > { %v5424_v29 = vsel %vm1066_vm3, %v9989_v13, 0.0 }
0x26fe   : > { %v9991_v34 = vpop.eup %9990 }
0x26ff   : > { %v5427_v62 = vsel %vm1066_vm3, %v9991_v34, 0.0 }
0x2708   : > { %9638 = vrot.lane.b32.xlu1 %v11425_v4, %s12320_s17 }
0x270c   : > { %9643 = vrot.lane.b32.xlu1 %v11419_v60, %s12321_s20 }
0x270e   : > { %9633 = vrot.lane.b32.xlu0 %v11417_v50, %s12320_s17 }
0x2710   : > { %9648 = vrot.lane.b32.xlu1 %v11427_v37, %s12321_s20 }
0x272d   : > { %5425 = vadd.xlane.f32.xlu0 %v5424_v29 }
0x2734   : > { %5428 = vadd.xlane.f32.xlu1 %v5427_v62 }
0x2743   : > { %5547 = vrot.lane.b32.xlu0 %v11412_v46, %s12321_s20 }
0x2745   : > { %5549 = vrot.lane.b32.xlu1 %v11433_v25, %s12321_s20 }
0x2747   : > { %5551 = vrot.lane.b32.xlu0 %v11435_v49, %s12321_s20 }
0x2749   : > { %5553 = vrot.lane.b32.xlu1 %v11441_v5, %s12321_s20 }
0x2784   : > { %v5423_v42 = vpop.xlane.xlu1 %5422 }
0x2785   : > { %v5420_v61 = vpop.xlane.xlu0 %5419 }
0x2786   : > { %9992 = vrcp.f32 %v5420_v61 }
0x2787   : > { %9994 = vrcp.f32 %v5423_v42 }
0x2788   : > { %v9639_v53 = vpop.permute.xlu1 %9638 }
0x2789   : > { %v9634_v47 = vpop.permute.xlu0 %9633  ;;  %v9641_v10 = vunpack.i.h.bf16 %v9639_v53  ;;  %v9640_v7 = vunpack.i.l.bf16 %v9639_v53 }
0x278a   : > { %v9636_v40 = vunpack.i.h.bf16 %v9634_v47  ;;  %v9635_v2 = vunpack.i.l.bf16 %v9634_v47 }
0x278b   : > { %v9095_v29 = vpack.c.bf16 %v9641_v10, %v9640_v7 }
0x278c   : > { %v9091_v6 = vpack.c.bf16 %v9636_v40, %v9635_v2  ;;  %v9644_v51 = vpop.permute.xlu1 %9643 }
0x278d   : > { %v9646_v62 = vunpack.i.h.bf16 %v9644_v51  ;;  %v9645_v1 = vunpack.i.l.bf16 %v9644_v51 }
0x278e   : > { %9092 = vmatprep.subr.bf16.mxu0 %v9091_v6 }
0x278f   : > { %9094 = vmatpush3.bf16.msra.mxu0 %v9091_v6  ;;  %v9099_v41 = vpack.c.bf16 %v9646_v62, %v9645_v1 }
0x2790   : > { %v9993_v30 = vpop.eup %9992  ;;  %9096 = vmatprep.subr.bf16.mxu0 %v9095_v29  ;;  %v9649_v61 = vpop.permute.xlu1 %9648 }
0x2791   : > { %v9995_v8 = vpop.eup %9994  ;;  %v5431_v33 = vmul.f32 %v9993_v30, %v9987_v0  ;;  %v9651_v53 = vunpack.i.h.bf16 %v9649_v61  ;;  %v9650_v47 = vunpack.i.l.bf16 %v9649_v61 }
0x2792   : > { %v5433_v42 = vmul.f32 %v9995_v8, %v9985_v52 }
0x2793   : > { %9098 = vmatpush3.bf16.msra.mxu0 %v9095_v29  ;;  %8325 = vmatprep.mubr.msk.f32.mxu0 %vm1066_vm3, %v5431_v33  ;;  %v9105_v10 = vpack.c.bf16 %v9651_v53, %v9650_v47 }
0x2794   : > { %9101 = vmatprep.subr.msk.bf16.mxu0 %vm10515_vm2, %v9099_v41 }
0x2796   : > { %8326 = vmatmul.mubr.msk.f32.vlgmr.msra.gmra.mrb[66].mxu0 %vm1066_vm3, %v5433_v42 }
0x279c   : > { %9104 = vmatpush3.bf16.xpose.msk.msra.mxu0 %vm10515_vm2, %v9099_v41 }
0x279d   : > { %9107 = vmatprep.subr.msk.bf16.mxu0 %vm10515_vm2, %v9105_v10 }
0x27a4   : > { %9110 = vmatpush3.bf16.xpose.msk.msra.mxu0 %vm10515_vm2, %v9105_v10 }
0x27ba   : > { %v5426_v30 = vpop.xlane.xlu0 %5425 }
0x27bb   : > { %9996 = vrcp.f32 %v5426_v30 }
0x27be   : > { %v5548_v0 = vpop.permute.xlu0 %5547 }
0x27c1   : > { %v5429_v8 = vpop.xlane.xlu1 %5428 }
0x27c2   : > { %9998 = vrcp.f32 %v5429_v8  ;;  %v5552_v40 = vpop.permute.xlu0 %5551 }
0x27c5   : > { %v9997_v1 = vpop.eup %9996  ;;  %v5550_v41 = vpop.permute.xlu1 %5549 }
0x27c6   : > { %v5435_v33 = vmul.f32 %v9997_v1, %v9989_v13 }
0x27c8   : > { %8328 = vmatprep.mubr.msk.f32.mxu0 %vm1066_vm3, %v5435_v33 }
0x27c9   : > { %v5554_v2 = vpop.permute.xlu1 %5553 }
0x27cc   : > { %v9999_v52 = vpop.eup %9998 }
0x27cd   : > { %v5437_v7 = vmul.f32 %v9999_v52, %v9991_v34 }
0x27cf   : > { %8329 = vmatmul.mubr.msk.f32.gmra.mrb[68].mxu0 %vm1066_vm3, %v5437_v7 }
0x27d0   : > { %8339 = vmatprep.mubr.msk.f32.mxu0 %vm956_vm1, %v5548_v0 }
0x27d3   : > { %8340 = vmatmul.mubr.msk.f32.vlgmr.msra.gmra.mrb[70].mxu0 %vm956_vm1, %v5550_v41 }
0x27d4   : > { %8342 = vmatprep.mubr.msk.f32.mxu0 %vm956_vm1, %v5552_v40 }
0x27d7   : > { %8343 = vmatmul.mubr.msk.f32.gmra.mrb[72].mxu0 %vm956_vm1, %v5554_v2 }
0x2869   : > { %v11737_v6 = vpop.f32.mrb[66].mxu0 }
0x286a   : > { %v11739_v13 = vpop.f32.mrb[67].mxu0 }
0x286b   : > { %v9707_v34 = vpack.i.bf16 %v11737_v6, %v11739_v13  ;;  %v7201_v6 = vld [vmem:[%s12267_s6 + $0x88] sm:$0xff]  ;;  %v7202_v13 = vld [vmem:[%s12267_s6 + $0x90] sm:$0xff] }
0x28a2   : > { %v11743_v51 = vpop.f32.mrb[68].mxu0 }
0x28a3   : > { %v11745_v29 = vpop.f32.mrb[69].mxu0 }
0x28a4   : > { %v12325_v38 = vpack.i.bf16 %v11743_v51, %v11745_v29  ;;  %v7203_v51 = vld [vmem:[%s12267_s6 + $0x98] sm:$0xff] }
0x28a5   : > { %v9143_v29 = vpack.c.bf16 %v7203_v51, %v7202_v13 }
0x28a6   : > { %v8341_v42 = vpop.f32.mrb[70].mxu0 }
0x28a7   : > { %v5645_v61 = vpop.f32.mrb[71].mxu0  ;;  %v5667_v53 = vsel %vm1066_vm3, %v8341_v42, -inf }
0x28a8   : > { %5668 = vmax.xlane.f32.xlu1 %v5667_v53  ;;  %v5664_v47 = vsel %vm1066_vm3, %v5645_v61, -inf }
0x28a9   : > { %5665 = vmax.xlane.f32.xlu0 %v5664_v47 }
0x28aa   : > { %v8344_v10 = vpop.f32.mrb[72].mxu0 }
0x28ab   : > { %v5655_v30 = vpop.f32.mrb[73].mxu0  ;;  %v5673_v1 = vsel %vm1066_vm3, %v8344_v10, -inf }
0x28ac   : > { %v5670_v8 = vsel %vm1066_vm3, %v5655_v30, -inf }
0x28ad   : > { %5671 = vmax.xlane.f32.xlu0 %v5670_v8 }
0x28b1   : > { %5674 = vmax.xlane.f32.xlu0 %v5673_v1 }
0x2935   : > { %v5669_v33 = vpop.xlane.xlu1 %5668 }
0x2936   : > { %v5677_v52 = vsub.f32 %v8341_v42, %v5669_v33  ;;  %v5666_v0 = vpop.xlane.xlu0 %5665 }
0x2937   : > { %v5676_v7 = vsub.f32 %v5645_v61, %v5666_v0 }
0x2938   : > { %v5682_v41 = vmul.f32 1.442695, %v5677_v52 }
0x2939   : > { %v5680_v40 = vmul.f32 1.442695, %v5676_v7 }
0x293a   : > { %10000 = vpow2.f32 %v5682_v41  ;;  %v5672_v42 = vpop.xlane.xlu0 %5671 }
0x293b   : > { %10002 = vpow2.f32 %v5680_v40  ;;  %v5678_v61 = vsub.f32 %v5655_v30, %v5672_v42 }
0x293d   : > { %v5684_v8 = vmul.f32 1.442695, %v5678_v61 }
0x293e   : > { %v5675_v1 = vpop.xlane.xlu0 %5674 }
0x293f   : > { %v5679_v33 = vsub.f32 %v8344_v10, %v5675_v1  ;;  %10004 = vpow2.f32 %v5684_v8 }
0x2941   : > { %v5686_v52 = vmul.f32 1.442695, %v5679_v33 }
0x2943   : > { %10006 = vpow2.f32 %v5686_v52 }
0x2944   : > { %v10001_v2 = vpop.eup %10000 }
0x2945   : > { %v10003_v53 = vpop.eup %10002  ;;  %v5691_v47 = vsel %vm1066_vm3, %v10001_v2, 0.0 }
0x2946   : > { %5692 = vadd.xlane.f32.xlu1 %v5691_v47  ;;  %v5688_v62 = vsel %vm1066_vm3, %v10003_v53, 0.0 }
0x2947   : > { %5689 = vadd.xlane.f32.xlu0 %v5688_v62 }
0x2949   : > { %v10005_v62 = vpop.eup %10004 }
0x294a   : > { %v5694_v0 = vsel %vm1066_vm3, %v10005_v62, 0.0 }
0x294d   : > { %v10007_v7 = vpop.eup %10006 }
0x2957   : > { %9658 = vrot.lane.b32.xlu1 %v11425_v4, %s12321_s20 }
0x295b   : > { %9663 = vrot.lane.b32.xlu1 %v11419_v60, %s12322_s22  ;;  %v5697_v60 = vsel %vm1066_vm3, %v10007_v7, 0.0 }
0x295d   : > { %9653 = vrot.lane.b32.xlu0 %v11417_v50, %s12321_s20 }
0x295f   : > { %9668 = vrot.lane.b32.xlu1 %v11427_v37, %s12322_s22 }
0x297c   : > { %5695 = vadd.xlane.f32.xlu0 %v5694_v0 }
0x2983   : > { %5698 = vadd.xlane.f32.xlu1 %v5697_v60 }
0x2992   : > { %5817 = vrot.lane.b32.xlu0 %v11412_v46, %s12322_s22 }
0x2994   : > { %5819 = vrot.lane.b32.xlu1 %v11433_v25, %s12322_s22 }
0x2996   : > { %5821 = vrot.lane.b32.xlu0 %v11435_v49, %s12322_s22 }
0x2998   : > { %5823 = vrot.lane.b32.xlu1 %v11441_v5, %s12322_s22 }
0x29d3   : > { %v5693_v37 = vpop.xlane.xlu1 %5692 }
0x29d4   : > { %v5690_v10 = vpop.xlane.xlu0 %5689 }
0x29d5   : > { %10008 = vrcp.f32 %v5690_v10 }
0x29d6   : > { %10010 = vrcp.f32 %v5693_v37 }
0x29d7   : > { %v9659_v30 = vpop.permute.xlu1 %9658 }
0x29d8   : > { %v9654_v41 = vpop.permute.xlu0 %9653  ;;  %v9661_v40 = vunpack.i.h.bf16 %v9659_v30  ;;  %v9660_v47 = vunpack.i.l.bf16 %v9659_v30 }
0x29d9   : > { %v9656_v42 = vunpack.i.h.bf16 %v9654_v41  ;;  %v9655_v61 = vunpack.i.l.bf16 %v9654_v41 }
0x29da   : > { %v9115_v1 = vpack.c.bf16 %v9661_v40, %v9660_v47 }
0x29db   : > { %v9111_v46 = vpack.c.bf16 %v9656_v42, %v9655_v61  ;;  %v9664_v8 = vpop.permute.xlu1 %9663 }
0x29dc   : > { %v9666_v25 = vunpack.i.h.bf16 %v9664_v8  ;;  %v9665_v33 = vunpack.i.l.bf16 %v9664_v8 }
0x29dd   : > { %9112 = vmatprep.subr.bf16.mxu1 %v9111_v46 }
0x29de   : > { %9114 = vmatpush3.bf16.msra.mxu1 %v9111_v46  ;;  %v9119_v0 = vpack.c.bf16 %v9666_v25, %v9665_v33 }
0x29df   : > { %v10009_v49 = vpop.eup %10008  ;;  %9116 = vmatprep.subr.bf16.mxu1 %v9115_v1  ;;  %v9669_v37 = vpop.permute.xlu1 %9668 }
0x29e0   : > { %v10011_v5 = vpop.eup %10010  ;;  %v5701_v52 = vmul.f32 %v10009_v49, %v10003_v53  ;;  %v9671_v10 = vunpack.i.h.bf16 %v9669_v37  ;;  %v9670_v30 = vunpack.i.l.bf16 %v9669_v37 }
0x29e1   : > { %v5703_v60 = vmul.f32 %v10011_v5, %v10001_v2 }
0x29e2   : > { %9118 = vmatpush3.bf16.msra.mxu1 %v9115_v1  ;;  %8353 = vmatprep.mubr.msk.f32.mxu1 %vm1066_vm3, %v5701_v52  ;;  %v9125_v41 = vpack.c.bf16 %v9671_v10, %v9670_v30 }
0x29e3   : > { %9121 = vmatprep.subr.msk.bf16.mxu1 %vm10515_vm2, %v9119_v0 }
0x29e5   : > { %8354 = vmatmul.mubr.msk.f32.vlgmr.msra.gmra.mrb[82].mxu1 %vm1066_vm3, %v5703_v60 }
0x29eb   : > { %9124 = vmatpush3.bf16.xpose.msk.msra.mxu1 %vm10515_vm2, %v9119_v0 }
0x29ec   : > { %9127 = vmatprep.subr.msk.bf16.mxu1 %vm10515_vm2, %v9125_v41 }
0x29f3   : > { %9130 = vmatpush3.bf16.xpose.msk.msra.mxu1 %vm10515_vm2, %v9125_v41 }
0x2a09   : > { %v5696_v53 = vpop.xlane.xlu0 %5695 }
0x2a0a   : > { %10012 = vrcp.f32 %v5696_v53 }
0x2a0d   : > { %v5818_v61 = vpop.permute.xlu0 %5817 }
0x2a10   : > { %v5699_v2 = vpop.xlane.xlu1 %5698 }
0x2a11   : > { %10014 = vrcp.f32 %v5699_v2  ;;  %v5822_v1 = vpop.permute.xlu0 %5821 }
0x2a14   : > { %v10013_v40 = vpop.eup %10012  ;;  %v5820_v8 = vpop.permute.xlu1 %5819 }
0x2a15   : > { %v5705_v47 = vmul.f32 %v10013_v40, %v10005_v62 }
0x2a17   : > { %8356 = vmatprep.mubr.msk.f32.mxu1 %vm1066_vm3, %v5705_v47 }
0x2a18   : > { %v5824_v45 = vpop.permute.xlu1 %5823 }
0x2a1b   : > { %v10015_v42 = vpop.eup %10014 }
0x2a1c   : > { %v5707_v46 = vmul.f32 %v10015_v42, %v10007_v7 }
0x2a1e   : > { %8357 = vmatmul.mubr.msk.f32.gmra.mrb[84].mxu1 %vm1066_vm3, %v5707_v46 }
0x2a1f   : > { %8367 = vmatprep.mubr.msk.f32.mxu1 %vm956_vm1, %v5818_v61 }
0x2a22   : > { %8368 = vmatmul.mubr.msk.f32.vlgmr.msra.gmra.mrb[86].mxu1 %vm956_vm1, %v5820_v8 }
0x2a23   : > { %8370 = vmatprep.mubr.msk.f32.mxu1 %vm956_vm1, %v5822_v1 }
0x2a26   : > { %8371 = vmatmul.mubr.msk.f32.gmra.mrb[88].mxu1 %vm956_vm1, %v5824_v45 }
0x2ab8   : > { %v8355_v25 = vpop.f32.mrb[82].mxu1 }
0x2ab9   : > { %v5798_v62 = vpop.f32.mrb[83].mxu1 }
0x2aba   : > { %v9717_v33 = vpack.i.bf16 %v8355_v25, %v5798_v62 }
0x2af1   : > { %v8358_v49 = vpop.f32.mrb[84].mxu1 }
0x2af2   : > { %v5808_v5 = vpop.f32.mrb[85].mxu1 }
0x2af3   : > { %v9737_v52 = vpack.i.bf16 %v8358_v49, %v5808_v5 }
0x2af5   : > { %v8369_v7 = vpop.f32.mrb[86].mxu1 }
0x2af6   : > { %v5915_v0 = vpop.f32.mrb[87].mxu1  ;;  %v5937_v60 = vsel %vm1066_vm3, %v8369_v7, -inf }
0x2af7   : > { %5938 = vmax.xlane.f32.xlu1 %v5937_v60  ;;  %v5934_v37 = vsel %vm1066_vm3, %v5915_v0, -inf }
0x2af8   : > { %5935 = vmax.xlane.f32.xlu0 %v5934_v37 }
0x2af9   : > { %v8372_v10 = vpop.f32.mrb[88].mxu1 }
0x2afa   : > { %v5925_v30 = vpop.f32.mrb[89].mxu1  ;;  %v5943_v53 = vsel %vm1066_vm3, %v8372_v10, -inf }
0x2afb   : > { %v5940_v41 = vsel %vm1066_vm3, %v5925_v30, -inf }
0x2afc   : > { %5941 = vmax.xlane.f32.xlu0 %v5940_v41 }
0x2b00   : > { %5944 = vmax.xlane.f32.xlu0 %v5943_v53 }
0x2b84   : > { %v5939_v2 = vpop.xlane.xlu1 %5938 }
0x2b85   : > { %v5947_v40 = vsub.f32 %v8369_v7, %v5939_v2  ;;  %v5936_v47 = vpop.xlane.xlu0 %5935  ;;  %v7206_v2 = vld [vmem:[%s12267_s6 + $0xb0] sm:$0xff] }
0x2b86   : > { %v5946_v42 = vsub.f32 %v5915_v0, %v5936_v47 }
0x2b87   : > { %v5952_v61 = vmul.f32 1.442695, %v5947_v40  ;;  %v7207_v40 = vld [vmem:[%s12267_s6 + $0xb8] sm:$0xff] }
0x2b88   : > { %v5950_v46 = vmul.f32 1.442695, %v5946_v42  ;;  %v9151_v47 = vpack.c.bf16 %v7207_v40, %v7206_v2  ;;  %v7208_v42 = vld [vmem:[%s12267_s6 + $0xc0] sm:$0xff] }
0x2b89   : > { %10016 = vpow2.f32 %v5952_v61  ;;  %v5942_v8 = vpop.xlane.xlu0 %5941  ;;  %v7209_v61 = vld [vmem:[%s12267_s6 + $0xc8] sm:$0xff] }
0x2b8a   : > { %10018 = vpow2.f32 %v5950_v46  ;;  %v5948_v1 = vsub.f32 %v5925_v30, %v5942_v8  ;;  %v9155_v46 = vpack.c.bf16 %v7209_v61, %v7208_v42  ;;  %v7210_v8 = vld [vmem:[%s12267_s6 + $0xd0] sm:$0xff] }
0x2b8c   : > { %v5954_v45 = vmul.f32 1.442695, %v5948_v1  ;;  %v7211_v1 = vld [vmem:[%s12267_s6 + $0xd8] sm:$0xff] }
0x2b8d   : > { %v5945_v25 = vpop.xlane.xlu0 %5944 }
0x2b8e   : > { %10020 = vpow2.f32 %v5954_v45  ;;  %v5949_v62 = vsub.f32 %v8372_v10, %v5945_v25  ;;  %v9159_v45 = vpack.c.bf16 %v7211_v1, %v7210_v8  ;;  %v7212_v25 = vld [vmem:[%s12267_s6 + $0xe0] sm:$0xff] }
0x2b90   : > { %v5956_v49 = vmul.f32 1.442695, %v5949_v62  ;;  %v7213_v62 = vld [vmem:[%s12267_s6 + $0xe8] sm:$0xff] }
0x2b92   : > { %10022 = vpow2.f32 %v5956_v49  ;;  %v9163_v49 = vpack.c.bf16 %v7213_v62, %v7212_v25 }
0x2b93   : > { %v10017_v5 = vpop.eup %10016 }
0x2b94   : > { %v10019_v60 = vpop.eup %10018  ;;  %v5961_v37 = vsel %vm1066_vm3, %v10017_v5, 0.0 }
0x2b95   : > { %5962 = vadd.xlane.f32.xlu1 %v5961_v37  ;;  %v5958_v7 = vsel %vm1066_vm3, %v10019_v60, 0.0 }
0x2b96   : > { %5959 = vadd.xlane.f32.xlu0 %v5958_v7 }
0x2b98   : > { %v10021_v0 = vpop.eup %10020 }
0x2b99   : > { %v5964_v41 = vsel %vm1066_vm3, %v10021_v0, 0.0 }
0x2b9a   : > { %5965 = vadd.xlane.f32.xlu0 %v5964_v41 }
0x2b9c   : > { %v10023_v53 = vpop.eup %10022 }
0x2b9d   : > { %v5967_v30 = vsel %vm1066_vm3, %v10023_v53, 0.0 }
0x2b9e   : > { %5968 = vadd.xlane.f32.xlu1 %v5967_v30 }
0x2baf   : > { %9678 = vrot.lane.b32.xlu1 %v11425_v4, %s12322_s22  ;;  %v12324_v4 = vpack.i.bf16 %v11691_v9, %v11693_v17  ;;  %v7200_v17 = vld [vmem:[%s12267_s6 + $0x80] sm:$0xff] }
0x2bb0   : > { %9673 = vrot.lane.b32.xlu0 %v11417_v50, %s12322_s22  ;;  %v12323_v50 = vpack.i.bf16 %v11639_v44, %v11641_v54 }
0x2bb3   : > { %9683 = vrot.lane.b32.xlu1 %v9682_v24, %s12322_s22 }
0x2bb4   : > { %9693 = vrot.lane.b32.xlu0 %v9692_v16, %s12320_s17 }
0x2bb7   : > { %9688 = vrot.lane.b32.xlu1 %v9687_v12, %s12321_s20 }
0x2bb8   : > { %9703 = vrot.lane.b32.xlu0 %v9702_v23, %s12322_s22  ;;  %s446_s22 = sand.u32 1, %s10104_s26  }
0x2bb9   : > { %s447_s23 = scalar_lea.vmem [#allocation2], %s446_s22 }
0x2bba   : > { %s6877_s0 = sshll.u32 %s447_s23, 4  ;;  %s12221_s0 = int_to_ptr.vmem [resolvable:$true] %s6877_s0 }
0x2bbb   : > { %9698 = vrot.lane.b32.xlu1 %v9697_v56, %s12312_s30 }
0x2bbc   : > { %9713 = vrot.lane.b32.xlu0 %v9712_v22, %s12321_s20 }
0x2bbf   : > { %9708 = vrot.lane.b32.xlu1 %v9707_v34, %s12319_s16  ;;  %v9139_v34 = vpack.c.bf16 %v7201_v6, %v7200_v17 }
0x2bc0   : > { %9723 = vrot.lane.b32.xlu0 %v12323_v50, %s12320_s17  ;;  %s10054_s17 = sshll.u32 %s10124_s29, 4  ;;  %s10055_s17 = int_to_ptr.vmem [resolvable:$false] %s10054_s17 }
0x2bc1   : > { %s10056_s20 = scalar_lea.vmem %s10055_s17, 32  ;;  %p10057_p0 = scmp.lt.s32.totalorder %s12221_s0, %s10055_s17 }
0x2bc3   : > { %9718 = vrot.lane.b32.xlu1 %v9717_v33, %s12314_s15  ;;  %v7204_v33 = vld [vmem:[%s12267_s6 + $0xa0] sm:$0xff] }
0x2bc4   : > { %9728 = vrot.lane.b32.xlu0 %v12324_v4, %s12312_s30 }
0x2bc7   : > { %9733 = vrot.lane.b32.xlu1 %v12325_v38, %s12319_s16  ;;  %s10050_s16 = scalar_lea.vmem %s12221_s0, 16 }
0x2bc8   : > { %9738 = vrot.lane.b32.xlu0 %v9737_v52, %s12314_s15  ;;  %v7205_v52 = vld [vmem:[%s12267_s6 + $0xa8] sm:$0xff]  ;;  %p10051_p11 = scmp.ne.s32.totalorder %s12221_s0, %s10050_s16  ;;  %p10058_p1 = scmp.lt.s32.totalorder %s10056_s20, %s10050_s16 }
0x2bc9   : > { %v9147_v10 = vpack.c.bf16 %v7205_v52, %v7204_v33 }
0x2bca   : > { %p10052_p12 = pnand %p10051_p11, %p10233_p5  ;;  %p10059_p2 = por %p10058_p1, %p10057_p0 }
0x2bcc   : > { %p10053_p13 = pneg %p10052_p12 }
0x2bce   : > { %p10060_p3 = pnand %p10059_p2, %p10053_p13 }
0x2c22   : > { %v5963_v24 = vpop.xlane.xlu1 %5962 }
0x2c23   : > { %v5960_v3 = vpop.xlane.xlu0 %5959 }
0x2c24   : > { %10024 = vrcp.f32 %v5960_v3 }
0x2c25   : > { %10026 = vrcp.f32 %v5963_v24 }
0x2c27   : > { %v5966_v35 = vpop.xlane.xlu0 %5965 }
0x2c28   : > { %10028 = vrcp.f32 %v5966_v35 }
0x2c2b   : > { %v5969_v18 = vpop.xlane.xlu1 %5968  ;;  %v9674_v23 = vpop.permute.xlu0 %9673 }
0x2c2c   : > { %v9676_v14 = vunpack.i.h.bf16 %v9674_v23  ;;  %v9675_v58 = vunpack.i.l.bf16 %v9674_v23  ;;  %10030 = vrcp.f32 %v5969_v18 }
0x2c2e   : > { %v10025_v12 = vpop.eup %10024  ;;  %v9131_v21 = vpack.c.bf16 %v9676_v14, %v9675_v58 }
0x2c2f   : > { %v9679_v20 = vpop.permute.xlu1 %9678  ;;  %v5971_v22 = vmul.f32 %v10025_v12, %v10019_v60  ;;  %v10027_v44 = vpop.eup %10026  ;;  %v7215_v60 = vld [vmem:[%s12267_s6 + $0xf8] sm:$0xff] }
0x2c30   : > { %v9681_v43 = vunpack.i.h.bf16 %v9679_v20  ;;  %v9680_v19 = vunpack.i.l.bf16 %v9679_v20  ;;  %9132 = vmatprep.subr.bf16.mxu0 %v9131_v21  ;;  %v5973_v48 = vmul.f32 %v10027_v44, %v10017_v5  ;;  %v7214_v5 = vld [vmem:[%s12267_s6 + $0xf0] sm:$0xff]  ;;  %v9694_v38 = vpop.permute.xlu0 %9693 }
0x2c31   : > { %9134 = vmatpush3.bf16.msra.mxu0 %v9131_v21  ;;  %8381 = vmatprep.mubr.msk.f32.mxu0 %vm1066_vm3, %v5971_v22  ;;  %v9167_v37 = vpack.c.bf16 %v7215_v60, %v7214_v5 }
0x2c32   : > { %v9135_v16 = vpack.c.bf16 %v9681_v43, %v9680_v19  ;;  %v10029_v54 = vpop.eup %10028 }
0x2c33   : > { %v5975_v56 = vmul.f32 %v10029_v54, %v10021_v0  ;;  %v9684_v4 = vpop.permute.xlu1 %9683  ;;  %v9696_v54 = vunpack.i.h.bf16 %v9694_v38 }
0x2c34   : > { %9136 = vmatprep.subr.bf16.mxu0 %v9135_v16  ;;  %v9704_v24 = vpop.permute.xlu0 %9703  ;;  %v9686_v58 = vunpack.i.h.bf16 %v9684_v4  ;;  %v9685_v12 = vunpack.i.l.bf16 %v9684_v4 }
0x2c35   : > { %9138 = vmatpush3.bf16.msra.mxu0 %v9135_v16  ;;  %v9706_v20 = vunpack.i.h.bf16 %v9704_v24  ;;  %v9705_v22 = vunpack.i.l.bf16 %v9704_v24 }
0x2c36   : > { %v10031_v15 = vpop.eup %10030  ;;  %9140 = vmatprep.subr.bf16.mxu0 %v9139_v34 }
0x2c37   : > { %v5977_v9 = vmul.f32 %v10031_v15, %v10023_v53  ;;  %v9689_v3 = vpop.permute.xlu1 %9688  ;;  %v6200_v15 = vsel %vm956_vm1, %v11481_v57, %v9686_v58  ;;  %v6201_v17 = vsel %vm956_vm1, %v11487_v28, %v9705_v22 }
0x2c38   : > { %8382 = vmatmul.mubr.msk.f32.vlgmr.msra.gmra.mrb[74].mxu0 %vm1066_vm3, %v5973_v48  ;;  %v9714_v18 = vpop.permute.xlu0 %9713  ;;  %v9691_v43 = vunpack.i.h.bf16 %v9689_v3  ;;  %v9690_v19 = vunpack.i.l.bf16 %v9689_v3  ;;  %v9695_v48 = vunpack.i.l.bf16 %v9694_v38 }
0x2c39   : > { %8384 = vmatprep.mubr.msk.f32.mxu0 %vm1066_vm3, %v5975_v56  ;;  %9142 = vmatpush3.bf16.msra.mxu0 %v9139_v34  ;;  %v9716_v16 = vunpack.i.h.bf16 %v9714_v18  ;;  %v9715_v44 = vunpack.i.l.bf16 %v9714_v18  ;;  %v6199_v56 = vsel %vm956_vm1, %v11483_v36, %v9685_v12 }
0x2c3a   : > { %9144 = vmatprep.subr.bf16.mxu0 %v9143_v29  ;;  %v6203_v6 = vsel %vm1066_vm3, %v6199_v56, %v9690_v19  ;;  %v6204_v13 = vsel %vm1066_vm3, %v6200_v15, %v9691_v43  ;;  %v11932_v19 = vld [vmem:[%s12273_s12 + $0x10] sm:$0xff] }
0x2c3b   : > { %v9699_v35 = vpop.permute.xlu1 %9698  ;;  %v6205_v57 = vsel %vm1066_vm3, %v6201_v17, %v9715_v44  ;;  %v6207_v61 = vsel %vm466_vm0, %v6203_v6, %v9695_v48 }
0x2c3c   : > { %8385 = vmatmul.mubr.msk.f32.gmra.mrb[76].mxu0 %vm1066_vm3, %v5977_v9  ;;  %v9724_v14 = vpop.permute.xlu0 %9723  ;;  %v6202_v9 = vsel %vm956_vm1, %v11485_v55, %v9706_v20  ;;  %v9701_v51 = vunpack.i.h.bf16 %v9699_v35 }
0x2c3d   : > { %9146 = vmatpush3.bf16.msra.mxu0 %v9143_v29  ;;  %v9700_v29 = vunpack.i.l.bf16 %v9699_v35  ;;  %v9726_v33 = vunpack.i.h.bf16 %v9724_v14  ;;  %v9725_v52 = vunpack.i.l.bf16 %v9724_v14  ;;  %v6206_v36 = vsel %vm1066_vm3, %v6202_v9, %v9716_v16 }
0x2c3e   : > { %9148 = vmatprep.subr.bf16.mxu0 %v9147_v10  ;;  %v12326_v16 = vsub.s32 3, %v10493_v26 }
0x2c3f   : > { %v9709_v23 = vpop.permute.xlu1 %9708  ;;  %v6209_v62 = vsel %vm466_vm0, %v6205_v57, %v9725_v52  ;;  %v7216_v52 = vld [vmem:[%s12268_s7 + $0x80] sm:$0xff] }
0x2c40   : > { %v9729_v34 = vpop.permute.xlu0 %9728  ;;  %v9711_v2 = vunpack.i.h.bf16 %v9709_v23  ;;  %v9710_v40 = vunpack.i.l.bf16 %v9709_v23  ;;  %v6247_v44 = vrot.slane %v11932_v19, %v12326_v16 }
0x2c41   : > { %9150 = vmatpush3.bf16.msra.mxu0 %v9147_v10  ;;  %v9731_v55 = vunpack.i.h.bf16 %v9729_v34 }
0x2c42   : > { %9152 = vmatprep.subr.bf16.mxu0 %v9151_v47 }
0x2c43   : > { %v9719_v21 = vpop.permute.xlu1 %9718 }
0x2c44   : > { %v9721_v42 = vunpack.i.h.bf16 %v9719_v21  ;;  %v9720_v28 = vunpack.i.l.bf16 %v9719_v21 }
0x2c45   : > { %9154 = vmatpush3.bf16.msra.mxu0 %v9151_v47  ;;  %v9730_v47 = vunpack.i.l.bf16 %v9729_v34 }
0x2c46   : > { %9156 = vmatprep.subr.bf16.mxu0 %v9155_v46 }
0x2c47   : > { %v9734_v10 = vpop.permute.xlu1 %9733 }
0x2c48   : > { %v9736_v8 = vunpack.i.h.bf16 %v9734_v10  ;;  %v9735_v1 = vunpack.i.l.bf16 %v9734_v10 }
0x2c49   : > { %9158 = vmatpush3.bf16.msra.mxu0 %v9155_v46  ;;  %v6208_v46 = vsel %vm466_vm0, %v6204_v13, %v9696_v54 }
0x2c4a   : > { %9160 = vmatprep.subr.bf16.mxu0 %v9159_v45  ;;  %v6212_v25 = vsel %vm3226_vm4, %v6208_v46, %v9701_v51 }
0x2c4b   : > { %v6216_v60 = vsel %vm3231_vm5, %v6212_v25, %v9711_v2 }
0x2c4d   : > { %9162 = vmatpush3.bf16.msra.mxu0 %v9159_v45  ;;  %v6211_v45 = vsel %vm3226_vm4, %v6207_v61, %v9700_v29 }
0x2c4e   : > { %9164 = vmatprep.subr.bf16.mxu0 %v9163_v49 }
0x2c51   : > { %9166 = vmatpush3.bf16.msra.mxu0 %v9163_v49  ;;  %v6210_v49 = vsel %vm466_vm0, %v6206_v36, %v9726_v33  ;;  %v7221_v36 = vld [vmem:[%s12268_s7 + $0xa8] sm:$0xff] }
0x2c52   : > { %9168 = vmatprep.subr.bf16.mxu0 %v9167_v37 }
0x2c55   : > { %9170 = vmatpush3.bf16.msra.mxu0 %v9167_v37  ;;  %v9739_v37 = vpop.permute.xlu0 %9738 }
0x2c56   : > { %v9741_v18 = vunpack.i.h.bf16 %v9739_v37  ;;  %v9740_v23 = vunpack.i.l.bf16 %v9739_v37 }
0x2d0b   : > { %v8383_v7 = vpop.f32.mrb[74].mxu0 }
0x2d0c   : > { %v6068_v0 = vpop.f32.mrb[75].mxu0 }
0x2d0d   : > { %v9742_v41 = vpack.i.bf16 %v8383_v7, %v6068_v0 }
0x2d0f   : > { %9743 = vrot.lane.b32.xlu1 %v9742_v41, %s12318_s14  ;;  %v8386_v53 = vpop.f32.mrb[76].mxu0  ;;  %v6215_v41 = vsel %vm3231_vm5, %v6211_v45, %v9710_v40 }
0x2d10   : > { %v6078_v30 = vpop.f32.mrb[77].mxu0  ;;  %v6219_v4 = vsel %vm3236_vm6, %v6215_v41, %v9720_v28 }
0x2d11   : > { %v9747_v50 = vpack.i.bf16 %v8386_v53, %v6078_v30  ;;  %v6213_v53 = vsel %vm3226_vm4, %v6209_v62, %v9730_v47  ;;  %v6214_v30 = vsel %vm3226_vm4, %v6210_v49, %v9731_v55 }
0x2d12   : > { %v6217_v24 = vsel %vm3231_vm5, %v6213_v53, %v9735_v1  ;;  %v6218_v35 = vsel %vm3231_vm5, %v6214_v30, %v9736_v8  ;;  %v7224_v53 = vld [vmem:[%s12268_s7 + $0xc0] sm:$0xff]  ;;  %v7225_v30 = vld [vmem:[%s12268_s7 + $0xc8] sm:$0xff] }
0x2d13   : > { %9748 = vrot.lane.b32.xlu1 %v9747_v50, %s12318_s14  ;;  %v6220_v50 = vsel %vm3236_vm6, %v6216_v60, %v9721_v42  ;;  %v6221_v21 = vsel %vm3236_vm6, %v6217_v24, %v9740_v23  ;;  %v6222_v20 = vsel %vm3236_vm6, %v6218_v35, %v9741_v18  ;;  %v7228_v24 = vld [vmem:[%s12268_s7 + $0xe0] sm:$0xff]  ;;  %v7229_v35 = vld [vmem:[%s12268_s7 + $0xe8] sm:$0xff]  ;;  %v7230_v18 = vld [vmem:[%s12268_s7 + $0xf0] sm:$0xff]  ;;  %s6865_s14 = scalar_lea.sflag [#allocation3], %s446_s22 }
0x2d14   : > { %v9195_v23 = vpack.c.bf16 %v7229_v35, %v7228_v24 }
0x2d81   : > { %v9744_v5 = vpop.permute.xlu1 %9743 }
0x2d82   : > { %v9746_v7 = vunpack.i.h.bf16 %v9744_v5  ;;  %v9745_v0 = vunpack.i.l.bf16 %v9744_v5 }
0x2d84   : > { %v6223_v38 = vsel %vm3241_vm7, %v6219_v4, %v9745_v0  ;;  %v6224_v3 = vsel %vm3241_vm7, %v6220_v50, %v9746_v7  ;;  %v7222_v7 = vld [vmem:[%s12268_s7 + $0xb0] sm:$0xff]  ;;  %v7223_v0 = vld [vmem:[%s12268_s7 + $0xb8] sm:$0xff]  ;;  %v9187_v50 = vpack.c.bf16 %v7225_v30, %v7224_v53 }
0x2d85   : > { %8419 = vmatprep.mubr.f32.mxu0 %v6223_v38  ;;  %v9749_v14 = vpop.permute.xlu1 %9748  ;;  %v9183_v41 = vpack.c.bf16 %v7223_v0, %v7222_v7  ;;  %v7226_v4 = vld [vmem:[%s12268_s7 + $0xd0] sm:$0xff]  ;;  %v7227_v38 = vld [vmem:[%s12268_s7 + $0xd8] sm:$0xff] }
0x2d86   : > { %v9751_v58 = vunpack.i.h.bf16 %v9749_v14  ;;  %v9750_v12 = vunpack.i.l.bf16 %v9749_v14  ;;  %8420 = vmatmul.mubr.f32.vlgmr.msra.gmra.mrb[78].mxu0 %v6224_v3  ;;  %v9191_v3 = vpack.c.bf16 %v7227_v38, %v7226_v4  ;;  %v7231_v14 = vld [vmem:[%s12268_s7 + $0xf8] sm:$0xff] }
0x2d88   : > { %v6225_v22 = vsel %vm3241_vm7, %v6221_v21, %v9750_v12  ;;  %v6226_v43 = vsel %vm3241_vm7, %v6222_v20, %v9751_v58  ;;  %v9199_v58 = vpack.c.bf16 %v7231_v14, %v7230_v18  ;;  %v7232_v12 = vld [vmem:[%s12269_s8 + $0x80] sm:$0xff]  ;;  %v7233_v21 = vld [vmem:[%s12269_s8 + $0x88] sm:$0xff]  ;;  %v7234_v20 = vld [vmem:[%s12269_s8 + $0x90] sm:$0xff]  ;;  %v12329_v14 = vsub.s32 6, %v10493_v26 }
0x2d89   : > { %8422 = vmatprep.mubr.f32.mxu0 %v6225_v22  ;;  %v9203_v22 = vpack.c.bf16 %v7233_v21, %v7232_v12  ;;  %v7246_v18 = vld [vmem:[%s12269_s8 + $0xf0] sm:$0xff] }
0x2d8a   : > { %8423 = vmatmul.mubr.f32.gmra.mrb[80].mxu0 %v6226_v43  ;;  %v7235_v43 = vld [vmem:[%s12269_s8 + $0x98] sm:$0xff] }
0x2d8b   : > { %v9207_v16 = vpack.c.bf16 %v7235_v43, %v7234_v20  ;;  %9204 = vmatprep.subr.bf16.mxu0 %v9203_v22 }
0x2d8c   : > { %9206 = vmatpush3.bf16.msra.mxu0 %v9203_v22 }
0x2d8d   : > { %9208 = vmatprep.subr.bf16.mxu0 %v9207_v16 }
0x2d90   : > { %9210 = vmatpush3.bf16.msra.mxu0 %v9207_v16 }
0x2e59   : > { %v8421_v54 = vpop.f32.mrb[78].mxu0 }
0x2e5a   : > { %v6320_v48 = vadd.f32 %v8421_v54, %v6247_v44  ;;  %v6314_v15 = vpop.f32.mrb[79].mxu0  ;;  %v7237_v54 = vld [vmem:[%s12269_s8 + $0xa8] sm:$0xff] }
0x2e5b   : > { %v6315_v56 = vadd.f32 %v6314_v15, %v6247_v44  ;;  %v7238_v15 = vld [vmem:[%s12269_s8 + $0xb0] sm:$0xff] }
0x2e5c   : > { %v6334_v9 = vadd.f32 %v6320_v48, %v11387_v63  ;;  %v7218_v63 = vld [vmem:[%s12268_s7 + $0x90] sm:$0xff] }
0x2e5d   : > { %v6333_v17 = vadd.f32 %v6315_v56, %v11385_v39  ;;  %v8424_v6 = vpop.f32.mrb[80].mxu0  ;;  %v7217_v39 = vld [vmem:[%s12268_s7 + $0x88] sm:$0xff]  ;;  %v7239_v56 = vld [vmem:[%s12269_s8 + $0xb8] sm:$0xff] }
0x2e5e   : > { %6339 = vadd.xlane.f32.xlu1 %v6334_v9  ;;  %v6324_v13 = vpop.f32.mrb[81].mxu0  ;;  %v6330_v51 = vadd.f32 %v8424_v6, %v6247_v44  ;;  %v9171_v10 = vpack.c.bf16 %v7217_v39, %v7216_v52  ;;  %v7241_v6 = vld [vmem:[%s12269_s8 + $0xc8] sm:$0xff] }
0x2e5f   : > { %v6325_v34 = vadd.f32 %v6324_v13, %v6247_v44  ;;  %6337 = vadd.xlane.f32.xlu0 %v6333_v17  ;;  %v7236_v44 = vld [vmem:[%s12269_s8 + $0xa0] sm:$0xff]  ;;  %v7245_v52 = vld [vmem:[%s12269_s8 + $0xe8] sm:$0xff] }
0x2e60   : > { %v6336_v33 = vadd.f32 %v6330_v51, %v11399_v32  ;;  %v7220_v32 = vld [vmem:[%s12268_s7 + $0xa0] sm:$0xff]  ;;  %9172 = vmatprep.subr.bf16.mxu1 %v9171_v10  ;;  %v9211_v48 = vpack.c.bf16 %v7237_v54, %v7236_v44  ;;  %v7243_v51 = vld [vmem:[%s12269_s8 + $0xd8] sm:$0xff] }
0x2e61   : > { %v6335_v29 = vadd.f32 %v6325_v34, %v11397_v59  ;;  %v7219_v59 = vld [vmem:[%s12268_s7 + $0x98] sm:$0xff]  ;;  %9174 = vmatpush3.bf16.msra.mxu1 %v9171_v10  ;;  %v9179_v2 = vpack.c.bf16 %v7221_v36, %v7220_v32  ;;  %v7242_v34 = vld [vmem:[%s12269_s8 + $0xd0] sm:$0xff] }
0x2e62   : > { %v9175_v57 = vpack.c.bf16 %v7219_v59, %v7218_v63  ;;  %9212 = vmatprep.subr.bf16.mxu0 %v9211_v48 }
0x2e63   : > { %6341 = vadd.xlane.f32.xlu0 %v6335_v29  ;;  %9214 = vmatpush3.bf16.msra.mxu0 %v9211_v48 }
0x2e64   : > { %9176 = vmatprep.subr.bf16.mxu1 %v9175_v57 }
0x2e65   : > { %9178 = vmatpush3.bf16.msra.mxu1 %v9175_v57 }
0x2e66   : > { %9180 = vmatprep.subr.bf16.mxu1 %v9179_v2 }
0x2e67   : > { %6343 = vadd.xlane.f32.xlu0 %v6336_v33 }
0x2e69   : > { %9182 = vmatpush3.bf16.msra.mxu1 %v9179_v2 }
0x2e6a   : > { %9184 = vmatprep.subr.bf16.mxu1 %v9183_v41 }
0x2e6d   : > { %9186 = vmatpush3.bf16.msra.mxu1 %v9183_v41 }
0x2e6e   : > { %9188 = vmatprep.subr.bf16.mxu1 %v9187_v50 }
0x2e71   : > { %9190 = vmatpush3.bf16.msra.mxu1 %v9187_v50 }
0x2e72   : > { %9192 = vmatprep.subr.bf16.mxu1 %v9191_v3 }
0x2e75   : > { %9194 = vmatpush3.bf16.msra.mxu1 %v9191_v3 }
0x2e76   : > { %9196 = vmatprep.subr.bf16.mxu1 %v9195_v23 }
0x2e79   : > { %9198 = vmatpush3.bf16.msra.mxu1 %v9195_v23 }
0x2e7a   : > { %9200 = vmatprep.subr.bf16.mxu1 %v9199_v58 }
0x2e7d   : > { %9202 = vmatpush3.bf16.msra.mxu1 %v9199_v58  ;;  %v6417_v58 = vrot.slane %v11932_v19, %v12329_v14 }
0x2eeb   : > { %v6340_v40 = vpop.xlane.xlu1 %6339 }
0x2eec   : > { %v6346_v55 = vmul.f32 0.0078125, %v6340_v40  ;;  %v6338_v47 = vpop.xlane.xlu0 %6337 }
0x2eed   : > { %v6345_v42 = vmul.f32 0.0078125, %v6338_v47 }
0x2eee   : > { %v11959_v28 = vsub.f32 %v6334_v9, %v6346_v55  ;;  %v9215_v9 = vpack.c.bf16 %v7239_v56, %v7238_v15 }
0x2eef   : > { %v11961_v61 = vsub.f32 %v6333_v17, %v6345_v42  ;;  %v7240_v17 = vld [vmem:[%s12269_s8 + $0xc0] sm:$0xff] }
0x2ef0   : > { %v6342_v46 = vpop.xlane.xlu0 %6341  ;;  %v6354_v8 = vmul.f32 %v11959_v28, %v11959_v28  ;;  %9216 = vmatprep.subr.bf16.mxu0 %v9215_v9  ;;  %v9219_v13 = vpack.c.bf16 %v7241_v6, %v7240_v17 }
0x2ef1   : > { %v6347_v1 = vmul.f32 0.0078125, %v6342_v46  ;;  %v6353_v45 = vmul.f32 %v11961_v61, %v11961_v61  ;;  %9218 = vmatpush3.bf16.msra.mxu0 %v9215_v9  ;;  %v12330_v9 = vsub.s32 7, %v10493_v26 }
0x2ef2   : > { %6359 = vadd.xlane.f32.xlu1 %v6354_v8  ;;  %9220 = vmatprep.subr.bf16.mxu0 %v9219_v13  ;;  %v12327_v8 = vsub.s32 4, %v10493_v26 }
0x2ef3   : > { %v11967_v25 = vsub.f32 %v6335_v29, %v6347_v1  ;;  %6357 = vadd.xlane.f32.xlu0 %v6353_v45  ;;  %v9223_v29 = vpack.c.bf16 %v7243_v51, %v7242_v34  ;;  %v6527_v17 = vrot.slane %v11932_v19, %v12330_v9  ;;  %v6781_v9 = vld [vmem:[%s12271_s10 + $0x28] sm:$0xff] }
0x2ef4   : > { %v6344_v62 = vpop.xlane.xlu0 %6343  ;;  %v6384_v1 = vrot.slane %v11932_v19, %v12327_v8 }
0x2ef5   : > { %v6348_v49 = vmul.f32 0.0078125, %v6344_v62  ;;  %v6355_v5 = vmul.f32 %v11967_v25, %v11967_v25  ;;  %9222 = vmatpush3.bf16.msra.mxu0 %v9219_v13 }
0x2ef6   : > { %9224 = vmatprep.subr.bf16.mxu0 %v9223_v29 }
0x2ef7   : > { %v11971_v60 = vsub.f32 %v6336_v33, %v6348_v49  ;;  %6361 = vadd.xlane.f32.xlu0 %v6355_v5  ;;  %v7244_v33 = vld [vmem:[%s12269_s8 + $0xe0] sm:$0xff] }
0x2ef8   : > { %v9227_v39 = vpack.c.bf16 %v7245_v52, %v7244_v33 }
0x2ef9   : > { %v6356_v37 = vmul.f32 %v11971_v60, %v11971_v60  ;;  %9226 = vmatpush3.bf16.msra.mxu0 %v9223_v29 }
0x2efa   : > { %9228 = vmatprep.subr.bf16.mxu0 %v9227_v39 }
0x2efb   : > { %6363 = vadd.xlane.f32.xlu1 %v6356_v37  ;;  %v12328_v37 = vsub.s32 5, %v10493_v26 }
0x2efd   : > { %9230 = vmatpush3.bf16.msra.mxu0 %v9227_v39  ;;  %v6392_v7 = vrot.slane %v11932_v19, %v12328_v37  ;;  %v6688_v37 = vld [vmem:[%s12270_s9] sm:$0xff] }
0x2f7f   : > { %v6360_v63 = vpop.xlane.xlu1 %6359 }
0x2f80   : > { %v6366_v10 = vmul.f32 0.0078125, %v6360_v63  ;;  %v6358_v59 = vpop.xlane.xlu0 %6357 }
0x2f81   : > { %v6365_v57 = vmul.f32 0.0078125, %v6358_v59 }
0x2f82   : > { %v6370_v32 = vadd.f32 1e-05, %v6366_v10 }
0x2f83   : > { %v6369_v36 = vadd.f32 1e-05, %v6365_v57 }
0x2f84   : > { %10032 = vrsqrt.f32 %v6370_v32  ;;  %v6362_v2 = vpop.xlane.xlu0 %6361 }
0x2f85   : > { %10034 = vrsqrt.f32 %v6369_v36  ;;  %v6367_v40 = vmul.f32 0.0078125, %v6362_v2 }
0x2f87   : > { %v6371_v55 = vadd.f32 1e-05, %v6367_v40 }
0x2f88   : > { %v6364_v47 = vpop.xlane.xlu1 %6363 }
0x2f89   : > { %10036 = vrsqrt.f32 %v6371_v55  ;;  %v6368_v42 = vmul.f32 0.0078125, %v6364_v47 }
0x2f8b   : > { %v6372_v46 = vadd.f32 1e-05, %v6368_v42 }
0x2f8d   : > { %10038 = vrsqrt.f32 %v6372_v46 }
0x2f8e   : > { %v10033_v45 = vpop.eup %10032 }
0x2f8f   : > { %v10035_v62 = vpop.eup %10034  ;;  %v6378_v49 = vmul.f32 %v10033_v45, %v11959_v28 }
0x2f90   : > { %v6377_v5 = vmul.f32 %v10035_v62, %v11961_v61 }
0x2f91   : > { %v6386_v0 = vmul.f32 %v6384_v1, %v6378_v49 }
0x2f92   : > { %v6385_v41 = vmul.f32 %v6384_v1, %v6377_v5 }
0x2f93   : > { %v10037_v53 = vpop.eup %10036  ;;  %v6394_v4 = vadd.f32 %v6392_v7, %v6386_v0 }
0x2f94   : > { %v6393_v30 = vadd.f32 %v6392_v7, %v6385_v41  ;;  %v6379_v50 = vmul.f32 %v10037_v53, %v11967_v25  ;;  %v7247_v25 = vld [vmem:[%s12269_s8 + $0xf8] sm:$0xff]  ;;  %v10122_v41 = vmov 0.0|0.0   ;;  %v6690_v53 = vld [vmem:[%s12270_s9 + $0x10] sm:$0xff] }
0x2f95   : > { %v9231_v23 = vpack.c.bf16 %v7247_v25, %v7246_v18  ;;  %9235 = vmatprep.subr.bf16.mxu1 %v10122_v41  ;;  %v6697_v18 = vld [vmem:[%s12270_s9 + $0x48] sm:$0xff] }
0x2f96   : > { %8457 = vmatprep.mubr.f32.mxu1 %v6393_v30  ;;  %v6387_v38 = vmul.f32 %v6384_v1, %v6379_v50 }
0x2f97   : > { %v10039_v3 = vpop.eup %10038  ;;  %8458 = vmatmul.mubr.f32.vlgmr.msra.gmra.mrb[90].mxu1 %v6394_v4  ;;  %9232 = vmatprep.subr.bf16.mxu0 %v9231_v23 }
0x2f98   : > { %v6395_v24 = vadd.f32 %v6392_v7, %v6387_v38  ;;  %v6380_v28 = vmul.f32 %v10039_v3, %v11971_v60  ;;  %9234 = vmatpush3.bf16.msra.mxu0 %v9231_v23  ;;  %v6693_v38 = vld [vmem:[%s12270_s9 + $0x28] sm:$0xff]  ;;  %v6699_v23 = vld [vmem:[%s12270_s9 + $0x58] sm:$0xff] }
0x2f99   : > { %9259 = vmatprep.subr.bf16.mxu0 %v10122_v41 }
0x2f9a   : > { %8460 = vmatprep.mubr.f32.mxu1 %v6395_v24  ;;  %v6388_v61 = vmul.f32 %v6384_v1, %v6380_v28  ;;  %v6695_v28 = vld [vmem:[%s12270_s9 + $0x38] sm:$0xff] }
0x2f9c   : > { %v6396_v35 = vadd.f32 %v6392_v7, %v6388_v61  ;;  %v6689_v7 = vld [vmem:[%s12270_s9 + $0x8] sm:$0xff] }
0x2f9d   : > { %v9236_v0 = vpack.c.bf16 %v6689_v7, %v6688_v37  ;;  %v7055_v37 = vld [vmem:[%s12273_s12 + $0x18] sm:$0x3] }
0x2f9e   : > { %8461 = vmatmul.mubr.f32.gmra.mrb[92].mxu1 %v6396_v35 }
0x2f9f   : > { %9237 = vmatpush3.bf16.msra.mxu1 %v9236_v0  ;;  %8533 = vmatprep.mubr.msk.f32.mxu1 %vm10123_vm8, %v12316_v11 }
0x2fa0   : > { %9238 = vmatprep.subr.bf16.mxu1 %v10122_v41 }
0x306a   : > { %v8459_v60 = vpop.f32.mrb[90].mxu1 }
0x306b   : > { %v6490_v12 = vadd.f32 %v8459_v60, %v6417_v58  ;;  %v6484_v21 = vpop.f32.mrb[91].mxu1  ;;  %v6701_v60 = vld [vmem:[%s12270_s9 + $0x68] sm:$0xff] }
0x306c   : > { %v6485_v20 = vadd.f32 %v6484_v21, %v6417_v58  ;;  %v6702_v21 = vld [vmem:[%s12270_s9 + $0x70] sm:$0xff] }
0x306d   : > { %v6504_v43 = vmax.f32 %v6490_v12, 0.0 }
0x306e   : > { %v6503_v22 = vmax.f32 %v6485_v20, 0.0  ;;  %v6703_v20 = vld [vmem:[%s12270_s9 + $0x78] sm:$0xff] }
0x3070   : > { %8495 = vmatprep.mubr.f32.mxu0 %v6503_v22  ;;  %v9257_v22 = vpack.c.bf16 %v6703_v20, %v6702_v21 }
0x3071   : > { %v8462_v16 = vpop.f32.mrb[92].mxu1  ;;  %8496 = vmatmul.mubr.f32.vlgmr.msra.gmra.mrb[82].mxu0 %v6504_v43  ;;  %v6776_v43 = vld [vmem:[%s12271_s10] sm:$0xff] }
0x3072   : > { %v6500_v44 = vadd.f32 %v8462_v16, %v6417_v58  ;;  %v6494_v54 = vpop.f32.mrb[93].mxu1  ;;  %v6777_v16 = vld [vmem:[%s12271_s10 + $0x8] sm:$0xff] }
0x3073   : > { %v6495_v48 = vadd.f32 %v6494_v54, %v6417_v58  ;;  %v6700_v58 = vld [vmem:[%s12270_s9 + $0x60] sm:$0xff]  ;;  %v9260_v54 = vpack.c.bf16 %v6777_v16, %v6776_v43  ;;  %v6791_v43 = vld [vmem:[%s12271_s10 + $0x78] sm:$0xff] }
0x3074   : > { %v6506_v56 = vmax.f32 %v6500_v44, 0.0  ;;  %v9254_v12 = vpack.c.bf16 %v6701_v60, %v6700_v58  ;;  %v6778_v44 = vld [vmem:[%s12271_s10 + $0x10] sm:$0xff] }
0x3075   : > { %v6505_v15 = vmax.f32 %v6495_v48, 0.0  ;;  %v6779_v48 = vld [vmem:[%s12271_s10 + $0x18] sm:$0xff]  ;;  %9261 = vmatpush3.bf16.msra.mxu0 %v9260_v54 }
0x3076   : > { %9262 = vmatprep.subr.bf16.mxu0 %v10122_v41 }
0x3077   : > { %8498 = vmatprep.mubr.f32.mxu0 %v6505_v15  ;;  %v9263_v15 = vpack.c.bf16 %v6779_v48, %v6778_v44  ;;  %v6704_v44 = vld [vmem:[%s12272_s11 + $0x2] sm:$0x1] }
0x3078   : > { %8499 = vmatmul.mubr.f32.gmra.mrb[84].mxu0 %v6506_v56  ;;  %v6780_v56 = vld [vmem:[%s12271_s10 + $0x20] sm:$0xff] }
0x3079   : > { %8568 = vmatprep.mubr.msk.f32.mxu0 %vm10123_vm8, %v12316_v11  ;;  %v6698_v11 = vld [vmem:[%s12270_s9 + $0x50] sm:$0xff]  ;;  %9264 = vmatpush3.bf16.msra.mxu0 %v9263_v15 }
0x307a   : > { %v9251_v14 = vpack.c.bf16 %v6699_v23, %v6698_v11  ;;  %9265 = vmatprep.subr.bf16.mxu0 %v10122_v41 }
0x3144   : > { %v8497_v6 = vpop.f32.mrb[82].mxu0 }
0x3145   : > { %v6600_v13 = vadd.f32 %v8497_v6, %v6527_v17  ;;  %v6594_v34 = vpop.f32.mrb[83].mxu0  ;;  %v6782_v6 = vld [vmem:[%s12271_s10 + $0x30] sm:$0xff] }
0x3146   : > { %v6595_v51 = vadd.f32 %v6594_v34, %v6527_v17 }
0x3147   : > { %v6614_v29 = vadd.f32 %v6600_v13, %v6394_v4  ;;  %v6692_v4 = vld [vmem:[%s12270_s9 + $0x20] sm:$0xff]  ;;  %v6783_v13 = vld [vmem:[%s12271_s10 + $0x38] sm:$0xff] }
0x3148   : > { %v6613_v33 = vadd.f32 %v6595_v51, %v6393_v30  ;;  %v6691_v30 = vld [vmem:[%s12270_s9 + $0x18] sm:$0xff]  ;;  %v9242_v3 = vpack.c.bf16 %v6693_v38, %v6692_v4  ;;  %v9269_v34 = vpack.c.bf16 %v6783_v13, %v6782_v6  ;;  %v6784_v51 = vld [vmem:[%s12271_s10 + $0x40] sm:$0xff] }
0x3149   : > { %6619 = vadd.xlane.f32.xlu1 %v6614_v29  ;;  %v9239_v50 = vpack.c.bf16 %v6691_v30, %v6690_v53 }
0x314a   : > { %6617 = vadd.xlane.f32.xlu0 %v6613_v33 }
0x314b   : > { %v8500_v52 = vpop.f32.mrb[84].mxu0  ;;  %9240 = vmatpush3.bf16.msra.mxu1 %v9239_v50  ;;  %v6672_v50 = vrot.slane %v7055_v37, %v10504_v31 }
0x314c   : > { %v6610_v39 = vadd.f32 %v8500_v52, %v6527_v17  ;;  %v6604_v63 = vpop.f32.mrb[85].mxu0  ;;  %9241 = vmatprep.subr.bf16.mxu1 %v10122_v41  ;;  %v6786_v52 = vld [vmem:[%s12271_s10 + $0x50] sm:$0xff] }
0x314d   : > { %v6605_v10 = vadd.f32 %v6604_v63, %v6527_v17  ;;  %v9266_v17 = vpack.c.bf16 %v6781_v9, %v6780_v56  ;;  %v6792_v9 = vld [vmem:[%s12272_s11 + $0x3] sm:$0x1] }
0x314e   : > { %v6616_v59 = vadd.f32 %v6610_v39, %v6396_v35  ;;  %v6696_v35 = vld [vmem:[%s12270_s9 + $0x40] sm:$0xff]  ;;  %v6787_v39 = vld [vmem:[%s12271_s10 + $0x58] sm:$0xff] }
0x314f   : > { %v6615_v57 = vadd.f32 %v6605_v10, %v6395_v24  ;;  %v6694_v24 = vld [vmem:[%s12270_s9 + $0x30] sm:$0xff]  ;;  %9243 = vmatpush3.bf16.msra.mxu1 %v9242_v3  ;;  %v9248_v25 = vpack.c.bf16 %v6697_v18, %v6696_v35  ;;  %9267 = vmatpush3.bf16.msra.mxu0 %v9266_v17  ;;  %v9275_v63 = vpack.c.bf16 %v6787_v39, %v6786_v52  ;;  %v6788_v10 = vld [vmem:[%s12271_s10 + $0x60] sm:$0xff] }
0x3150   : > { %6623 = vadd.xlane.f32.xlu1 %v6616_v59  ;;  %v9245_v61 = vpack.c.bf16 %v6695_v28, %v6694_v24  ;;  %9244 = vmatprep.subr.bf16.mxu1 %v10122_v41 }
0x3151   : > { %6621 = vadd.xlane.f32.xlu0 %v6615_v57  ;;  %9268 = vmatprep.subr.bf16.mxu0 %v10122_v41 }
0x3153   : > { %9246 = vmatpush3.bf16.msra.mxu1 %v9245_v61  ;;  %9270 = vmatpush3.bf16.msra.mxu0 %v9269_v34 }
0x3154   : > { %9247 = vmatprep.subr.bf16.mxu1 %v10122_v41  ;;  %9271 = vmatprep.subr.bf16.mxu0 %v10122_v41 }
0x3157   : > { %9249 = vmatpush3.bf16.msra.mxu1 %v9248_v25 }
0x3158   : > { %9250 = vmatprep.subr.bf16.mxu1 %v10122_v41 }
0x315b   : > { %9252 = vmatpush3.bf16.msra.mxu1 %v9251_v14 }
0x315c   : > { %9253 = vmatprep.subr.bf16.mxu1 %v10122_v41 }
0x315f   : > { %9255 = vmatpush3.bf16.msra.mxu1 %v9254_v12 }
0x3160   : > { %9256 = vmatprep.subr.bf16.mxu1 %v10122_v41 }
0x3163   : > { %9258 = vmatpush3.bf16.msra.mxu1 %v9257_v22 }
0x31d6   : > { %v6620_v32 = vpop.xlane.xlu1 %6619 }
0x31d7   : > { %v6626_v26 = vmul.f32 0.0078125, %v6620_v32  ;;  %v6618_v36 = vpop.xlane.xlu0 %6617 }
0x31d8   : > { %v6625_v19 = vmul.f32 0.0078125, %v6618_v36 }
0x31d9   : > { %v12069_v2 = vsub.f32 %v6614_v29, %v6626_v26  ;;  %v6785_v29 = vld [vmem:[%s12271_s10 + $0x48] sm:$0xff] }
0x31da   : > { %v12071_v40 = vsub.f32 %v6613_v33, %v6625_v19  ;;  %v9272_v33 = vpack.c.bf16 %v6785_v29, %v6784_v51 }
0x31db   : > { %v6634_v55 = vmul.f32 %v12069_v2, %v12069_v2 }
0x31dc   : > { %v6633_v47 = vmul.f32 %v12071_v40, %v12071_v40  ;;  %9273 = vmatpush3.bf16.msra.mxu0 %v9272_v33 }
0x31dd   : > { %6639 = vadd.xlane.f32.xlu1 %v6634_v55  ;;  %v6624_v42 = vpop.xlane.xlu1 %6623  ;;  %9274 = vmatprep.subr.bf16.mxu0 %v10122_v41 }
0x31de   : > { %v6628_v46 = vmul.f32 0.0078125, %v6624_v42  ;;  %6637 = vadd.xlane.f32.xlu0 %v6633_v47  ;;  %v6622_v8 = vpop.xlane.xlu0 %6621 }
0x31df   : > { %v6627_v1 = vmul.f32 0.0078125, %v6622_v8 }
0x31e0   : > { %v12077_v45 = vsub.f32 %v6616_v59, %v6628_v46  ;;  %v6789_v59 = vld [vmem:[%s12271_s10 + $0x68] sm:$0xff]  ;;  %9276 = vmatpush3.bf16.msra.mxu0 %v9275_v63 }
0x31e1   : > { %v12079_v62 = vsub.f32 %v6615_v57, %v6627_v1  ;;  %v9278_v57 = vpack.c.bf16 %v6789_v59, %v6788_v10  ;;  %9277 = vmatprep.subr.bf16.mxu0 %v10122_v41 }
0x31e2   : > { %v6636_v49 = vmul.f32 %v12077_v45, %v12077_v45 }
0x31e3   : > { %v6635_v5 = vmul.f32 %v12079_v62, %v12079_v62 }
0x31e4   : > { %6643 = vadd.xlane.f32.xlu1 %v6636_v49  ;;  %9279 = vmatpush3.bf16.msra.mxu0 %v9278_v57 }
0x31e5   : > { %6641 = vadd.xlane.f32.xlu0 %v6635_v5  ;;  %9280 = vmatprep.subr.bf16.mxu0 %v10122_v41  ;;  %v6664_v41 = vrot.slane %v7055_v37, %v10496_v27 }
0x326a   : > { %v6640_v32 = vpop.xlane.xlu1 %6639 }
0x326b   : > { %v6646_v26 = vmul.f32 0.0078125, %v6640_v32  ;;  %v6638_v36 = vpop.xlane.xlu0 %6637 }
0x326c   : > { %v6645_v19 = vmul.f32 0.0078125, %v6638_v36 }
0x326d   : > { %v6650_v55 = vadd.f32 1e-05, %v6646_v26 }
0x326e   : > { %v6649_v47 = vadd.f32 1e-05, %v6645_v19 }
0x326f   : > { %10040 = vrsqrt.f32 %v6650_v55 }
0x3270   : > { %10042 = vrsqrt.f32 %v6649_v47 }
0x3271   : > { %v6644_v42 = vpop.xlane.xlu1 %6643 }
0x3272   : > { %v6648_v46 = vmul.f32 0.0078125, %v6644_v42  ;;  %v6642_v8 = vpop.xlane.xlu0 %6641 }
0x3273   : > { %v6647_v1 = vmul.f32 0.0078125, %v6642_v8 }
0x3274   : > { %v6652_v49 = vadd.f32 1e-05, %v6648_v46 }
0x3275   : > { %v6651_v5 = vadd.f32 1e-05, %v6647_v1 }
0x3276   : > { %10044 = vrsqrt.f32 %v6652_v49 }
0x3277   : > { %10046 = vrsqrt.f32 %v6651_v5 }
0x3279   : > { %v10041_v7 = vpop.eup %10040 }
0x327a   : > { %v10043_v0 = vpop.eup %10042  ;;  %v6658_v53 = vmul.f32 %v10041_v7, %v12069_v2 }
0x327b   : > { %v6657_v30 = vmul.f32 %v10043_v0, %v12071_v40 }
0x327c   : > { %v6666_v4 = vmul.f32 %v6664_v41, %v6658_v53 }
0x327d   : > { %v6665_v38 = vmul.f32 %v6664_v41, %v6657_v30 }
0x327e   : > { %v6674_v61 = vadd.f32 %v6672_v50, %v6666_v4 }
0x327f   : > { %v6673_v18 = vadd.f32 %v6672_v50, %v6665_v38 }
0x3280   : > { %v10045_v3 = vpop.eup %10044 }
0x3281   : > { %v10047_v24 = vpop.eup %10046  ;;  %v6660_v28 = vmul.f32 %v10045_v3, %v12077_v45  ;;  %v6677_v27 = vadd.f32 %v6674_v61, %v6673_v18 }
0x3282   : > { %v6659_v35 = vmul.f32 %v10047_v24, %v12079_v62  ;;  %v6790_v62 = vld [vmem:[%s12271_s10 + $0x70] sm:$0xff] }
0x3283   : > { %v6668_v25 = vmul.f32 %v6664_v41, %v6660_v28  ;;  %v9281_v16 = vpack.c.bf16 %v6791_v43, %v6790_v62 }
0x3284   : > { %v6667_v11 = vmul.f32 %v6664_v41, %v6659_v35 }
0x3285   : > { %v6676_v14 = vadd.f32 %v6672_v50, %v6668_v25  ;;  %9282 = vmatpush3.bf16.msra.mxu0 %v9281_v16 }
0x3286   : > { %v6675_v23 = vadd.f32 %v6672_v50, %v6667_v11 }
0x3288   : > { %v6678_v2 = vadd.f32 %v6677_v27, %v6675_v23 }
0x328a   : > { %v6679_v58 = vadd.f32 %v6678_v2, %v6676_v14 }
0x328c   : > { %v6680_v40 = vrot.slane %v6679_v58, 4 }
0x328e   : > { %v6681_v60 = vadd.f32 %v6680_v40, %v6679_v58 }
0x3290   : > { %v6682_v31 = vrot.slane %v6681_v60, 2 }
0x3292   : > { %v6683_v12 = vadd.f32 %v6682_v31, %v6681_v60 }
0x3294   : > { %v6684_v21 = vrot.slane %v6683_v12, 1 }
0x3296   : > { %v6685_v20 = vadd.f32 %v6684_v21, %v6683_v12 }
0x3298   : > { %v6686_v45 = vsub.f32 %v6685_v20, %v6673_v18 }
0x329a   : > { %v6687_v22 = vmul.f32 0.032258064, %v6686_v45 }
0x329c   : > { %8534 = vmatmul.mubr.f32.vlgmr.msra.gmra.mrb[94].mxu1 %v6687_v22 }
0x336f   : > { %v6771_v54 = vpop.f32.mrb[94].mxu1 }
0x3370   : > { %v6772_v48 = vadd.f32 %v6771_v54, %v6704_v44  ;;  %v8535_v15 = vpop.f32.mrb[95].mxu1 }
0x3372   : > { %v6775_v56 = vmax.f32 %v6772_v48, 0.0 }
0x3374   : > { %8569 = vmatmul.mubr.f32.vlgmr.msra.gmra.mrb[86].mxu0 %v6775_v56 }
0x3447   : > { %v6859_v17 = vpop.f32.mrb[86].mxu0 }
0x3448   : > { %v6860_v6 = vadd.f32 %v6859_v17, %v6792_v9  ;;  %v8570_v13 = vpop.f32.mrb[87].mxu0 }
0x344a   : > { %6863 = vst [vmem:[%s447_s23] sm:$0x1] %v6860_v6 }
0x344b   : > { %10063 = shalt.err (!%p10060_p3)
}
0x344c   : > { %s10064_s22 = scalar_lea.hbm %s12219_s24, 16  ;;  %s10068_s21 = scalar_lea.hbm %s12274_s13, 32 }
0x344d   : > { %p10065_p4 = scmp.ne.s32.totalorder %s12219_s24, %s10064_s22  ;;  %p10069_p9 = scmp.lt.u32.totalorder %s12219_s24, %s12274_s13 }
0x344e   : > { %p10070_p10 = scmp.lt.u32.totalorder %s10068_s21, %s10064_s22  ;;  %p10072_p12 = scmp.lt.u32.totalorder %s10064_s22, %s12219_s24 }
0x344f   : > { %p10066_p7 = pnand %p10065_p4, %p10233_p5 }
0x3450   : > { %p10071_p11 = por %p10070_p10, %p10069_p9 }
0x3451   : > { %p10067_p8 = pneg %p10066_p7 }
0x3452   : > { %p10073_p13 = por %p10072_p12, %p10071_p11 }
0x3454   : > { %p10074_p0 = pnand %p10073_p13, %p10067_p8 }
0x3456   : > { %10077 = shalt.err (!%p10074_p0)
}
0x3457   : > { %9283 = dma.vmem_to_hbm [thread:$0]  (%p10233_p5), %s12221_s0, 16, %s12219_s24, %s6865_s14  }
0x3458 PF: > { %p9289_p1 = scmp.ge.s32.totalorder %s10112_s28, 2  ;;  %s6889_s27 = sand.u32 1, %s10100_s25  }
0x3459   : > { %s6890_s16 = scalar_lea.sflag [#allocation3], %s6889_s27 }
0x345a   : > { %p9286_p2 = pnand %p9289_p1, %p10237_p6 }
0x345c   : > { %10095 = dma.done.wait (!%p9286_p2), %s6890_s16, 16  }
0x345d   : > { %10097 = vsyncadd (!%p9286_p2), %s6890_s16, 4294967280  ;;  %s12331_s28 = sld [smem:[#allocation6_spill]]  ;;  %s12332_s29 = sld [smem:[#allocation5_spill]] }
0x345e   : > { %s12333_s27 = sld [smem:[#allocation7_spill]]  ;;  %s12334_s25 = smov %s10104_s26 }
0x3463   : > { %p23_p3 = scmp.ge.s32.totalorder %s12331_s28, 4   ;;  %s12335_s26 = smov %s12332_s29 }
0x3465   :  { %25 = sbr.rel (!%p23_p3) target bundleno = 6 (0x6), region = 115 }
0x346c   :  { %6894 = vsyncpa [#allocation3], 1 }
0x346d   :  { %6896 = vsyncpa [#allocation3 + $0x1], 1 }

</bundles_post_ra>
